<compile_context>
chip_gen: v6e
topology: v6e:2x2x1
jax: 0.10.0
libtpu: 0.0.40
codegen_flags: <defaults>
</compile_context>

<pallas_src>
import functools
import math

import jax
import jax.numpy as jnp
from jax import lax
from jax.experimental import pallas as pl
from jax.experimental.pallas import tpu as pltpu


# ----------------------------- in-kernel helpers ---------------------------

def _mxu_dot(a, b):
    """MXU matmul: bf16 inputs, f32 accumulation."""
    return jnp.dot(a.astype(jnp.bfloat16), b.astype(jnp.bfloat16),
                   preferred_element_type=jnp.float32)


def _layernorm(h, g, b, eps):
    mean = jnp.mean(h, axis=-1, keepdims=True)
    c = h - mean
    var = jnp.mean(c * c, axis=-1, keepdims=True)
    return c * lax.rsqrt(var + eps) * g + b


def _mha(q, k, v, bias, num_heads, scale, need_weights):
    """Multi-head scaled-dot-product attention for one batch element.

    q: (Tq, D), k/v: (Tk, D), bias: (Tq, Tk) additive mask.
    Returns ((Tq, D) output, head-summed probs (Tq, Tk) or None).
    """
    D = q.shape[-1]
    Dh = D // num_heads
    head_outs = []
    p_sum = None
    for h in range(num_heads):
        lo = h * Dh
        qh = q[:, lo:lo + Dh]
        kh = k[:, lo:lo + Dh]
        vh = v[:, lo:lo + Dh]
        # scores = q @ k^T in f32 (tiny matmuls; f32 softmax statistics).
        s = lax.dot_general(qh, kh, (((1,), (1,)), ((), ())),
                            preferred_element_type=jnp.float32)
        s = s * scale + bias
        m = jnp.max(s, axis=-1, keepdims=True)
        e = jnp.exp(s - m)
        denom = jnp.sum(e, axis=-1, keepdims=True)
        p = e * pl.reciprocal(denom, approx=True)
        head_outs.append(jnp.dot(p, vh, preferred_element_type=jnp.float32))
        if need_weights:
            p_sum = p if p_sum is None else p_sum + p
    o = jnp.concatenate(head_outs, axis=-1)          # (Tq, D)
    return o, p_sum


# ------------------------- fused decoder-layer kernel ----------------------

def _decoder_layer_kernel(
        x_ref, enc_ref, sbias_ref, ebias_ref,
        w_qkv_ref, b_qkv_ref, w_so_ref, b_so_ref,
        w_eq_ref, b_eq_ref, w_ekv_ref, b_ekv_ref, w_eo_ref, b_eo_ref,
        g1_ref, bt1_ref, g2_ref, bt2_ref, g3_ref, bt3_ref,
        w_f1_ref, b_f1_ref, w_f2_ref, b_f2_ref,
        xo_ref, attn_ref,
        *, batch, tgt_len, src_len, num_heads, eps):
    D = x_ref.shape[-1]
    Dh = D // num_heads
    scale = 1.0 / math.sqrt(Dh)

    x = x_ref[...]                                           # (B*T, D)

    # ---------------- self-attention (post-norm) ----------------
    residual = x
    qkv = _mxu_dot(x, w_qkv_ref[...]) + b_qkv_ref[...]       # (B*T, 3D) fused QKV
    q = qkv[:, 0:D]
    k = qkv[:, D:2 * D]
    v = qkv[:, 2 * D:3 * D]
    rows = []
    for b in range(batch):
        r0 = b * tgt_len
        o_b, _ = _mha(q[r0:r0 + tgt_len], k[r0:r0 + tgt_len], v[r0:r0 + tgt_len],
                      sbias_ref[b], num_heads, scale, need_weights=False)
        rows.append(o_b)
    o = jnp.concatenate(rows, axis=0)                        # (B*T, D)
    y = _mxu_dot(o, w_so_ref[...]) + b_so_ref[...]
    # TODO(synk): dropout layers are identity (eval / inference mode).
    x = _layernorm(residual + y, g1_ref[...], bt1_ref[...], eps)

    # ---------------- encoder attention ----------------
    residual = x
    q = _mxu_dot(x, w_eq_ref[...]) + b_eq_ref[...]           # (B*T, D)
    # Encoder K/V: one fused matmul over ALL encoder rows, all batches at once.
    kv = _mxu_dot(enc_ref[...], w_ekv_ref[...]) + b_ekv_ref[...]   # (B*S, 2D)
    rows = []
    for b in range(batch):
        s0 = b * src_len
        k_b = kv[s0:s0 + src_len, 0:D]
        v_b = kv[s0:s0 + src_len, D:2 * D]
        r0 = b * tgt_len
        o_b, p_b = _mha(q[r0:r0 + tgt_len], k_b, v_b,
                        ebias_ref[b], num_heads, scale, need_weights=True)
        rows.append(o_b)
        # head-averaged attention weights: single (T, S) store per batch elem.
        attn_ref[b] = (p_b * (1.0 / num_heads)).astype(attn_ref.dtype)
    o = jnp.concatenate(rows, axis=0)
    y = _mxu_dot(o, w_eo_ref[...]) + b_eo_ref[...]
    x = _layernorm(residual + y, g2_ref[...], bt2_ref[...], eps)

    # ---------------- feed-forward ----------------
    residual = x
    h = jnp.maximum(_mxu_dot(x, w_f1_ref[...]) + b_f1_ref[...], 0.0)
    y = _mxu_dot(h, w_f2_ref[...]) + b_f2_ref[...]
    x = _layernorm(residual + y, g3_ref[...], bt3_ref[...], eps)

    xo_ref[...] = x.astype(xo_ref.dtype)


# -------------- fused output kernel: LN + projection + log-softmax ---------

def _output_kernel(x_ref, g_ref, b_ref, w_ref, o_ref, *, normalize, eps):
    x = x_ref[...]                                           # (B*T, D)
    if normalize:
        x = _layernorm(x, g_ref[...], b_ref[...], eps)
    # TODO(synk): for large vocabularies tile the projection / log-softmax over
    # vocab chunks (multiples of 128) so the weight block fits v7x's 64 MiB VMEM.
    logits = _mxu_dot(x, w_ref[...])                         # (B*T, V)
    m = jnp.max(logits, axis=-1, keepdims=True)
    lse = jnp.log(jnp.sum(jnp.exp(logits - m), axis=-1, keepdims=True)) + m
    o_ref[...] = (logits - lse).astype(o_ref.dtype)


# ------------------------------- wrappers -----------------------------------

def _vmem_specs(n):
    return [pl.BlockSpec(memory_space=pltpu.MemorySpace.VMEM) for _ in range(n)]


def pallas_decoder_layer(x, encoder_flat, self_bias, enc_bias, lp, *,
                         batch, tgt_len, src_len, num_heads, eps=1e-5):
    BT, D = x.shape
    inputs = [
        x, encoder_flat, self_bias, enc_bias,
        lp["self_attn"]["w_qkv"], lp["self_attn"]["b_qkv"],
        lp["self_attn"]["w_out"], lp["self_attn"]["b_out"],
        lp["enc_attn"]["w_q"], lp["enc_attn"]["b_q"],
        lp["enc_attn"]["w_kv"], lp["enc_attn"]["b_kv"],
        lp["enc_attn"]["w_out"], lp["enc_attn"]["b_out"],
        lp["ln_self_g"], lp["ln_self_b"],
        lp["ln_enc_g"], lp["ln_enc_b"],
        lp["ln_final_g"], lp["ln_final_b"],
        lp["fc1_w"], lp["fc1_b"], lp["fc2_w"], lp["fc2_b"],
    ]
    kernel = functools.partial(_decoder_layer_kernel, batch=batch,
                               tgt_len=tgt_len, src_len=src_len,
                               num_heads=num_heads, eps=eps)
    x_out, attn = pl.pallas_call(
        kernel,
        out_shape=(jax.ShapeDtypeStruct((BT, D), jnp.float32),
                   jax.ShapeDtypeStruct((batch, tgt_len, src_len), jnp.float32)),
        in_specs=_vmem_specs(len(inputs)),
        out_specs=tuple(_vmem_specs(2)),
    )(*inputs)
    return x_out, attn


def pallas_decoder_output(x, ln_g, ln_b, proj_w, *, normalize, eps=1e-5):
    BT, D = x.shape
    V = proj_w.shape[1]
    kernel = functools.partial(_output_kernel, normalize=normalize, eps=eps)
    return pl.pallas_call(
        kernel,
        out_shape=jax.ShapeDtypeStruct((BT, V), jnp.float32),
        in_specs=_vmem_specs(4),
        out_specs=pl.BlockSpec(memory_space=pltpu.MemorySpace.VMEM),
    )(x, ln_g, ln_b, proj_w)


# ----------------------------- parameter init -------------------------------

def xavier_uniform(key, fan_in, fan_out):
    a = math.sqrt(6.0 / (fan_in + fan_out))
    return jax.random.uniform(key, (fan_in, fan_out), jnp.float32, -a, a)


def init_self_attn_params(key, D):
    kq, kk, kv, ko = jax.random.split(key, 4)
    w_qkv = jnp.concatenate([xavier_uniform(kq, D, D),
                             xavier_uniform(kk, D, D),
                             xavier_uniform(kv, D, D)], axis=1)        # (D, 3D)
    return {"w_qkv": w_qkv,
            "b_qkv": jnp.zeros((1, 3 * D), jnp.float32),
            "w_out": xavier_uniform(ko, D, D),
            "b_out": jnp.zeros((1, D), jnp.float32)}


def init_enc_attn_params(key, D):
    kq, kk, kv, ko = jax.random.split(key, 4)
    w_kv = jnp.concatenate([xavier_uniform(kk, D, D),
                            xavier_uniform(kv, D, D)], axis=1)         # (D, 2D)
    return {"w_q": xavier_uniform(kq, D, D),
            "b_q": jnp.zeros((1, D), jnp.float32),
            "w_kv": w_kv,
            "b_kv": jnp.zeros((1, 2 * D), jnp.float32),
            "w_out": xavier_uniform(ko, D, D),
            "b_out": jnp.zeros((1, D), jnp.float32)}


def init_layer_params(key, D, Hd):
    ks = jax.random.split(key, 4)
    return {
        "self_attn": init_self_attn_params(ks[0], D),
        "enc_attn": init_enc_attn_params(ks[1], D),
        "ln_self_g": jnp.ones((1, D), jnp.float32),
        "ln_self_b": jnp.zeros((1, D), jnp.float32),
        "ln_enc_g": jnp.ones((1, D), jnp.float32),
        "ln_enc_b": jnp.zeros((1, D), jnp.float32),
        "ln_final_g": jnp.ones((1, D), jnp.float32),
        "ln_final_b": jnp.zeros((1, D), jnp.float32),
        "fc1_w": xavier_uniform(ks[2], D, Hd),
        "fc1_b": jnp.zeros((1, Hd), jnp.float32),
        "fc2_w": xavier_uniform(ks[3], Hd, D),
        "fc2_b": jnp.zeros((1, D), jnp.float32),
    }


def init_decoder_params(key, args, vocab_size):
    D = args["decoder_embed_dim"]
    Hd = args["decoder_hidden_dim"]
    keys = jax.random.split(key, args["decoder_layers"] + 2)
    return {
        "embedding": jax.random.normal(keys[0], (vocab_size, D), jnp.float32),
        "layers": [init_layer_params(keys[i + 1], D, Hd)
                   for i in range(args["decoder_layers"])],
        "proj_w": xavier_uniform(keys[-1], D, vocab_size),   # project_out_dim (no bias)
        "out_ln_g": jnp.ones((1, D), jnp.float32),
        "out_ln_b": jnp.zeros((1, D), jnp.float32),
    }


# ----------------------------- model forward --------------------------------

def make_self_attn_bias(tgt_lengths, tgt_len):
    # causal mask (query_mask=True) + target-length key padding mask, additive.
    q_idx = jnp.arange(tgt_len)[:, None]
    k_idx = jnp.arange(tgt_len)[None, :]
    causal = k_idx <= q_idx                                              # (T, T)
    keep = causal[None, :, :] & (k_idx[None, :, :] < tgt_lengths[:, None, None])
    return jnp.where(keep, 0.0, -1e9).astype(jnp.float32)                # (B, T, T)


def make_enc_attn_bias(src_lengths, tgt_len, src_len):
    k_idx = jnp.arange(src_len)[None, None, :]
    keep = k_idx < src_lengths[:, None, None]
    keep = jnp.broadcast_to(keep, (src_lengths.shape[0], tgt_len, src_len))
    return jnp.where(keep, 0.0, -1e9).astype(jnp.float32)                # (B, T, S)


def decoder_forward(params, args, output_tokens, src_lengths, tgt_lengths, encoder_out):
    B, T = output_tokens.shape
    S = encoder_out.shape[1]
    D = args["decoder_embed_dim"]
    H = args["decoder_attention_heads"]
    embed_scale = math.sqrt(D)

    x = params["embedding"][output_tokens] * embed_scale     # (B, T, D) glue gather
    # TODO(synk): SinusoidalPositionalEmbedding path not used (use_position_emb=False).
    # TODO(synk): top-level dropout is identity (eval / inference mode).
    x = x.reshape(B * T, D)                                  # flatten rows for MXU
    encoder_flat = encoder_out.reshape(B * S, D)             # one K/V matmul per layer

    self_bias = make_self_attn_bias(tgt_lengths, T)
    enc_bias = make_enc_attn_bias(src_lengths, T, S)

    inner_states = [x.reshape(B, T, D)]
    attn_states = []
    for lp in params["layers"]:
        x, attn = pallas_decoder_layer(x, encoder_flat, self_bias, enc_bias, lp,
                                       batch=B, tgt_len=T, src_len=S, num_heads=H)
        inner_states.append(x.reshape(B, T, D))
        attn_states.append(attn)

    out = pallas_decoder_output(x, params["out_ln_g"], params["out_ln_b"],
                                params["proj_w"],
                                normalize=args["output_normalize"])
    output = out.reshape(B, T, params["proj_w"].shape[1])
    return output, {"attn": attn_states, "inner_states": inner_states}


# --------------------------------- main --------------------------------------

if __name__ == "__main__":
    args = {
        "decoder_embed_dim": 32,
        "decoder_attention_heads": 4,
        "decoder_hidden_dim": 64,
        "decoder_layers": 2,
        "dropout": 0.1,
        "attention_dropout": 0.1,
        "decoder_normalize_before": False,
        "decoder_need_atten_weight": True,
        "output_normalize": True,
    }
    vocab_size = 50
    B, T, S = 2, 8, 10

    key = jax.random.PRNGKey(0)
    k_param, k_tok, k_enc = jax.random.split(key, 3)
    params = init_decoder_params(k_param, args, vocab_size)

    output_tokens = jax.random.randint(k_tok, (B, T), 0, vocab_size)
    encoder_out = jax.random.normal(k_enc, (B, S, args["decoder_embed_dim"]), jnp.float32)
    src_lengths = jnp.array([10, 7], dtype=jnp.int32)
    tgt_lengths = jnp.array([8, 5], dtype=jnp.int32)

    out, extras = decoder_forward(params, args, output_tokens,
                                  src_lengths, tgt_lengths, encoder_out)
    out = jax.block_until_ready(out)

    assert out.shape == (B, T, vocab_size)
    assert bool(jnp.all(jnp.isfinite(out)))
    assert len(extras["attn"]) == args["decoder_layers"]
    assert extras["attn"][0].shape == (B, T, S)
    print("KERNEL_OK")
</pallas_src>

<mosaic_0001>
module attributes {stable_mosaic.version = 11 : i64} {
  func.func @_decoder_layer_kernel(%arg0: memref<16x32xf32, #tpu.memory_space<vmem>>, %arg1: memref<20x32xf32, #tpu.memory_space<vmem>>, %arg2: memref<2x8x8xf32, #tpu.memory_space<vmem>>, %arg3: memref<2x8x10xf32, #tpu.memory_space<vmem>>, %arg4: memref<32x96xf32, #tpu.memory_space<vmem>>, %arg5: memref<1x96xf32, #tpu.memory_space<vmem>>, %arg6: memref<32x32xf32, #tpu.memory_space<vmem>>, %arg7: memref<1x32xf32, #tpu.memory_space<vmem>>, %arg8: memref<32x32xf32, #tpu.memory_space<vmem>>, %arg9: memref<1x32xf32, #tpu.memory_space<vmem>>, %arg10: memref<32x64xf32, #tpu.memory_space<vmem>>, %arg11: memref<1x64xf32, #tpu.memory_space<vmem>>, %arg12: memref<32x32xf32, #tpu.memory_space<vmem>>, %arg13: memref<1x32xf32, #tpu.memory_space<vmem>>, %arg14: memref<1x32xf32, #tpu.memory_space<vmem>>, %arg15: memref<1x32xf32, #tpu.memory_space<vmem>>, %arg16: memref<1x32xf32, #tpu.memory_space<vmem>>, %arg17: memref<1x32xf32, #tpu.memory_space<vmem>>, %arg18: memref<1x32xf32, #tpu.memory_space<vmem>>, %arg19: memref<1x32xf32, #tpu.memory_space<vmem>>, %arg20: memref<32x64xf32, #tpu.memory_space<vmem>>, %arg21: memref<1x64xf32, #tpu.memory_space<vmem>>, %arg22: memref<64x32xf32, #tpu.memory_space<vmem>>, %arg23: memref<1x32xf32, #tpu.memory_space<vmem>>, %arg24: memref<16x32xf32, #tpu.memory_space<vmem>>, %arg25: memref<2x8x10xf32, #tpu.memory_space<vmem>>) attributes {dimension_semantics = [], scalar_prefetch = 0 : i64, scratch_operands = 0 : i64, tpu.core_type = #tpu.core_type<tc>} {
    %c0 = arith.constant 0 : index
    %c0_0 = arith.constant 0 : index
    %0 = vector.load %arg0[%c0, %c0_0] : memref<16x32xf32, #tpu.memory_space<vmem>>, vector<16x32xf32>
    %c0_1 = arith.constant 0 : index
    %c0_2 = arith.constant 0 : index
    %1 = vector.load %arg4[%c0_1, %c0_2] : memref<32x96xf32, #tpu.memory_space<vmem>>, vector<32x96xf32>
    %2 = arith.truncf %0 : vector<16x32xf32> to vector<16x32xbf16>
    %3 = arith.truncf %1 : vector<32x96xf32> to vector<32x96xbf16>
    %cst = arith.constant dense<0.000000e+00> : vector<16x96xf32>
    %4 = tpu.matmul %2, %3, %cst {dimension_numbers = #tpu.dot_dimension_numbers<[1], [0], [0], [1], [0, 0, 1, 1], [], []>} : vector<16x32xbf16>, vector<32x96xbf16>, vector<16x96xf32> -> vector<16x96xf32>
    %c0_3 = arith.constant 0 : index
    %c0_4 = arith.constant 0 : index
    %5 = vector.load %arg5[%c0_3, %c0_4] : memref<1x96xf32, #tpu.memory_space<vmem>>, vector<1x96xf32>
    %6 = vector.broadcast %5 : vector<1x96xf32> to vector<16x96xf32>
    %7 = arith.addf %4, %6 : vector<16x96xf32>
    %8 = vector.extract_strided_slice %7 {offsets = [0, 0], sizes = [16, 32], strides = [1, 1]} : vector<16x96xf32> to vector<16x32xf32>
    %9 = vector.extract_strided_slice %7 {offsets = [0, 32], sizes = [16, 32], strides = [1, 1]} : vector<16x96xf32> to vector<16x32xf32>
    %10 = vector.extract_strided_slice %7 {offsets = [0, 64], sizes = [16, 32], strides = [1, 1]} : vector<16x96xf32> to vector<16x32xf32>
    %11 = vector.extract_strided_slice %8 {offsets = [0, 0], sizes = [8, 32], strides = [1, 1]} : vector<16x32xf32> to vector<8x32xf32>
    %12 = vector.extract_strided_slice %9 {offsets = [0, 0], sizes = [8, 32], strides = [1, 1]} : vector<16x32xf32> to vector<8x32xf32>
    %13 = vector.extract_strided_slice %10 {offsets = [0, 0], sizes = [8, 32], strides = [1, 1]} : vector<16x32xf32> to vector<8x32xf32>
    %c0_5 = arith.constant 0 : index
    %c0_6 = arith.constant 0 : index
    %c0_7 = arith.constant 0 : index
    %14 = vector.load %arg2[%c0_5, %c0_6, %c0_7] : memref<2x8x8xf32, #tpu.memory_space<vmem>>, vector<1x8x8xf32>
    %15 = vector.shape_cast %14 : vector<1x8x8xf32> to vector<8x8xf32>
    %16 = vector.extract_strided_slice %11 {offsets = [0, 0], sizes = [8, 8], strides = [1, 1]} : vector<8x32xf32> to vector<8x8xf32>
    %17 = vector.extract_strided_slice %12 {offsets = [0, 0], sizes = [8, 8], strides = [1, 1]} : vector<8x32xf32> to vector<8x8xf32>
    %18 = vector.extract_strided_slice %13 {offsets = [0, 0], sizes = [8, 8], strides = [1, 1]} : vector<8x32xf32> to vector<8x8xf32>
    %cst_8 = arith.constant dense<0.000000e+00> : vector<8x8xf32>
    %19 = tpu.matmul %16, %17, %cst_8 {dimension_numbers = #tpu.dot_dimension_numbers<[1], [1], [0], [0], [0, 0, 1, 0], [], []>} : vector<8x8xf32>, vector<8x8xf32>, vector<8x8xf32> -> vector<8x8xf32>
    %cst_9 = arith.constant 0.353553385 : f32
    %20 = vector.broadcast %cst_9 : f32 to vector<8x8xf32>
    %21 = arith.mulf %19, %20 : vector<8x8xf32>
    %22 = arith.addf %21, %15 : vector<8x8xf32>
    %cst_10 = arith.constant dense<0xFF800000> : vector<8xf32>
    %23 = vector.multi_reduction <maximumf>, %22, %cst_10 [1] : vector<8x8xf32> to vector<8xf32>
    %24 = vector.shape_cast %23 : vector<8xf32> to vector<8x1xf32>
    %25 = vector.broadcast %24 : vector<8x1xf32> to vector<8x8xf32>
    %26 = arith.subf %22, %25 : vector<8x8xf32>
    %27 = math.exp %26 : vector<8x8xf32>
    %cst_11 = arith.constant dense<0.000000e+00> : vector<8xf32>
    %28 = vector.multi_reduction <add>, %27, %cst_11 [1] : vector<8x8xf32> to vector<8xf32>
    %29 = vector.shape_cast %28 : vector<8xf32> to vector<8x1xf32>
    %30 = tpu.reciprocal %29 {approx = true} : vector<8x1xf32> -> vector<8x1xf32>
    %31 = vector.broadcast %30 : vector<8x1xf32> to vector<8x8xf32>
    %32 = arith.mulf %27, %31 : vector<8x8xf32>
    %cst_12 = arith.constant dense<0.000000e+00> : vector<8x8xf32>
    %33 = tpu.matmul %32, %18, %cst_12 {dimension_numbers = #tpu.dot_dimension_numbers<[1], [0], [0], [1], [0, 0, 1, 1], [], []>} : vector<8x8xf32>, vector<8x8xf32>, vector<8x8xf32> -> vector<8x8xf32>
    %34 = vector.extract_strided_slice %11 {offsets = [0, 8], sizes = [8, 8], strides = [1, 1]} : vector<8x32xf32> to vector<8x8xf32>
    %35 = vector.extract_strided_slice %12 {offsets = [0, 8], sizes = [8, 8], strides = [1, 1]} : vector<8x32xf32> to vector<8x8xf32>
    %36 = vector.extract_strided_slice %13 {offsets = [0, 8], sizes = [8, 8], strides = [1, 1]} : vector<8x32xf32> to vector<8x8xf32>
    %cst_13 = arith.constant dense<0.000000e+00> : vector<8x8xf32>
    %37 = tpu.matmul %34, %35, %cst_13 {dimension_numbers = #tpu.dot_dimension_numbers<[1], [1], [0], [0], [0, 0, 1, 0], [], []>} : vector<8x8xf32>, vector<8x8xf32>, vector<8x8xf32> -> vector<8x8xf32>
    %cst_14 = arith.constant 0.353553385 : f32
    %38 = vector.broadcast %cst_14 : f32 to vector<8x8xf32>
    %39 = arith.mulf %37, %38 : vector<8x8xf32>
    %40 = arith.addf %39, %15 : vector<8x8xf32>
    %cst_15 = arith.constant dense<0xFF800000> : vector<8xf32>
    %41 = vector.multi_reduction <maximumf>, %40, %cst_15 [1] : vector<8x8xf32> to vector<8xf32>
    %42 = vector.shape_cast %41 : vector<8xf32> to vector<8x1xf32>
    %43 = vector.broadcast %42 : vector<8x1xf32> to vector<8x8xf32>
    %44 = arith.subf %40, %43 : vector<8x8xf32>
    %45 = math.exp %44 : vector<8x8xf32>
    %cst_16 = arith.constant dense<0.000000e+00> : vector<8xf32>
    %46 = vector.multi_reduction <add>, %45, %cst_16 [1] : vector<8x8xf32> to vector<8xf32>
    %47 = vector.shape_cast %46 : vector<8xf32> to vector<8x1xf32>
    %48 = tpu.reciprocal %47 {approx = true} : vector<8x1xf32> -> vector<8x1xf32>
    %49 = vector.broadcast %48 : vector<8x1xf32> to vector<8x8xf32>
    %50 = arith.mulf %45, %49 : vector<8x8xf32>
    %cst_17 = arith.constant dense<0.000000e+00> : vector<8x8xf32>
    %51 = tpu.matmul %50, %36, %cst_17 {dimension_numbers = #tpu.dot_dimension_numbers<[1], [0], [0], [1], [0, 0, 1, 1], [], []>} : vector<8x8xf32>, vector<8x8xf32>, vector<8x8xf32> -> vector<8x8xf32>
    %52 = vector.extract_strided_slice %11 {offsets = [0, 16], sizes = [8, 8], strides = [1, 1]} : vector<8x32xf32> to vector<8x8xf32>
    %53 = vector.extract_strided_slice %12 {offsets = [0, 16], sizes = [8, 8], strides = [1, 1]} : vector<8x32xf32> to vector<8x8xf32>
    %54 = vector.extract_strided_slice %13 {offsets = [0, 16], sizes = [8, 8], strides = [1, 1]} : vector<8x32xf32> to vector<8x8xf32>
    %cst_18 = arith.constant dense<0.000000e+00> : vector<8x8xf32>
    %55 = tpu.matmul %52, %53, %cst_18 {dimension_numbers = #tpu.dot_dimension_numbers<[1], [1], [0], [0], [0, 0, 1, 0], [], []>} : vector<8x8xf32>, vector<8x8xf32>, vector<8x8xf32> -> vector<8x8xf32>
    %cst_19 = arith.constant 0.353553385 : f32
    %56 = vector.broadcast %cst_19 : f32 to vector<8x8xf32>
    %57 = arith.mulf %55, %56 : vector<8x8xf32>
    %58 = arith.addf %57, %15 : vector<8x8xf32>
    %cst_20 = arith.constant dense<0xFF800000> : vector<8xf32>
    %59 = vector.multi_reduction <maximumf>, %58, %cst_20 [1] : vector<8x8xf32> to vector<8xf32>
    %60 = vector.shape_cast %59 : vector<8xf32> to vector<8x1xf32>
    %61 = vector.broadcast %60 : vector<8x1xf32> to vector<8x8xf32>
    %62 = arith.subf %58, %61 : vector<8x8xf32>
    %63 = math.exp %62 : vector<8x8xf32>
    %cst_21 = arith.constant dense<0.000000e+00> : vector<8xf32>
    %64 = vector.multi_reduction <add>, %63, %cst_21 [1] : vector<8x8xf32> to vector<8xf32>
    %65 = vector.shape_cast %64 : vector<8xf32> to vector<8x1xf32>
    %66 = tpu.reciprocal %65 {approx = true} : vector<8x1xf32> -> vector<8x1xf32>
    %67 = vector.broadcast %66 : vector<8x1xf32> to vector<8x8xf32>
    %68 = arith.mulf %63, %67 : vector<8x8xf32>
    %cst_22 = arith.constant dense<0.000000e+00> : vector<8x8xf32>
    %69 = tpu.matmul %68, %54, %cst_22 {dimension_numbers = #tpu.dot_dimension_numbers<[1], [0], [0], [1], [0, 0, 1, 1], [], []>} : vector<8x8xf32>, vector<8x8xf32>, vector<8x8xf32> -> vector<8x8xf32>
    %70 = vector.extract_strided_slice %11 {offsets = [0, 24], sizes = [8, 8], strides = [1, 1]} : vector<8x32xf32> to vector<8x8xf32>
    %71 = vector.extract_strided_slice %12 {offsets = [0, 24], sizes = [8, 8], strides = [1, 1]} : vector<8x32xf32> to vector<8x8xf32>
    %72 = vector.extract_strided_slice %13 {offsets = [0, 24], sizes = [8, 8], strides = [1, 1]} : vector<8x32xf32> to vector<8x8xf32>
    %cst_23 = arith.constant dense<0.000000e+00> : vector<8x8xf32>
    %73 = tpu.matmul %70, %71, %cst_23 {dimension_numbers = #tpu.dot_dimension_numbers<[1], [1], [0], [0], [0, 0, 1, 0], [], []>} : vector<8x8xf32>, vector<8x8xf32>, vector<8x8xf32> -> vector<8x8xf32>
    %cst_24 = arith.constant 0.353553385 : f32
    %74 = vector.broadcast %cst_24 : f32 to vector<8x8xf32>
    %75 = arith.mulf %73, %74 : vector<8x8xf32>
    %76 = arith.addf %75, %15 : vector<8x8xf32>
    %cst_25 = arith.constant dense<0xFF800000> : vector<8xf32>
    %77 = vector.multi_reduction <maximumf>, %76, %cst_25 [1] : vector<8x8xf32> to vector<8xf32>
    %78 = vector.shape_cast %77 : vector<8xf32> to vector<8x1xf32>
    %79 = vector.broadcast %78 : vector<8x1xf32> to vector<8x8xf32>
    %80 = arith.subf %76, %79 : vector<8x8xf32>
    %81 = math.exp %80 : vector<8x8xf32>
    %cst_26 = arith.constant dense<0.000000e+00> : vector<8xf32>
    %82 = vector.multi_reduction <add>, %81, %cst_26 [1] : vector<8x8xf32> to vector<8xf32>
    %83 = vector.shape_cast %82 : vector<8xf32> to vector<8x1xf32>
    %84 = tpu.reciprocal %83 {approx = true} : vector<8x1xf32> -> vector<8x1xf32>
    %85 = vector.broadcast %84 : vector<8x1xf32> to vector<8x8xf32>
    %86 = arith.mulf %81, %85 : vector<8x8xf32>
    %cst_27 = arith.constant dense<0.000000e+00> : vector<8x8xf32>
    %87 = tpu.matmul %86, %72, %cst_27 {dimension_numbers = #tpu.dot_dimension_numbers<[1], [0], [0], [1], [0, 0, 1, 1], [], []>} : vector<8x8xf32>, vector<8x8xf32>, vector<8x8xf32> -> vector<8x8xf32>
    %88 = tpu.concatenate %33, %51, %69, %87 in 1 : vector<8x8xf32>, vector<8x8xf32>, vector<8x8xf32>, vector<8x8xf32> -> vector<8x32xf32>
    %89 = vector.extract_strided_slice %8 {offsets = [8, 0], sizes = [8, 32], strides = [1, 1]} : vector<16x32xf32> to vector<8x32xf32>
    %90 = vector.extract_strided_slice %9 {offsets = [8, 0], sizes = [8, 32], strides = [1, 1]} : vector<16x32xf32> to vector<8x32xf32>
    %91 = vector.extract_strided_slice %10 {offsets = [8, 0], sizes = [8, 32], strides = [1, 1]} : vector<16x32xf32> to vector<8x32xf32>
    %c1 = arith.constant 1 : index
    %c0_28 = arith.constant 0 : index
    %c0_29 = arith.constant 0 : index
    %92 = vector.load %arg2[%c1, %c0_28, %c0_29] : memref<2x8x8xf32, #tpu.memory_space<vmem>>, vector<1x8x8xf32>
    %93 = vector.shape_cast %92 : vector<1x8x8xf32> to vector<8x8xf32>
    %94 = vector.extract_strided_slice %89 {offsets = [0, 0], sizes = [8, 8], strides = [1, 1]} : vector<8x32xf32> to vector<8x8xf32>
    %95 = vector.extract_strided_slice %90 {offsets = [0, 0], sizes = [8, 8], strides = [1, 1]} : vector<8x32xf32> to vector<8x8xf32>
    %96 = vector.extract_strided_slice %91 {offsets = [0, 0], sizes = [8, 8], strides = [1, 1]} : vector<8x32xf32> to vector<8x8xf32>
    %cst_30 = arith.constant dense<0.000000e+00> : vector<8x8xf32>
    %97 = tpu.matmul %94, %95, %cst_30 {dimension_numbers = #tpu.dot_dimension_numbers<[1], [1], [0], [0], [0, 0, 1, 0], [], []>} : vector<8x8xf32>, vector<8x8xf32>, vector<8x8xf32> -> vector<8x8xf32>
    %cst_31 = arith.constant 0.353553385 : f32
    %98 = vector.broadcast %cst_31 : f32 to vector<8x8xf32>
    %99 = arith.mulf %97, %98 : vector<8x8xf32>
    %100 = arith.addf %99, %93 : vector<8x8xf32>
    %cst_32 = arith.constant dense<0xFF800000> : vector<8xf32>
    %101 = vector.multi_reduction <maximumf>, %100, %cst_32 [1] : vector<8x8xf32> to vector<8xf32>
    %102 = vector.shape_cast %101 : vector<8xf32> to vector<8x1xf32>
    %103 = vector.broadcast %102 : vector<8x1xf32> to vector<8x8xf32>
    %104 = arith.subf %100, %103 : vector<8x8xf32>
    %105 = math.exp %104 : vector<8x8xf32>
    %cst_33 = arith.constant dense<0.000000e+00> : vector<8xf32>
    %106 = vector.multi_reduction <add>, %105, %cst_33 [1] : vector<8x8xf32> to vector<8xf32>
    %107 = vector.shape_cast %106 : vector<8xf32> to vector<8x1xf32>
    %108 = tpu.reciprocal %107 {approx = true} : vector<8x1xf32> -> vector<8x1xf32>
    %109 = vector.broadcast %108 : vector<8x1xf32> to vector<8x8xf32>
    %110 = arith.mulf %105, %109 : vector<8x8xf32>
    %cst_34 = arith.constant dense<0.000000e+00> : vector<8x8xf32>
    %111 = tpu.matmul %110, %96, %cst_34 {dimension_numbers = #tpu.dot_dimension_numbers<[1], [0], [0], [1], [0, 0, 1, 1], [], []>} : vector<8x8xf32>, vector<8x8xf32>, vector<8x8xf32> -> vector<8x8xf32>
    %112 = vector.extract_strided_slice %89 {offsets = [0, 8], sizes = [8, 8], strides = [1, 1]} : vector<8x32xf32> to vector<8x8xf32>
    %113 = vector.extract_strided_slice %90 {offsets = [0, 8], sizes = [8, 8], strides = [1, 1]} : vector<8x32xf32> to vector<8x8xf32>
    %114 = vector.extract_strided_slice %91 {offsets = [0, 8], sizes = [8, 8], strides = [1, 1]} : vector<8x32xf32> to vector<8x8xf32>
    %cst_35 = arith.constant dense<0.000000e+00> : vector<8x8xf32>
    %115 = tpu.matmul %112, %113, %cst_35 {dimension_numbers = #tpu.dot_dimension_numbers<[1], [1], [0], [0], [0, 0, 1, 0], [], []>} : vector<8x8xf32>, vector<8x8xf32>, vector<8x8xf32> -> vector<8x8xf32>
    %cst_36 = arith.constant 0.353553385 : f32
    %116 = vector.broadcast %cst_36 : f32 to vector<8x8xf32>
    %117 = arith.mulf %115, %116 : vector<8x8xf32>
    %118 = arith.addf %117, %93 : vector<8x8xf32>
    %cst_37 = arith.constant dense<0xFF800000> : vector<8xf32>
    %119 = vector.multi_reduction <maximumf>, %118, %cst_37 [1] : vector<8x8xf32> to vector<8xf32>
    %120 = vector.shape_cast %119 : vector<8xf32> to vector<8x1xf32>
    %121 = vector.broadcast %120 : vector<8x1xf32> to vector<8x8xf32>
    %122 = arith.subf %118, %121 : vector<8x8xf32>
    %123 = math.exp %122 : vector<8x8xf32>
    %cst_38 = arith.constant dense<0.000000e+00> : vector<8xf32>
    %124 = vector.multi_reduction <add>, %123, %cst_38 [1] : vector<8x8xf32> to vector<8xf32>
    %125 = vector.shape_cast %124 : vector<8xf32> to vector<8x1xf32>
    %126 = tpu.reciprocal %125 {approx = true} : vector<8x1xf32> -> vector<8x1xf32>
    %127 = vector.broadcast %126 : vector<8x1xf32> to vector<8x8xf32>
    %128 = arith.mulf %123, %127 : vector<8x8xf32>
    %cst_39 = arith.constant dense<0.000000e+00> : vector<8x8xf32>
    %129 = tpu.matmul %128, %114, %cst_39 {dimension_numbers = #tpu.dot_dimension_numbers<[1], [0], [0], [1], [0, 0, 1, 1], [], []>} : vector<8x8xf32>, vector<8x8xf32>, vector<8x8xf32> -> vector<8x8xf32>
    %130 = vector.extract_strided_slice %89 {offsets = [0, 16], sizes = [8, 8], strides = [1, 1]} : vector<8x32xf32> to vector<8x8xf32>
    %131 = vector.extract_strided_slice %90 {offsets = [0, 16], sizes = [8, 8], strides = [1, 1]} : vector<8x32xf32> to vector<8x8xf32>
    %132 = vector.extract_strided_slice %91 {offsets = [0, 16], sizes = [8, 8], strides = [1, 1]} : vector<8x32xf32> to vector<8x8xf32>
    %cst_40 = arith.constant dense<0.000000e+00> : vector<8x8xf32>
    %133 = tpu.matmul %130, %131, %cst_40 {dimension_numbers = #tpu.dot_dimension_numbers<[1], [1], [0], [0], [0, 0, 1, 0], [], []>} : vector<8x8xf32>, vector<8x8xf32>, vector<8x8xf32> -> vector<8x8xf32>
    %cst_41 = arith.constant 0.353553385 : f32
    %134 = vector.broadcast %cst_41 : f32 to vector<8x8xf32>
    %135 = arith.mulf %133, %134 : vector<8x8xf32>
    %136 = arith.addf %135, %93 : vector<8x8xf32>
    %cst_42 = arith.constant dense<0xFF800000> : vector<8xf32>
    %137 = vector.multi_reduction <maximumf>, %136, %cst_42 [1] : vector<8x8xf32> to vector<8xf32>
    %138 = vector.shape_cast %137 : vector<8xf32> to vector<8x1xf32>
    %139 = vector.broadcast %138 : vector<8x1xf32> to vector<8x8xf32>
    %140 = arith.subf %136, %139 : vector<8x8xf32>
    %141 = math.exp %140 : vector<8x8xf32>
    %cst_43 = arith.constant dense<0.000000e+00> : vector<8xf32>
    %142 = vector.multi_reduction <add>, %141, %cst_43 [1] : vector<8x8xf32> to vector<8xf32>
    %143 = vector.shape_cast %142 : vector<8xf32> to vector<8x1xf32>
    %144 = tpu.reciprocal %143 {approx = true} : vector<8x1xf32> -> vector<8x1xf32>
    %145 = vector.broadcast %144 : vector<8x1xf32> to vector<8x8xf32>
    %146 = arith.mulf %141, %145 : vector<8x8xf32>
    %cst_44 = arith.constant dense<0.000000e+00> : vector<8x8xf32>
    %147 = tpu.matmul %146, %132, %cst_44 {dimension_numbers = #tpu.dot_dimension_numbers<[1], [0], [0], [1], [0, 0, 1, 1], [], []>} : vector<8x8xf32>, vector<8x8xf32>, vector<8x8xf32> -> vector<8x8xf32>
    %148 = vector.extract_strided_slice %89 {offsets = [0, 24], sizes = [8, 8], strides = [1, 1]} : vector<8x32xf32> to vector<8x8xf32>
    %149 = vector.extract_strided_slice %90 {offsets = [0, 24], sizes = [8, 8], strides = [1, 1]} : vector<8x32xf32> to vector<8x8xf32>
    %150 = vector.extract_strided_slice %91 {offsets = [0, 24], sizes = [8, 8], strides = [1, 1]} : vector<8x32xf32> to vector<8x8xf32>
    %cst_45 = arith.constant dense<0.000000e+00> : vector<8x8xf32>
    %151 = tpu.matmul %148, %149, %cst_45 {dimension_numbers = #tpu.dot_dimension_numbers<[1], [1], [0], [0], [0, 0, 1, 0], [], []>} : vector<8x8xf32>, vector<8x8xf32>, vector<8x8xf32> -> vector<8x8xf32>
    %cst_46 = arith.constant 0.353553385 : f32
    %152 = vector.broadcast %cst_46 : f32 to vector<8x8xf32>
    %153 = arith.mulf %151, %152 : vector<8x8xf32>
    %154 = arith.addf %153, %93 : vector<8x8xf32>
    %cst_47 = arith.constant dense<0xFF800000> : vector<8xf32>
    %155 = vector.multi_reduction <maximumf>, %154, %cst_47 [1] : vector<8x8xf32> to vector<8xf32>
    %156 = vector.shape_cast %155 : vector<8xf32> to vector<8x1xf32>
    %157 = vector.broadcast %156 : vector<8x1xf32> to vector<8x8xf32>
    %158 = arith.subf %154, %157 : vector<8x8xf32>
    %159 = math.exp %158 : vector<8x8xf32>
    %cst_48 = arith.constant dense<0.000000e+00> : vector<8xf32>
    %160 = vector.multi_reduction <add>, %159, %cst_48 [1] : vector<8x8xf32> to vector<8xf32>
    %161 = vector.shape_cast %160 : vector<8xf32> to vector<8x1xf32>
    %162 = tpu.reciprocal %161 {approx = true} : vector<8x1xf32> -> vector<8x1xf32>
    %163 = vector.broadcast %162 : vector<8x1xf32> to vector<8x8xf32>
    %164 = arith.mulf %159, %163 : vector<8x8xf32>
    %cst_49 = arith.constant dense<0.000000e+00> : vector<8x8xf32>
    %165 = tpu.matmul %164, %150, %cst_49 {dimension_numbers = #tpu.dot_dimension_numbers<[1], [0], [0], [1], [0, 0, 1, 1], [], []>} : vector<8x8xf32>, vector<8x8xf32>, vector<8x8xf32> -> vector<8x8xf32>
    %166 = tpu.concatenate %111, %129, %147, %165 in 1 : vector<8x8xf32>, vector<8x8xf32>, vector<8x8xf32>, vector<8x8xf32> -> vector<8x32xf32>
    %167 = tpu.concatenate %88, %166 in 0 : vector<8x32xf32>, vector<8x32xf32> -> vector<16x32xf32>
    %c0_50 = arith.constant 0 : index
    %c0_51 = arith.constant 0 : index
    %168 = vector.load %arg6[%c0_50, %c0_51] : memref<32x32xf32, #tpu.memory_space<vmem>>, vector<32x32xf32>
    %169 = arith.truncf %167 : vector<16x32xf32> to vector<16x32xbf16>
    %170 = arith.truncf %168 : vector<32x32xf32> to vector<32x32xbf16>
    %cst_52 = arith.constant dense<0.000000e+00> : vector<16x32xf32>
    %171 = tpu.matmul %169, %170, %cst_52 {dimension_numbers = #tpu.dot_dimension_numbers<[1], [0], [0], [1], [0, 0, 1, 1], [], []>} : vector<16x32xbf16>, vector<32x32xbf16>, vector<16x32xf32> -> vector<16x32xf32>
    %c0_53 = arith.constant 0 : index
    %c0_54 = arith.constant 0 : index
    %172 = vector.load %arg7[%c0_53, %c0_54] : memref<1x32xf32, #tpu.memory_space<vmem>>, vector<1x32xf32>
    %173 = vector.broadcast %172 : vector<1x32xf32> to vector<16x32xf32>
    %174 = arith.addf %171, %173 : vector<16x32xf32>
    %175 = arith.addf %0, %174 : vector<16x32xf32>
    %c0_55 = arith.constant 0 : index
    %c0_56 = arith.constant 0 : index
    %176 = vector.load %arg14[%c0_55, %c0_56] : memref<1x32xf32, #tpu.memory_space<vmem>>, vector<1x32xf32>
    %c0_57 = arith.constant 0 : index
    %c0_58 = arith.constant 0 : index
    %177 = vector.load %arg15[%c0_57, %c0_58] : memref<1x32xf32, #tpu.memory_space<vmem>>, vector<1x32xf32>
    %cst_59 = arith.constant dense<0.000000e+00> : vector<16xf32>
    %178 = vector.multi_reduction <add>, %175, %cst_59 [1] : vector<16x32xf32> to vector<16xf32>
    %179 = vector.shape_cast %178 : vector<16xf32> to vector<16x1xf32>
    %cst_60 = arith.constant 3.200000e+01 : f32
    %180 = vector.broadcast %cst_60 : f32 to vector<16x1xf32>
    %181 = arith.divf %179, %180 : vector<16x1xf32>
    %182 = vector.broadcast %181 : vector<16x1xf32> to vector<16x32xf32>
    %183 = arith.subf %175, %182 : vector<16x32xf32>
    %184 = arith.mulf %183, %183 : vector<16x32xf32>
    %cst_61 = arith.constant dense<0.000000e+00> : vector<16xf32>
    %185 = vector.multi_reduction <add>, %184, %cst_61 [1] : vector<16x32xf32> to vector<16xf32>
    %186 = vector.shape_cast %185 : vector<16xf32> to vector<16x1xf32>
    %cst_62 = arith.constant 3.200000e+01 : f32
    %187 = vector.broadcast %cst_62 : f32 to vector<16x1xf32>
    %188 = arith.divf %186, %187 : vector<16x1xf32>
    %cst_63 = arith.constant 9.99999974E-6 : f32
    %189 = vector.broadcast %cst_63 : f32 to vector<16x1xf32>
    %190 = arith.addf %188, %189 : vector<16x1xf32>
    %191 = math.rsqrt %190 : vector<16x1xf32>
    %192 = vector.broadcast %191 : vector<16x1xf32> to vector<16x32xf32>
    %193 = arith.mulf %183, %192 : vector<16x32xf32>
    %194 = vector.broadcast %176 : vector<1x32xf32> to vector<16x32xf32>
    %195 = arith.mulf %193, %194 : vector<16x32xf32>
    %196 = vector.broadcast %177 : vector<1x32xf32> to vector<16x32xf32>
    %197 = arith.addf %195, %196 : vector<16x32xf32>
    %c0_64 = arith.constant 0 : index
    %c0_65 = arith.constant 0 : index
    %198 = vector.load %arg8[%c0_64, %c0_65] : memref<32x32xf32, #tpu.memory_space<vmem>>, vector<32x32xf32>
    %199 = arith.truncf %197 : vector<16x32xf32> to vector<16x32xbf16>
    %200 = arith.truncf %198 : vector<32x32xf32> to vector<32x32xbf16>
    %cst_66 = arith.constant dense<0.000000e+00> : vector<16x32xf32>
    %201 = tpu.matmul %199, %200, %cst_66 {dimension_numbers = #tpu.dot_dimension_numbers<[1], [0], [0], [1], [0, 0, 1, 1], [], []>} : vector<16x32xbf16>, vector<32x32xbf16>, vector<16x32xf32> -> vector<16x32xf32>
    %c0_67 = arith.constant 0 : index
    %c0_68 = arith.constant 0 : index
    %202 = vector.load %arg9[%c0_67, %c0_68] : memref<1x32xf32, #tpu.memory_space<vmem>>, vector<1x32xf32>
    %203 = vector.broadcast %202 : vector<1x32xf32> to vector<16x32xf32>
    %204 = arith.addf %201, %203 : vector<16x32xf32>
    %c0_69 = arith.constant 0 : index
    %c0_70 = arith.constant 0 : index
    %205 = vector.load %arg1[%c0_69, %c0_70] : memref<20x32xf32, #tpu.memory_space<vmem>>, vector<20x32xf32>
    %c0_71 = arith.constant 0 : index
    %c0_72 = arith.constant 0 : index
    %206 = vector.load %arg10[%c0_71, %c0_72] : memref<32x64xf32, #tpu.memory_space<vmem>>, vector<32x64xf32>
    %207 = arith.truncf %205 : vector<20x32xf32> to vector<20x32xbf16>
    %208 = arith.truncf %206 : vector<32x64xf32> to vector<32x64xbf16>
    %cst_73 = arith.constant dense<0.000000e+00> : vector<20x64xf32>
    %209 = tpu.matmul %207, %208, %cst_73 {dimension_numbers = #tpu.dot_dimension_numbers<[1], [0], [0], [1], [0, 0, 1, 1], [], []>} : vector<20x32xbf16>, vector<32x64xbf16>, vector<20x64xf32> -> vector<20x64xf32>
    %c0_74 = arith.constant 0 : index
    %c0_75 = arith.constant 0 : index
    %210 = vector.load %arg11[%c0_74, %c0_75] : memref<1x64xf32, #tpu.memory_space<vmem>>, vector<1x64xf32>
    %211 = vector.broadcast %210 : vector<1x64xf32> to vector<20x64xf32>
    %212 = arith.addf %209, %211 : vector<20x64xf32>
    %213 = vector.extract_strided_slice %212 {offsets = [0, 0], sizes = [10, 32], strides = [1, 1]} : vector<20x64xf32> to vector<10x32xf32>
    %214 = vector.extract_strided_slice %212 {offsets = [0, 32], sizes = [10, 32], strides = [1, 1]} : vector<20x64xf32> to vector<10x32xf32>
    %215 = vector.extract_strided_slice %204 {offsets = [0, 0], sizes = [8, 32], strides = [1, 1]} : vector<16x32xf32> to vector<8x32xf32>
    %c0_76 = arith.constant 0 : index
    %c0_77 = arith.constant 0 : index
    %c0_78 = arith.constant 0 : index
    %216 = vector.load %arg3[%c0_76, %c0_77, %c0_78] : memref<2x8x10xf32, #tpu.memory_space<vmem>>, vector<1x8x10xf32>
    %217 = vector.shape_cast %216 : vector<1x8x10xf32> to vector<8x10xf32>
    %218 = vector.extract_strided_slice %215 {offsets = [0, 0], sizes = [8, 8], strides = [1, 1]} : vector<8x32xf32> to vector<8x8xf32>
    %219 = vector.extract_strided_slice %213 {offsets = [0, 0], sizes = [10, 8], strides = [1, 1]} : vector<10x32xf32> to vector<10x8xf32>
    %220 = vector.extract_strided_slice %214 {offsets = [0, 0], sizes = [10, 8], strides = [1, 1]} : vector<10x32xf32> to vector<10x8xf32>
    %cst_79 = arith.constant dense<0.000000e+00> : vector<8x10xf32>
    %221 = tpu.matmul %218, %219, %cst_79 {dimension_numbers = #tpu.dot_dimension_numbers<[1], [1], [0], [0], [0, 0, 1, 0], [], []>} : vector<8x8xf32>, vector<10x8xf32>, vector<8x10xf32> -> vector<8x10xf32>
    %cst_80 = arith.constant 0.353553385 : f32
    %222 = vector.broadcast %cst_80 : f32 to vector<8x10xf32>
    %223 = arith.mulf %221, %222 : vector<8x10xf32>
    %224 = arith.addf %223, %217 : vector<8x10xf32>
    %cst_81 = arith.constant dense<0xFF800000> : vector<8xf32>
    %225 = vector.multi_reduction <maximumf>, %224, %cst_81 [1] : vector<8x10xf32> to vector<8xf32>
    %226 = vector.shape_cast %225 : vector<8xf32> to vector<8x1xf32>
    %227 = vector.broadcast %226 : vector<8x1xf32> to vector<8x10xf32>
    %228 = arith.subf %224, %227 : vector<8x10xf32>
    %229 = math.exp %228 : vector<8x10xf32>
    %cst_82 = arith.constant dense<0.000000e+00> : vector<8xf32>
    %230 = vector.multi_reduction <add>, %229, %cst_82 [1] : vector<8x10xf32> to vector<8xf32>
    %231 = vector.shape_cast %230 : vector<8xf32> to vector<8x1xf32>
    %232 = tpu.reciprocal %231 {approx = true} : vector<8x1xf32> -> vector<8x1xf32>
    %233 = vector.broadcast %232 : vector<8x1xf32> to vector<8x10xf32>
    %234 = arith.mulf %229, %233 : vector<8x10xf32>
    %cst_83 = arith.constant dense<0.000000e+00> : vector<8x8xf32>
    %235 = tpu.matmul %234, %220, %cst_83 {dimension_numbers = #tpu.dot_dimension_numbers<[1], [0], [0], [1], [0, 0, 1, 1], [], []>} : vector<8x10xf32>, vector<10x8xf32>, vector<8x8xf32> -> vector<8x8xf32>
    %236 = vector.extract_strided_slice %215 {offsets = [0, 8], sizes = [8, 8], strides = [1, 1]} : vector<8x32xf32> to vector<8x8xf32>
    %237 = vector.extract_strided_slice %213 {offsets = [0, 8], sizes = [10, 8], strides = [1, 1]} : vector<10x32xf32> to vector<10x8xf32>
    %238 = vector.extract_strided_slice %214 {offsets = [0, 8], sizes = [10, 8], strides = [1, 1]} : vector<10x32xf32> to vector<10x8xf32>
    %cst_84 = arith.constant dense<0.000000e+00> : vector<8x10xf32>
    %239 = tpu.matmul %236, %237, %cst_84 {dimension_numbers = #tpu.dot_dimension_numbers<[1], [1], [0], [0], [0, 0, 1, 0], [], []>} : vector<8x8xf32>, vector<10x8xf32>, vector<8x10xf32> -> vector<8x10xf32>
    %cst_85 = arith.constant 0.353553385 : f32
    %240 = vector.broadcast %cst_85 : f32 to vector<8x10xf32>
    %241 = arith.mulf %239, %240 : vector<8x10xf32>
    %242 = arith.addf %241, %217 : vector<8x10xf32>
    %cst_86 = arith.constant dense<0xFF800000> : vector<8xf32>
    %243 = vector.multi_reduction <maximumf>, %242, %cst_86 [1] : vector<8x10xf32> to vector<8xf32>
    %244 = vector.shape_cast %243 : vector<8xf32> to vector<8x1xf32>
    %245 = vector.broadcast %244 : vector<8x1xf32> to vector<8x10xf32>
    %246 = arith.subf %242, %245 : vector<8x10xf32>
    %247 = math.exp %246 : vector<8x10xf32>
    %cst_87 = arith.constant dense<0.000000e+00> : vector<8xf32>
    %248 = vector.multi_reduction <add>, %247, %cst_87 [1] : vector<8x10xf32> to vector<8xf32>
    %249 = vector.shape_cast %248 : vector<8xf32> to vector<8x1xf32>
    %250 = tpu.reciprocal %249 {approx = true} : vector<8x1xf32> -> vector<8x1xf32>
    %251 = vector.broadcast %250 : vector<8x1xf32> to vector<8x10xf32>
    %252 = arith.mulf %247, %251 : vector<8x10xf32>
    %cst_88 = arith.constant dense<0.000000e+00> : vector<8x8xf32>
    %253 = tpu.matmul %252, %238, %cst_88 {dimension_numbers = #tpu.dot_dimension_numbers<[1], [0], [0], [1], [0, 0, 1, 1], [], []>} : vector<8x10xf32>, vector<10x8xf32>, vector<8x8xf32> -> vector<8x8xf32>
    %254 = arith.addf %234, %252 : vector<8x10xf32>
    %255 = vector.extract_strided_slice %215 {offsets = [0, 16], sizes = [8, 8], strides = [1, 1]} : vector<8x32xf32> to vector<8x8xf32>
    %256 = vector.extract_strided_slice %213 {offsets = [0, 16], sizes = [10, 8], strides = [1, 1]} : vector<10x32xf32> to vector<10x8xf32>
    %257 = vector.extract_strided_slice %214 {offsets = [0, 16], sizes = [10, 8], strides = [1, 1]} : vector<10x32xf32> to vector<10x8xf32>
    %cst_89 = arith.constant dense<0.000000e+00> : vector<8x10xf32>
    %258 = tpu.matmul %255, %256, %cst_89 {dimension_numbers = #tpu.dot_dimension_numbers<[1], [1], [0], [0], [0, 0, 1, 0], [], []>} : vector<8x8xf32>, vector<10x8xf32>, vector<8x10xf32> -> vector<8x10xf32>
    %cst_90 = arith.constant 0.353553385 : f32
    %259 = vector.broadcast %cst_90 : f32 to vector<8x10xf32>
    %260 = arith.mulf %258, %259 : vector<8x10xf32>
    %261 = arith.addf %260, %217 : vector<8x10xf32>
    %cst_91 = arith.constant dense<0xFF800000> : vector<8xf32>
    %262 = vector.multi_reduction <maximumf>, %261, %cst_91 [1] : vector<8x10xf32> to vector<8xf32>
    %263 = vector.shape_cast %262 : vector<8xf32> to vector<8x1xf32>
    %264 = vector.broadcast %263 : vector<8x1xf32> to vector<8x10xf32>
    %265 = arith.subf %261, %264 : vector<8x10xf32>
    %266 = math.exp %265 : vector<8x10xf32>
    %cst_92 = arith.constant dense<0.000000e+00> : vector<8xf32>
    %267 = vector.multi_reduction <add>, %266, %cst_92 [1] : vector<8x10xf32> to vector<8xf32>
    %268 = vector.shape_cast %267 : vector<8xf32> to vector<8x1xf32>
    %269 = tpu.reciprocal %268 {approx = true} : vector<8x1xf32> -> vector<8x1xf32>
    %270 = vector.broadcast %269 : vector<8x1xf32> to vector<8x10xf32>
    %271 = arith.mulf %266, %270 : vector<8x10xf32>
    %cst_93 = arith.constant dense<0.000000e+00> : vector<8x8xf32>
    %272 = tpu.matmul %271, %257, %cst_93 {dimension_numbers = #tpu.dot_dimension_numbers<[1], [0], [0], [1], [0, 0, 1, 1], [], []>} : vector<8x10xf32>, vector<10x8xf32>, vector<8x8xf32> -> vector<8x8xf32>
    %273 = arith.addf %254, %271 : vector<8x10xf32>
    %274 = vector.extract_strided_slice %215 {offsets = [0, 24], sizes = [8, 8], strides = [1, 1]} : vector<8x32xf32> to vector<8x8xf32>
    %275 = vector.extract_strided_slice %213 {offsets = [0, 24], sizes = [10, 8], strides = [1, 1]} : vector<10x32xf32> to vector<10x8xf32>
    %276 = vector.extract_strided_slice %214 {offsets = [0, 24], sizes = [10, 8], strides = [1, 1]} : vector<10x32xf32> to vector<10x8xf32>
    %cst_94 = arith.constant dense<0.000000e+00> : vector<8x10xf32>
    %277 = tpu.matmul %274, %275, %cst_94 {dimension_numbers = #tpu.dot_dimension_numbers<[1], [1], [0], [0], [0, 0, 1, 0], [], []>} : vector<8x8xf32>, vector<10x8xf32>, vector<8x10xf32> -> vector<8x10xf32>
    %cst_95 = arith.constant 0.353553385 : f32
    %278 = vector.broadcast %cst_95 : f32 to vector<8x10xf32>
    %279 = arith.mulf %277, %278 : vector<8x10xf32>
    %280 = arith.addf %279, %217 : vector<8x10xf32>
    %cst_96 = arith.constant dense<0xFF800000> : vector<8xf32>
    %281 = vector.multi_reduction <maximumf>, %280, %cst_96 [1] : vector<8x10xf32> to vector<8xf32>
    %282 = vector.shape_cast %281 : vector<8xf32> to vector<8x1xf32>
    %283 = vector.broadcast %282 : vector<8x1xf32> to vector<8x10xf32>
    %284 = arith.subf %280, %283 : vector<8x10xf32>
    %285 = math.exp %284 : vector<8x10xf32>
    %cst_97 = arith.constant dense<0.000000e+00> : vector<8xf32>
    %286 = vector.multi_reduction <add>, %285, %cst_97 [1] : vector<8x10xf32> to vector<8xf32>
    %287 = vector.shape_cast %286 : vector<8xf32> to vector<8x1xf32>
    %288 = tpu.reciprocal %287 {approx = true} : vector<8x1xf32> -> vector<8x1xf32>
    %289 = vector.broadcast %288 : vector<8x1xf32> to vector<8x10xf32>
    %290 = arith.mulf %285, %289 : vector<8x10xf32>
    %cst_98 = arith.constant dense<0.000000e+00> : vector<8x8xf32>
    %291 = tpu.matmul %290, %276, %cst_98 {dimension_numbers = #tpu.dot_dimension_numbers<[1], [0], [0], [1], [0, 0, 1, 1], [], []>} : vector<8x10xf32>, vector<10x8xf32>, vector<8x8xf32> -> vector<8x8xf32>
    %292 = arith.addf %273, %290 : vector<8x10xf32>
    %293 = tpu.concatenate %235, %253, %272, %291 in 1 : vector<8x8xf32>, vector<8x8xf32>, vector<8x8xf32>, vector<8x8xf32> -> vector<8x32xf32>
    %cst_99 = arith.constant 2.500000e-01 : f32
    %294 = vector.broadcast %cst_99 : f32 to vector<8x10xf32>
    %295 = arith.mulf %292, %294 : vector<8x10xf32>
    %c0_100 = arith.constant 0 : index
    %c0_101 = arith.constant 0 : index
    %c0_102 = arith.constant 0 : index
    %296 = vector.load %arg25[%c0_100, %c0_101, %c0_102] : memref<2x8x10xf32, #tpu.memory_space<vmem>>, vector<1x8x10xf32>
    %297 = vector.shape_cast %296 : vector<1x8x10xf32> to vector<8x10xf32>
    %298 = vector.shape_cast %295 : vector<8x10xf32> to vector<1x8x10xf32>
    tpu.vector_store %arg25[%c0_100, %c0_101, %c0_102], %298 {strides = array<i32>} : memref<2x8x10xf32, #tpu.memory_space<vmem>>, vector<1x8x10xf32>,
    %299 = vector.extract_strided_slice %212 {offsets = [10, 0], sizes = [10, 32], strides = [1, 1]} : vector<20x64xf32> to vector<10x32xf32>
    %300 = vector.extract_strided_slice %212 {offsets = [10, 32], sizes = [10, 32], strides = [1, 1]} : vector<20x64xf32> to vector<10x32xf32>
    %301 = vector.extract_strided_slice %204 {offsets = [8, 0], sizes = [8, 32], strides = [1, 1]} : vector<16x32xf32> to vector<8x32xf32>
    %c1_103 = arith.constant 1 : index
    %c0_104 = arith.constant 0 : index
    %c0_105 = arith.constant 0 : index
    %302 = vector.load %arg3[%c1_103, %c0_104, %c0_105] : memref<2x8x10xf32, #tpu.memory_space<vmem>>, vector<1x8x10xf32>
    %303 = vector.shape_cast %302 : vector<1x8x10xf32> to vector<8x10xf32>
    %304 = vector.extract_strided_slice %301 {offsets = [0, 0], sizes = [8, 8], strides = [1, 1]} : vector<8x32xf32> to vector<8x8xf32>
    %305 = vector.extract_strided_slice %299 {offsets = [0, 0], sizes = [10, 8], strides = [1, 1]} : vector<10x32xf32> to vector<10x8xf32>
    %306 = vector.extract_strided_slice %300 {offsets = [0, 0], sizes = [10, 8], strides = [1, 1]} : vector<10x32xf32> to vector<10x8xf32>
    %cst_106 = arith.constant dense<0.000000e+00> : vector<8x10xf32>
    %307 = tpu.matmul %304, %305, %cst_106 {dimension_numbers = #tpu.dot_dimension_numbers<[1], [1], [0], [0], [0, 0, 1, 0], [], []>} : vector<8x8xf32>, vector<10x8xf32>, vector<8x10xf32> -> vector<8x10xf32>
    %cst_107 = arith.constant 0.353553385 : f32
    %308 = vector.broadcast %cst_107 : f32 to vector<8x10xf32>
    %309 = arith.mulf %307, %308 : vector<8x10xf32>
    %310 = arith.addf %309, %303 : vector<8x10xf32>
    %cst_108 = arith.constant dense<0xFF800000> : vector<8xf32>
    %311 = vector.multi_reduction <maximumf>, %310, %cst_108 [1] : vector<8x10xf32> to vector<8xf32>
    %312 = vector.shape_cast %311 : vector<8xf32> to vector<8x1xf32>
    %313 = vector.broadcast %312 : vector<8x1xf32> to vector<8x10xf32>
    %314 = arith.subf %310, %313 : vector<8x10xf32>
    %315 = math.exp %314 : vector<8x10xf32>
    %cst_109 = arith.constant dense<0.000000e+00> : vector<8xf32>
    %316 = vector.multi_reduction <add>, %315, %cst_109 [1] : vector<8x10xf32> to vector<8xf32>
    %317 = vector.shape_cast %316 : vector<8xf32> to vector<8x1xf32>
    %318 = tpu.reciprocal %317 {approx = true} : vector<8x1xf32> -> vector<8x1xf32>
    %319 = vector.broadcast %318 : vector<8x1xf32> to vector<8x10xf32>
    %320 = arith.mulf %315, %319 : vector<8x10xf32>
    %cst_110 = arith.constant dense<0.000000e+00> : vector<8x8xf32>
    %321 = tpu.matmul %320, %306, %cst_110 {dimension_numbers = #tpu.dot_dimension_numbers<[1], [0], [0], [1], [0, 0, 1, 1], [], []>} : vector<8x10xf32>, vector<10x8xf32>, vector<8x8xf32> -> vector<8x8xf32>
    %322 = vector.extract_strided_slice %301 {offsets = [0, 8], sizes = [8, 8], strides = [1, 1]} : vector<8x32xf32> to vector<8x8xf32>
    %323 = vector.extract_strided_slice %299 {offsets = [0, 8], sizes = [10, 8], strides = [1, 1]} : vector<10x32xf32> to vector<10x8xf32>
    %324 = vector.extract_strided_slice %300 {offsets = [0, 8], sizes = [10, 8], strides = [1, 1]} : vector<10x32xf32> to vector<10x8xf32>
    %cst_111 = arith.constant dense<0.000000e+00> : vector<8x10xf32>
    %325 = tpu.matmul %322, %323, %cst_111 {dimension_numbers = #tpu.dot_dimension_numbers<[1], [1], [0], [0], [0, 0, 1, 0], [], []>} : vector<8x8xf32>, vector<10x8xf32>, vector<8x10xf32> -> vector<8x10xf32>
    %cst_112 = arith.constant 0.353553385 : f32
    %326 = vector.broadcast %cst_112 : f32 to vector<8x10xf32>
    %327 = arith.mulf %325, %326 : vector<8x10xf32>
    %328 = arith.addf %327, %303 : vector<8x10xf32>
    %cst_113 = arith.constant dense<0xFF800000> : vector<8xf32>
    %329 = vector.multi_reduction <maximumf>, %328, %cst_113 [1] : vector<8x10xf32> to vector<8xf32>
    %330 = vector.shape_cast %329 : vector<8xf32> to vector<8x1xf32>
    %331 = vector.broadcast %330 : vector<8x1xf32> to vector<8x10xf32>
    %332 = arith.subf %328, %331 : vector<8x10xf32>
    %333 = math.exp %332 : vector<8x10xf32>
    %cst_114 = arith.constant dense<0.000000e+00> : vector<8xf32>
    %334 = vector.multi_reduction <add>, %333, %cst_114 [1] : vector<8x10xf32> to vector<8xf32>
    %335 = vector.shape_cast %334 : vector<8xf32> to vector<8x1xf32>
    %336 = tpu.reciprocal %335 {approx = true} : vector<8x1xf32> -> vector<8x1xf32>
    %337 = vector.broadcast %336 : vector<8x1xf32> to vector<8x10xf32>
    %338 = arith.mulf %333, %337 : vector<8x10xf32>
    %cst_115 = arith.constant dense<0.000000e+00> : vector<8x8xf32>
    %339 = tpu.matmul %338, %324, %cst_115 {dimension_numbers = #tpu.dot_dimension_numbers<[1], [0], [0], [1], [0, 0, 1, 1], [], []>} : vector<8x10xf32>, vector<10x8xf32>, vector<8x8xf32> -> vector<8x8xf32>
    %340 = arith.addf %320, %338 : vector<8x10xf32>
    %341 = vector.extract_strided_slice %301 {offsets = [0, 16], sizes = [8, 8], strides = [1, 1]} : vector<8x32xf32> to vector<8x8xf32>
    %342 = vector.extract_strided_slice %299 {offsets = [0, 16], sizes = [10, 8], strides = [1, 1]} : vector<10x32xf32> to vector<10x8xf32>
    %343 = vector.extract_strided_slice %300 {offsets = [0, 16], sizes = [10, 8], strides = [1, 1]} : vector<10x32xf32> to vector<10x8xf32>
    %cst_116 = arith.constant dense<0.000000e+00> : vector<8x10xf32>
    %344 = tpu.matmul %341, %342, %cst_116 {dimension_numbers = #tpu.dot_dimension_numbers<[1], [1], [0], [0], [0, 0, 1, 0], [], []>} : vector<8x8xf32>, vector<10x8xf32>, vector<8x10xf32> -> vector<8x10xf32>
    %cst_117 = arith.constant 0.353553385 : f32
    %345 = vector.broadcast %cst_117 : f32 to vector<8x10xf32>
    %346 = arith.mulf %344, %345 : vector<8x10xf32>
    %347 = arith.addf %346, %303 : vector<8x10xf32>
    %cst_118 = arith.constant dense<0xFF800000> : vector<8xf32>
    %348 = vector.multi_reduction <maximumf>, %347, %cst_118 [1] : vector<8x10xf32> to vector<8xf32>
    %349 = vector.shape_cast %348 : vector<8xf32> to vector<8x1xf32>
    %350 = vector.broadcast %349 : vector<8x1xf32> to vector<8x10xf32>
    %351 = arith.subf %347, %350 : vector<8x10xf32>
    %352 = math.exp %351 : vector<8x10xf32>
    %cst_119 = arith.constant dense<0.000000e+00> : vector<8xf32>
    %353 = vector.multi_reduction <add>, %352, %cst_119 [1] : vector<8x10xf32> to vector<8xf32>
    %354 = vector.shape_cast %353 : vector<8xf32> to vector<8x1xf32>
    %355 = tpu.reciprocal %354 {approx = true} : vector<8x1xf32> -> vector<8x1xf32>
    %356 = vector.broadcast %355 : vector<8x1xf32> to vector<8x10xf32>
    %357 = arith.mulf %352, %356 : vector<8x10xf32>
    %cst_120 = arith.constant dense<0.000000e+00> : vector<8x8xf32>
    %358 = tpu.matmul %357, %343, %cst_120 {dimension_numbers = #tpu.dot_dimension_numbers<[1], [0], [0], [1], [0, 0, 1, 1], [], []>} : vector<8x10xf32>, vector<10x8xf32>, vector<8x8xf32> -> vector<8x8xf32>
    %359 = arith.addf %340, %357 : vector<8x10xf32>
    %360 = vector.extract_strided_slice %301 {offsets = [0, 24], sizes = [8, 8], strides = [1, 1]} : vector<8x32xf32> to vector<8x8xf32>
    %361 = vector.extract_strided_slice %299 {offsets = [0, 24], sizes = [10, 8], strides = [1, 1]} : vector<10x32xf32> to vector<10x8xf32>
    %362 = vector.extract_strided_slice %300 {offsets = [0, 24], sizes = [10, 8], strides = [1, 1]} : vector<10x32xf32> to vector<10x8xf32>
    %cst_121 = arith.constant dense<0.000000e+00> : vector<8x10xf32>
    %363 = tpu.matmul %360, %361, %cst_121 {dimension_numbers = #tpu.dot_dimension_numbers<[1], [1], [0], [0], [0, 0, 1, 0], [], []>} : vector<8x8xf32>, vector<10x8xf32>, vector<8x10xf32> -> vector<8x10xf32>
    %cst_122 = arith.constant 0.353553385 : f32
    %364 = vector.broadcast %cst_122 : f32 to vector<8x10xf32>
    %365 = arith.mulf %363, %364 : vector<8x10xf32>
    %366 = arith.addf %365, %303 : vector<8x10xf32>
    %cst_123 = arith.constant dense<0xFF800000> : vector<8xf32>
    %367 = vector.multi_reduction <maximumf>, %366, %cst_123 [1] : vector<8x10xf32> to vector<8xf32>
    %368 = vector.shape_cast %367 : vector<8xf32> to vector<8x1xf32>
    %369 = vector.broadcast %368 : vector<8x1xf32> to vector<8x10xf32>
    %370 = arith.subf %366, %369 : vector<8x10xf32>
    %371 = math.exp %370 : vector<8x10xf32>
    %cst_124 = arith.constant dense<0.000000e+00> : vector<8xf32>
    %372 = vector.multi_reduction <add>, %371, %cst_124 [1] : vector<8x10xf32> to vector<8xf32>
    %373 = vector.shape_cast %372 : vector<8xf32> to vector<8x1xf32>
    %374 = tpu.reciprocal %373 {approx = true} : vector<8x1xf32> -> vector<8x1xf32>
    %375 = vector.broadcast %374 : vector<8x1xf32> to vector<8x10xf32>
    %376 = arith.mulf %371, %375 : vector<8x10xf32>
    %cst_125 = arith.constant dense<0.000000e+00> : vector<8x8xf32>
    %377 = tpu.matmul %376, %362, %cst_125 {dimension_numbers = #tpu.dot_dimension_numbers<[1], [0], [0], [1], [0, 0, 1, 1], [], []>} : vector<8x10xf32>, vector<10x8xf32>, vector<8x8xf32> -> vector<8x8xf32>
    %378 = arith.addf %359, %376 : vector<8x10xf32>
    %379 = tpu.concatenate %321, %339, %358, %377 in 1 : vector<8x8xf32>, vector<8x8xf32>, vector<8x8xf32>, vector<8x8xf32> -> vector<8x32xf32>
    %cst_126 = arith.constant 2.500000e-01 : f32
    %380 = vector.broadcast %cst_126 : f32 to vector<8x10xf32>
    %381 = arith.mulf %378, %380 : vector<8x10xf32>
    %c1_127 = arith.constant 1 : index
    %c0_128 = arith.constant 0 : index
    %c0_129 = arith.constant 0 : index
    %382 = vector.load %arg25[%c1_127, %c0_128, %c0_129] : memref<2x8x10xf32, #tpu.memory_space<vmem>>, vector<1x8x10xf32>
    %383 = vector.shape_cast %382 : vector<1x8x10xf32> to vector<8x10xf32>
    %384 = vector.shape_cast %381 : vector<8x10xf32> to vector<1x8x10xf32>
    tpu.vector_store %arg25[%c1_127, %c0_128, %c0_129], %384 {strides = array<i32>} : memref<2x8x10xf32, #tpu.memory_space<vmem>>, vector<1x8x10xf32>,
    %385 = tpu.concatenate %293, %379 in 0 : vector<8x32xf32>, vector<8x32xf32> -> vector<16x32xf32>
    %c0_130 = arith.constant 0 : index
    %c0_131 = arith.constant 0 : index
    %386 = vector.load %arg12[%c0_130, %c0_131] : memref<32x32xf32, #tpu.memory_space<vmem>>, vector<32x32xf32>
    %387 = arith.truncf %385 : vector<16x32xf32> to vector<16x32xbf16>
    %388 = arith.truncf %386 : vector<32x32xf32> to vector<32x32xbf16>
    %cst_132 = arith.constant dense<0.000000e+00> : vector<16x32xf32>
    %389 = tpu.matmul %387, %388, %cst_132 {dimension_numbers = #tpu.dot_dimension_numbers<[1], [0], [0], [1], [0, 0, 1, 1], [], []>} : vector<16x32xbf16>, vector<32x32xbf16>, vector<16x32xf32> -> vector<16x32xf32>
    %c0_133 = arith.constant 0 : index
    %c0_134 = arith.constant 0 : index
    %390 = vector.load %arg13[%c0_133, %c0_134] : memref<1x32xf32, #tpu.memory_space<vmem>>, vector<1x32xf32>
    %391 = vector.broadcast %390 : vector<1x32xf32> to vector<16x32xf32>
    %392 = arith.addf %389, %391 : vector<16x32xf32>
    %393 = arith.addf %197, %392 : vector<16x32xf32>
    %c0_135 = arith.constant 0 : index
    %c0_136 = arith.constant 0 : index
    %394 = vector.load %arg16[%c0_135, %c0_136] : memref<1x32xf32, #tpu.memory_space<vmem>>, vector<1x32xf32>
    %c0_137 = arith.constant 0 : index
    %c0_138 = arith.constant 0 : index
    %395 = vector.load %arg17[%c0_137, %c0_138] : memref<1x32xf32, #tpu.memory_space<vmem>>, vector<1x32xf32>
    %cst_139 = arith.constant dense<0.000000e+00> : vector<16xf32>
    %396 = vector.multi_reduction <add>, %393, %cst_139 [1] : vector<16x32xf32> to vector<16xf32>
    %397 = vector.shape_cast %396 : vector<16xf32> to vector<16x1xf32>
    %cst_140 = arith.constant 3.200000e+01 : f32
    %398 = vector.broadcast %cst_140 : f32 to vector<16x1xf32>
    %399 = arith.divf %397, %398 : vector<16x1xf32>
    %400 = vector.broadcast %399 : vector<16x1xf32> to vector<16x32xf32>
    %401 = arith.subf %393, %400 : vector<16x32xf32>
    %402 = arith.mulf %401, %401 : vector<16x32xf32>
    %cst_141 = arith.constant dense<0.000000e+00> : vector<16xf32>
    %403 = vector.multi_reduction <add>, %402, %cst_141 [1] : vector<16x32xf32> to vector<16xf32>
    %404 = vector.shape_cast %403 : vector<16xf32> to vector<16x1xf32>
    %cst_142 = arith.constant 3.200000e+01 : f32
    %405 = vector.broadcast %cst_142 : f32 to vector<16x1xf32>
    %406 = arith.divf %404, %405 : vector<16x1xf32>
    %cst_143 = arith.constant 9.99999974E-6 : f32
    %407 = vector.broadcast %cst_143 : f32 to vector<16x1xf32>
    %408 = arith.addf %406, %407 : vector<16x1xf32>
    %409 = math.rsqrt %408 : vector<16x1xf32>
    %410 = vector.broadcast %409 : vector<16x1xf32> to vector<16x32xf32>
    %411 = arith.mulf %401, %410 : vector<16x32xf32>
    %412 = vector.broadcast %394 : vector<1x32xf32> to vector<16x32xf32>
    %413 = arith.mulf %411, %412 : vector<16x32xf32>
    %414 = vector.broadcast %395 : vector<1x32xf32> to vector<16x32xf32>
    %415 = arith.addf %413, %414 : vector<16x32xf32>
    %c0_144 = arith.constant 0 : index
    %c0_145 = arith.constant 0 : index
    %416 = vector.load %arg20[%c0_144, %c0_145] : memref<32x64xf32, #tpu.memory_space<vmem>>, vector<32x64xf32>
    %417 = arith.truncf %415 : vector<16x32xf32> to vector<16x32xbf16>
    %418 = arith.truncf %416 : vector<32x64xf32> to vector<32x64xbf16>
    %cst_146 = arith.constant dense<0.000000e+00> : vector<16x64xf32>
    %419 = tpu.matmul %417, %418, %cst_146 {dimension_numbers = #tpu.dot_dimension_numbers<[1], [0], [0], [1], [0, 0, 1, 1], [], []>} : vector<16x32xbf16>, vector<32x64xbf16>, vector<16x64xf32> -> vector<16x64xf32>
    %c0_147 = arith.constant 0 : index
    %c0_148 = arith.constant 0 : index
    %420 = vector.load %arg21[%c0_147, %c0_148] : memref<1x64xf32, #tpu.memory_space<vmem>>, vector<1x64xf32>
    %421 = vector.broadcast %420 : vector<1x64xf32> to vector<16x64xf32>
    %422 = arith.addf %419, %421 : vector<16x64xf32>
    %cst_149 = arith.constant 0.000000e+00 : f32
    %423 = vector.broadcast %cst_149 : f32 to vector<16x64xf32>
    %424 = arith.maximumf %422, %423 : vector<16x64xf32>
    %c0_150 = arith.constant 0 : index
    %c0_151 = arith.constant 0 : index
    %425 = vector.load %arg22[%c0_150, %c0_151] : memref<64x32xf32, #tpu.memory_space<vmem>>, vector<64x32xf32>
    %426 = arith.truncf %424 : vector<16x64xf32> to vector<16x64xbf16>
    %427 = arith.truncf %425 : vector<64x32xf32> to vector<64x32xbf16>
    %cst_152 = arith.constant dense<0.000000e+00> : vector<16x32xf32>
    %428 = tpu.matmul %426, %427, %cst_152 {dimension_numbers = #tpu.dot_dimension_numbers<[1], [0], [0], [1], [0, 0, 1, 1], [], []>} : vector<16x64xbf16>, vector<64x32xbf16>, vector<16x32xf32> -> vector<16x32xf32>
    %c0_153 = arith.constant 0 : index
    %c0_154 = arith.constant 0 : index
    %429 = vector.load %arg23[%c0_153, %c0_154] : memref<1x32xf32, #tpu.memory_space<vmem>>, vector<1x32xf32>
    %430 = vector.broadcast %429 : vector<1x32xf32> to vector<16x32xf32>
    %431 = arith.addf %428, %430 : vector<16x32xf32>
    %432 = arith.addf %415, %431 : vector<16x32xf32>
    %c0_155 = arith.constant 0 : index
    %c0_156 = arith.constant 0 : index
    %433 = vector.load %arg18[%c0_155, %c0_156] : memref<1x32xf32, #tpu.memory_space<vmem>>, vector<1x32xf32>
    %c0_157 = arith.constant 0 : index
    %c0_158 = arith.constant 0 : index
    %434 = vector.load %arg19[%c0_157, %c0_158] : memref<1x32xf32, #tpu.memory_space<vmem>>, vector<1x32xf32>
    %cst_159 = arith.constant dense<0.000000e+00> : vector<16xf32>
    %435 = vector.multi_reduction <add>, %432, %cst_159 [1] : vector<16x32xf32> to vector<16xf32>
    %436 = vector.shape_cast %435 : vector<16xf32> to vector<16x1xf32>
    %cst_160 = arith.constant 3.200000e+01 : f32
    %437 = vector.broadcast %cst_160 : f32 to vector<16x1xf32>
    %438 = arith.divf %436, %437 : vector<16x1xf32>
    %439 = vector.broadcast %438 : vector<16x1xf32> to vector<16x32xf32>
    %440 = arith.subf %432, %439 : vector<16x32xf32>
    %441 = arith.mulf %440, %440 : vector<16x32xf32>
    %cst_161 = arith.constant dense<0.000000e+00> : vector<16xf32>
    %442 = vector.multi_reduction <add>, %441, %cst_161 [1] : vector<16x32xf32> to vector<16xf32>
    %443 = vector.shape_cast %442 : vector<16xf32> to vector<16x1xf32>
    %cst_162 = arith.constant 3.200000e+01 : f32
    %444 = vector.broadcast %cst_162 : f32 to vector<16x1xf32>
    %445 = arith.divf %443, %444 : vector<16x1xf32>
    %cst_163 = arith.constant 9.99999974E-6 : f32
    %446 = vector.broadcast %cst_163 : f32 to vector<16x1xf32>
    %447 = arith.addf %445, %446 : vector<16x1xf32>
    %448 = math.rsqrt %447 : vector<16x1xf32>
    %449 = vector.broadcast %448 : vector<16x1xf32> to vector<16x32xf32>
    %450 = arith.mulf %440, %449 : vector<16x32xf32>
    %451 = vector.broadcast %433 : vector<1x32xf32> to vector<16x32xf32>
    %452 = arith.mulf %450, %451 : vector<16x32xf32>
    %453 = vector.broadcast %434 : vector<1x32xf32> to vector<16x32xf32>
    %454 = arith.addf %452, %453 : vector<16x32xf32>
    %c0_164 = arith.constant 0 : index
    %c0_165 = arith.constant 0 : index
    %455 = vector.load %arg24[%c0_164, %c0_165] : memref<16x32xf32, #tpu.memory_space<vmem>>, vector<16x32xf32>
    tpu.vector_store %arg24[%c0_164, %c0_165], %454 {strides = array<i32>} : memref<16x32xf32, #tpu.memory_space<vmem>>, vector<16x32xf32>,
    return
  }
}

</mosaic_0001>

<bundles_post_ra>
// kernel: tpu_custom_call.1
= control target key start
LH: loop header
LB: loop body
LE: loop exit
PB: predicated region body
PF: predicated region fallthrough
CT: control target
= control target key end

     0   :  { %s5468_s0 = inlined_call_operand.hbm [shape: f32[16,32], index: 0, kind: input, shape index: {}]   ;;  %s5469_s1 = inlined_call_operand.hbm [shape: f32[20,32], index: 1, kind: input, shape index: {}]   ;;  %s5470_s2 = inlined_call_operand.hbm [shape: f32[2,8,8], index: 2, kind: input, shape index: {}]   ;;  %s5471_s3 = inlined_call_operand.hbm [shape: f32[2,8,10], index: 3, kind: input, shape index: {}]   ;;  %s5472_s4 = inlined_call_operand.vmem [shape: f32[32,96], index: 4, kind: input, shape index: {}]   ;;  %s5473_s5 = inlined_call_operand.hbm [shape: f32[1,96], index: 5, kind: input, shape index: {}]   ;;  %s5474_s6 = inlined_call_operand.vmem [shape: f32[32,32], index: 6, kind: input, shape index: {}]   ;;  %s5475_s7 = inlined_call_operand.hbm [shape: f32[1,32], index: 7, kind: input, shape index: {}]   ;;  %s5476_s8 = inlined_call_operand.vmem [shape: f32[32,32], index: 8, kind: input, shape index: {}]   ;;  %s5477_s9 = inlined_call_operand.hbm [shape: f32[1,32], index: 9, kind: input, shape index: {}]   ;;  %s5478_s10 = inlined_call_operand.hbm [shape: f32[32,64], index: 10, kind: input, shape index: {}]   ;;  %s5479_s11 = inlined_call_operand.hbm [shape: f32[1,64], index: 11, kind: input, shape index: {}]   ;;  %s5480_s12 = inlined_call_operand.hbm [shape: f32[32,32], index: 12, kind: input, shape index: {}]   ;;  %s5481_s13 = inlined_call_operand.hbm [shape: f32[1,32], index: 13, kind: input, shape index: {}]   ;;  %s5482_s14 = inlined_call_operand.hbm [shape: f32[1,32], index: 14, kind: input, shape index: {}]   ;;  %s5483_s15 = inlined_call_operand.hbm [shape: f32[1,32], index: 15, kind: input, shape index: {}]   ;;  %s5484_s16 = inlined_call_operand.hbm [shape: f32[1,32], index: 16, kind: input, shape index: {}]   ;;  %s5485_s17 = inlined_call_operand.hbm [shape: f32[1,32], index: 17, kind: input, shape index: {}]   ;;  %s5486_s18 = inlined_call_operand.hbm [shape: f32[1,32], index: 18, kind: input, shape index: {}]   ;;  %s5487_s19 = inlined_call_operand.vmem [shape: f32[1,32], index: 19, kind: input, shape index: {}]   ;;  %s5488_s20 = inlined_call_operand.vmem [shape: f32[32,64], index: 20, kind: input, shape index: {}]   ;;  %s5489_s21 = inlined_call_operand.vmem [shape: f32[1,64], index: 21, kind: input, shape index: {}]   ;;  %s5490_s22 = inlined_call_operand.vmem [shape: f32[64,32], index: 22, kind: input, shape index: {}]   ;;  %s5491_s23 = inlined_call_operand.vmem [shape: f32[1,32], index: 23, kind: input, shape index: {}]   ;;  %s5492_s24 = inlined_call_operand.hbm [shape: f32[16,32], index: 24, kind: output, shape index: {0}]   ;;  %s5493_s25 = inlined_call_operand.hbm [shape: f32[2,8,10], index: 25, kind: output, shape index: {1}]  }
   0x1   :  { %5497 = sst [smem:[#allocation42_spill]] %s5468_s0 }
   0x2   :  { %5498 = sst [smem:[#allocation43_spill]] %s5469_s1 }
   0x3   :  { %5499 = sst [smem:[#allocation44_spill]] %s5470_s2 }
   0x4   :  { %5500 = sst [smem:[#allocation45_spill]] %s5471_s3 }
   0x5   :  { %5501 = sst [smem:[#allocation46_spill]] %s5472_s4 }
   0x6   :  { %5502 = sst [smem:[#allocation47_spill]] %s5473_s5 }
   0x7   :  { %5503 = sst [smem:[#allocation48_spill]] %s5474_s6 }
   0x8   :  { %5504 = sst [smem:[#allocation49_spill]] %s5475_s7 }
   0x9   :  { %5505 = sst [smem:[#allocation50_spill]] %s5476_s8 }
   0xa   :  { %5506 = sst [smem:[#allocation51_spill]] %s5477_s9 }
   0xb   :  { %31 = vsyncpa [#allocation3], 0 }
   0xc   :  { %32 = vsyncpa [#allocation6], 0 }
   0xd   :  { %33 = vsyncpa [#allocation9], 0 }
   0xe   :  { %34 = vsyncpa [#allocation12], 0 }
   0xf   :  { %35 = vsyncpa [#allocation15], 0 }
  0x10   :  { %36 = vsyncpa [#allocation18], 0 }
  0x11   :  { %37 = vsyncpa [#allocation21], 0 }
  0x12   :  { %38 = vsyncpa [#allocation24], 0 }
  0x13   :  { %39 = vsyncpa [#allocation27], 0 }
  0x14   :  { %40 = vsyncpa [#allocation4], 0 }
  0x15   :  { %41 = vsyncpa [#allocation30], 0  ;;  %s4670_s29 = smov [#allocation5]   ;;  %s4671_s6 = smov [#allocation8]  }
  0x16   :  { %s59_s2 = sshll.u32 %s4670_s29, 4  ;;  %s83_s30 = sshll.u32 %s4671_s6, 4  ;;  %s60_s2 = int_to_ptr.vmem [resolvable:$true] %s59_s2  ;;  %s84_s30 = int_to_ptr.vmem [resolvable:$true] %s83_s30 }
  0x17   :  { %s4296_s7 = scalar_lea.vmem %s60_s2, 384  ;;  %p4301_p1 = scmp.lt.s32.totalorder %s60_s2, %s60_s2 }
  0x18   :  { %p4297_p0 = scmp.ne.s32.totalorder %s60_s2, %s4296_s7  ;;  %p4302_p2 = scmp.lt.s32.totalorder %s4296_s7, %s4296_s7 }
  0x1a   :  { %p4303_p3 = por %p4302_p2, %p4301_p1 }
  0x1c   :  { %p4304_p4 = pnand %p4303_p3, %p4297_p0 }
  0x1e   :  { %4307 = shalt.err (!%p4304_p4)
}
  0x1f   :  { %s4672_s3 = smov 128   ;;  %s4673_s26 = smov 8  }
  0x20   :  { %s5507_s27 = sld [smem:[#allocation43_spill]]  ;;  %s4316_s4 = scalar_lea.vmem %s84_s30, 256 }
  0x21   :  { %p4317_p5 = scmp.ne.s32.totalorder %s84_s30, %s4316_s4  ;;  %p4321_p6 = scmp.lt.s32.totalorder %s84_s30, %s84_s30 }
  0x22   :  { %p4322_p7 = scmp.lt.s32.totalorder %s4316_s4, %s4316_s4 }
  0x24   :  { %p4323_p8 = por %p4322_p7, %p4321_p6 }
  0x26   :  { %65 = dma.hbm_to_vmem [thread:$0]  %s5507_s27, 384, %s60_s2, [#allocation6], %s4672_s3, %s4672_s3, %s4673_s26  }
  0x27   :  { %p4324_p9 = pnand %p4323_p8, %p4317_p5 }
  0x29   :  { %4327 = shalt.err (!%p4324_p9)
}
  0x2a   :  { %s5508_s5 = sld [smem:[#allocation45_spill]]  ;;  %s4674_s0 = smov [#allocation11]  }
  0x2b   :  { %s110_s29 = sshll.u32 %s4674_s0, 4  ;;  %s4675_s6 = smov [#allocation14]   ;;  %s111_s29 = int_to_ptr.vmem [resolvable:$true] %s110_s29 }
  0x2c   :  { %s131_s7 = sshll.u32 %s4675_s6, 4  ;;  %s4336_s2 = scalar_lea.vmem %s111_s29, 16  ;;  %s132_s7 = int_to_ptr.vmem [resolvable:$true] %s131_s7 }
  0x2d   :  { %p4337_p10 = scmp.ne.s32.totalorder %s111_s29, %s4336_s2  ;;  %s4340_s1 = scalar_lea.vmem %s111_s29, 32 }
  0x2e   :  { %p4341_p11 = scmp.lt.s32.totalorder %s111_s29, %s111_s29  ;;  %p4342_p12 = scmp.lt.s32.totalorder %s4340_s1, %s4336_s2 }
  0x30   :  { %89 = dma.hbm_to_vmem [thread:$0]  %s5508_s5, 256, %s84_s30, [#allocation9], %s4672_s3, %s4672_s3, %s4673_s26  }
  0x31   :  { %p4343_p13 = por %p4342_p12, %p4341_p11 }
  0x33   :  { %p4344_p0 = pnand %p4343_p13, %p4337_p10 }
  0x35   :  { %4347 = shalt.err (!%p4344_p0)
}
  0x36   :  { %s5509_s4 = sld [smem:[#allocation49_spill]]  ;;  %s4356_s28 = scalar_lea.vmem %s132_s7, 512 }
  0x37   :  { %p4357_p1 = scmp.ne.s32.totalorder %s132_s7, %s4356_s28  ;;  %p4361_p2 = scmp.lt.s32.totalorder %s132_s7, %s132_s7 }
  0x38   :  { %p4362_p3 = scmp.lt.s32.totalorder %s4356_s28, %s4356_s28 }
  0x3a   :  { %p4363_p4 = por %p4362_p3, %p4361_p2 }
  0x3c   :  { %113 = dma.hbm_to_vmem [thread:$0]  %s5509_s4, 16, %s111_s29, [#allocation12]  }
  0x3d   :  { %p4364_p5 = pnand %p4363_p4, %p4357_p1 }
  0x3f   :  { %4367 = shalt.err (!%p4364_p5)
}
  0x40   :  { %137 = dma.hbm_to_vmem [thread:$0]  %s5478_s10, 512, %s132_s7, [#allocation15], %s4672_s3, %s4672_s3, %s4673_s26  }
  0x41   :  { %s4676_s5 = smov [#allocation17]   ;;  %s4677_s6 = smov [#allocation20]  }
  0x42   :  { %s153_s0 = sshll.u32 %s4676_s5, 4  ;;  %s176_s2 = sshll.u32 %s4677_s6, 4  ;;  %s154_s0 = int_to_ptr.vmem [resolvable:$true] %s153_s0  ;;  %s177_s2 = int_to_ptr.vmem [resolvable:$true] %s176_s2 }
  0x43   :  { %s4376_s29 = scalar_lea.vmem %s154_s0, 512  ;;  %p4381_p7 = scmp.lt.s32.totalorder %s154_s0, %s154_s0 }
  0x44   :  { %p4377_p6 = scmp.ne.s32.totalorder %s154_s0, %s4376_s29  ;;  %p4382_p8 = scmp.lt.s32.totalorder %s4376_s29, %s4376_s29 }
  0x46   :  { %p4383_p9 = por %p4382_p8, %p4381_p7 }
  0x48   :  { %p4384_p10 = pnand %p4383_p9, %p4377_p6 }
  0x4a   :  { %4387 = shalt.err (!%p4384_p10)
}
  0x4b   :  { %159 = dma.hbm_to_vmem [thread:$0]  %s5480_s12, 512, %s154_s0, [#allocation18], %s4672_s3, %s4672_s3, %s4673_s26  }
  0x4c   :  { %s4396_s10 = scalar_lea.vmem %s177_s2, 16  ;;  %s4400_s7 = scalar_lea.vmem %s177_s2, 32 }
  0x4d   :  { %p4397_p11 = scmp.ne.s32.totalorder %s177_s2, %s4396_s10  ;;  %p4401_p12 = scmp.lt.s32.totalorder %s177_s2, %s177_s2 }
  0x4e   :  { %p4402_p13 = scmp.lt.s32.totalorder %s4400_s7, %s4396_s10 }
  0x50   :  { %p4403_p0 = por %p4402_p13, %p4401_p12 }
  0x52   :  { %p4404_p1 = pnand %p4403_p0, %p4397_p11 }
  0x54   :  { %4407 = shalt.err (!%p4404_p1)
}
  0x55   :  { %179 = dma.hbm_to_vmem [thread:$0]  %s5482_s14, 16, %s177_s2, [#allocation21]  }
  0x56   :  { %s4678_s28 = smov [#allocation23]   ;;  %s4679_s9 = smov [#allocation2]  }
  0x57   :  { %s196_s30 = sshll.u32 %s4678_s28, 4  ;;  %s47_s5 = sshll.u32 %s4679_s9, 4  ;;  %s197_s30 = int_to_ptr.vmem [resolvable:$true] %s196_s30  ;;  %s48_s5 = int_to_ptr.vmem [resolvable:$true] %s47_s5 }
  0x58   :  { %s4416_s6 = scalar_lea.vmem %s197_s30, 16  ;;  %s4420_s12 = scalar_lea.vmem %s197_s30, 32 }
  0x59   :  { %p4417_p2 = scmp.ne.s32.totalorder %s197_s30, %s4416_s6  ;;  %p4421_p3 = scmp.lt.s32.totalorder %s197_s30, %s197_s30 }
  0x5a   :  { %p4422_p4 = scmp.lt.s32.totalorder %s4420_s12, %s4416_s6 }
  0x5c   :  { %p4423_p5 = por %p4422_p4, %p4421_p3 }
  0x5e   :  { %p4424_p6 = pnand %p4423_p5, %p4417_p2 }
  0x60   :  { %4427 = shalt.err (!%p4424_p6)
}
  0x61   :  { %199 = dma.hbm_to_vmem [thread:$0]  %s5484_s16, 16, %s197_s30, [#allocation24]  }
  0x62   :  { %s4436_s1 = scalar_lea.vmem %s48_s5, 256  ;;  %p4441_p8 = scmp.lt.s32.totalorder %s48_s5, %s48_s5 }
  0x63   :  { %p4437_p7 = scmp.ne.s32.totalorder %s48_s5, %s4436_s1  ;;  %p4442_p9 = scmp.lt.s32.totalorder %s4436_s1, %s4436_s1 }
  0x65   :  { %p4443_p10 = por %p4442_p9, %p4441_p8 }
  0x67   :  { %p4444_p11 = pnand %p4443_p10, %p4437_p7 }
  0x69   :  { %4447 = shalt.err (!%p4444_p11)
}
  0x6a   :  { %s5510_s8 = sld [smem:[#allocation42_spill]]  ;;  %s4680_s10 = smov [#allocation7]  }
  0x6b   :  { %s71_s7 = sshll.u32 %s4680_s10, 4  ;;  %s4681_s27 = smov [#allocation10]   ;;  %s72_s7 = int_to_ptr.vmem [resolvable:$true] %s71_s7 }
  0x6c   :  { %s98_s4 = sshll.u32 %s4681_s27, 4  ;;  %s4456_s16 = scalar_lea.vmem %s72_s7, 256  ;;  %s99_s4 = int_to_ptr.vmem [resolvable:$true] %s98_s4 }
  0x6d   :  { %p4457_p12 = scmp.ne.s32.totalorder %s72_s7, %s4456_s16  ;;  %p4461_p13 = scmp.lt.s32.totalorder %s72_s7, %s72_s7 }
  0x6e   :  { %p4462_p0 = scmp.lt.s32.totalorder %s4456_s16, %s4456_s16 }
  0x70   :  { %53 = dma.hbm_to_vmem [thread:$0]  %s5510_s8, 256, %s48_s5, [#allocation3], %s4672_s3, %s4672_s3, %s4673_s26  }
  0x71   :  { %p4463_p1 = por %p4462_p0, %p4461_p13 }
  0x73   :  { %p4464_p2 = pnand %p4463_p1, %p4457_p12 }
  0x75   :  { %4467 = shalt.err (!%p4464_p2)
}
  0x76   :  { %s5511_s9 = sld [smem:[#allocation44_spill]]  ;;  %s4476_s5 = scalar_lea.vmem %s99_s4, 16 }
  0x77   :  { %p4477_p3 = scmp.ne.s32.totalorder %s99_s4, %s4476_s5  ;;  %s4480_s6 = scalar_lea.vmem %s99_s4, 32 }
  0x78   :  { %p4481_p4 = scmp.lt.s32.totalorder %s99_s4, %s99_s4  ;;  %p4482_p5 = scmp.lt.s32.totalorder %s4480_s6, %s4476_s5 }
  0x7a   :  { %p4483_p6 = por %p4482_p5, %p4481_p4 }
  0x7c   :  { %77 = dma.hbm_to_vmem [thread:$0]  %s5511_s9, 256, %s72_s7, [#allocation6], %s4672_s3, %s4672_s3, %s4673_s26  }
  0x7d   :  { %p4484_p7 = pnand %p4483_p6, %p4477_p3 }
  0x7f   :  { %4487 = shalt.err (!%p4484_p7)
}
  0x80   :  { %s5512_s29 = sld [smem:[#allocation47_spill]]  ;;  %s4682_s1 = smov [#allocation13]  }
  0x81   :  { %s122_s14 = sshll.u32 %s4682_s1, 4  ;;  %s4683_s2 = smov [#allocation16]   ;;  %s123_s14 = int_to_ptr.vmem [resolvable:$true] %s122_s14 }
  0x82   :  { %s144_s8 = sshll.u32 %s4683_s2, 4  ;;  %s4496_s10 = scalar_lea.vmem %s123_s14, 16  ;;  %s145_s8 = int_to_ptr.vmem [resolvable:$true] %s144_s8 }
  0x83   :  { %p4497_p8 = scmp.ne.s32.totalorder %s123_s14, %s4496_s10  ;;  %s4500_s7 = scalar_lea.vmem %s123_s14, 32 }
  0x84   :  { %p4501_p9 = scmp.lt.s32.totalorder %s123_s14, %s123_s14  ;;  %p4502_p10 = scmp.lt.s32.totalorder %s4500_s7, %s4496_s10 }
  0x86   :  { %101 = dma.hbm_to_vmem [thread:$0]  %s5512_s29, 16, %s99_s4, [#allocation9]  }
  0x87   :  { %p4503_p11 = por %p4502_p10, %p4501_p9 }
  0x89   :  { %p4504_p12 = pnand %p4503_p11, %p4497_p8 }
  0x8b   :  { %4507 = shalt.err (!%p4504_p12)
}
  0x8c   :  { %s5513_s28 = sld [smem:[#allocation51_spill]]  ;;  %s4516_s30 = scalar_lea.vmem %s145_s8, 16 }
  0x8d   :  { %p4517_p13 = scmp.ne.s32.totalorder %s145_s8, %s4516_s30  ;;  %s4520_s4 = scalar_lea.vmem %s145_s8, 32 }
  0x8e   :  { %p4521_p0 = scmp.lt.s32.totalorder %s145_s8, %s145_s8  ;;  %p4522_p1 = scmp.lt.s32.totalorder %s4520_s4, %s4516_s30 }
  0x90   :  { %p4523_p2 = por %p4522_p1, %p4521_p0 }
  0x92   :  { %125 = dma.hbm_to_vmem [thread:$0]  %s5513_s28, 16, %s123_s14, [#allocation12]  }
  0x93   :  { %p4524_p3 = pnand %p4523_p2, %p4517_p13 }
  0x95   :  { %4527 = shalt.err (!%p4524_p3)
}
  0x96   :  { %147 = dma.hbm_to_vmem [thread:$0]  %s5479_s11, 16, %s145_s8, [#allocation15]  }
  0x97   :  { %s4684_s6 = smov [#allocation19]   ;;  %s4685_s0 = smov [#allocation22]  }
  0x98   :  { %s166_s12 = sshll.u32 %s4684_s6, 4  ;;  %s186_s29 = sshll.u32 %s4685_s0, 4  ;;  %s167_s12 = int_to_ptr.vmem [resolvable:$true] %s166_s12  ;;  %s187_s29 = int_to_ptr.vmem [resolvable:$true] %s186_s29 }
  0x99   :  { %s4536_s1 = scalar_lea.vmem %s167_s12, 16  ;;  %s4540_s14 = scalar_lea.vmem %s167_s12, 32 }
  0x9a   :  { %p4537_p4 = scmp.ne.s32.totalorder %s167_s12, %s4536_s1  ;;  %p4541_p5 = scmp.lt.s32.totalorder %s167_s12, %s167_s12 }
  0x9b   :  { %p4542_p6 = scmp.lt.s32.totalorder %s4540_s14, %s4536_s1 }
  0x9d   :  { %p4543_p7 = por %p4542_p6, %p4541_p5 }
  0x9f   :  { %p4544_p8 = pnand %p4543_p7, %p4537_p4 }
  0xa1   :  { %4547 = shalt.err (!%p4544_p8)
}
  0xa2   :  { %169 = dma.hbm_to_vmem [thread:$0]  %s5481_s13, 16, %s167_s12, [#allocation18]  }
  0xa3   :  { %s4556_s7 = scalar_lea.vmem %s187_s29, 16  ;;  %s4560_s11 = scalar_lea.vmem %s187_s29, 32 }
  0xa4   :  { %p4557_p9 = scmp.ne.s32.totalorder %s187_s29, %s4556_s7  ;;  %p4561_p10 = scmp.lt.s32.totalorder %s187_s29, %s187_s29 }
  0xa5   :  { %p4562_p11 = scmp.lt.s32.totalorder %s4560_s11, %s4556_s7 }
  0xa7   :  { %p4563_p12 = por %p4562_p11, %p4561_p10 }
  0xa9   :  { %p4564_p13 = pnand %p4563_p12, %p4557_p9 }
  0xab   :  { %4567 = shalt.err (!%p4564_p13)
}
  0xac   :  { %189 = dma.hbm_to_vmem [thread:$0]  %s5483_s15, 16, %s187_s29, [#allocation21]  }
  0xad   :  { %s4686_s16 = smov [#allocation25]   ;;  %s4687_s30 = smov [#allocation26]  }
  0xae   :  { %s206_s28 = sshll.u32 %s4686_s16, 4  ;;  %s216_s4 = sshll.u32 %s4687_s30, 4  ;;  %s207_s28 = int_to_ptr.vmem [resolvable:$true] %s206_s28  ;;  %s217_s4 = int_to_ptr.vmem [resolvable:$true] %s216_s4 }
  0xaf   :  { %s4576_s9 = scalar_lea.vmem %s207_s28, 16  ;;  %s4580_s13 = scalar_lea.vmem %s207_s28, 32 }
  0xb0   :  { %p4577_p0 = scmp.ne.s32.totalorder %s207_s28, %s4576_s9  ;;  %p4581_p1 = scmp.lt.s32.totalorder %s207_s28, %s207_s28 }
  0xb1   :  { %p4582_p2 = scmp.lt.s32.totalorder %s4580_s13, %s4576_s9 }
  0xb3   :  { %p4583_p3 = por %p4582_p2, %p4581_p1 }
  0xb5   :  { %p4584_p4 = pnand %p4583_p3, %p4577_p0 }
  0xb7   :  { %4587 = shalt.err (!%p4584_p4)
}
  0xb8   :  { %209 = dma.hbm_to_vmem [thread:$0]  %s5485_s17, 16, %s207_s28, [#allocation24]  }
  0xb9   :  { %s4596_s12 = scalar_lea.vmem %s217_s4, 16  ;;  %s4600_s15 = scalar_lea.vmem %s217_s4, 32 }
  0xba   :  { %p4597_p5 = scmp.ne.s32.totalorder %s217_s4, %s4596_s12  ;;  %p4601_p6 = scmp.lt.s32.totalorder %s217_s4, %s217_s4 }
  0xbb   :  { %p4602_p7 = scmp.lt.s32.totalorder %s4600_s15, %s4596_s12 }
  0xbd   :  { %p4603_p8 = por %p4602_p7, %p4601_p6 }
  0xbf   :  { %p4604_p9 = pnand %p4603_p8, %p4597_p5 }
  0xc1   :  { %4607 = shalt.err (!%p4604_p9)
}
  0xc2   :  { %219 = dma.hbm_to_vmem [thread:$0]  %s5486_s18, 16, %s217_s4, [#allocation27]  }
  0xc3   :  { %4648 = dma.done.wait [#allocation3], 256  }
  0xc4   :  { %4649 = vsyncadd [#allocation3], 4294967040 }
  0xc5   :  { %4650 = dma.done.wait [#allocation6], 640  }
  0xc6   :  { %4651 = vsyncadd [#allocation6], 4294966656 }
  0xc7   :  { %4652 = dma.done.wait [#allocation9], 272  }
  0xc8   :  { %4653 = vsyncadd [#allocation9], 4294967024 }
  0xc9   :  { %4654 = dma.done.wait [#allocation12], 32  }
  0xca   :  { %4655 = vsyncadd [#allocation12], 4294967264 }
  0xcb   :  { %4656 = dma.done.wait [#allocation15], 528  }
  0xcc   :  { %4657 = vsyncadd [#allocation15], 4294966768 }
  0xcd   :  { %4658 = dma.done.wait [#allocation18], 528  }
  0xce   :  { %4659 = vsyncadd [#allocation18], 4294966768 }
  0xcf   :  { %4660 = dma.done.wait [#allocation21], 32  }
  0xd0   :  { %4661 = vsyncadd [#allocation21], 4294967264 }
  0xd1   :  { %4662 = dma.done.wait [#allocation24], 32  }
  0xd2   :  { %4663 = vsyncadd [#allocation24], 4294967264 }
  0xd3   :  { %4664 = dma.done.wait [#allocation27], 16  }
  0xd4   :  { %4665 = vsyncadd [#allocation27], 4294967280  ;;  %v4688_v0 = vmov 0.0   ;;  %vm4689_vm0 = vmmov 0   ;;  %s5514_s1 = sld [smem:[#allocation46_spill]]  ;;  %v4919_v7 = vld [vmem:[#allocation2] sm:$0xff] }
  0xd5   :  { %3895 = vmatprep.subr.bf16.mxu0 %v4688_v0  ;;  %3899 = vmatprep.mubr.msk.bf16.mxu0 %vm4689_vm0, %v4688_v0  ;;  %v4921_v8 = vld [vmem:[#allocation2 + $0x8] sm:$0xff]  ;;  %vm295_vm1 = vcmask 261120   ;;  %s4690_s27 = smov 64   ;;  %s4691_s16 = smov 96   ;;  %vm344_vm2 = vcmask 64512   ;;  %v1027_v63 = vld [vmem:[#allocation7 + $0x8] sm:$0xff] }
  0xd6   :  { %3908 = vmatprep.subr.mxu1 %v4688_v0  ;;  %3910 = vmatprep.mubr.msk.f32.mxu1 %vm4689_vm0, %v4688_v0  ;;  %v285_v9 = vpack.c.bf16 %v4921_v8, %v4919_v7  ;;  %v3706_v10 = vld [vmem:[#allocation10] ss:$0 sm:$0xff]  ;;  %s4692_s28 = smov 88   ;;  %s4693_s30 = smov 120   ;;  %vm1022_vm3 = vcmask 130048   ;;  %vm1024_vm4 = vcmask 195584  }
  0xd7   :  { %s4694_s4 = smov 80   ;;  %s4695_s9 = smov 112   ;;  %v4953_v20 = vld [vmem:[#allocation7] sm:$0xff]  ;;  %vm2027_vm5 = vcmask 80896   ;;  %vm2047_vm6 = vcmask 1041408   ;;  %vm2668_vm7 = vcmask 1045504  }
  0xd8   :  { %s4696_s13 = smov 72   ;;  %s4697_s5 = smov 104   ;;  %vm3572_vm8 = vcmask 523264  }
  0xd9   :  { %s4698_s6 = smov 48   ;;  %s4699_s12 = smov 40  }
  0xda   :  { %v283_v1 = vld [vmem:[%s5514_s1 + $0x10] sm:$0xff]  ;;  %v284_v2 = vld [vmem:[%s5514_s1 + $0x18] sm:$0xff]  ;;  %v281_v3 = vld [vmem:[%s5514_s1] sm:$0xff]  ;;  %s4700_s15 = smov 56   ;;  %s5515_s17 = sld [smem:[#allocation48_spill]] }
  0xdb   :  { %v287_v4 = vpack.c.bf16 %v284_v2, %v283_v1  ;;  %v282_v5 = vld [vmem:[%s5514_s1 + $0x8] sm:$0xff]  ;;  %s4701_s11 = smov 16   ;;  %s4702_s8 = smov 24  }
  0xdc   :  { %v286_v6 = vpack.c.bf16 %v282_v5, %v281_v3 }
  0xdd   :  { %3896 = vmatpush3.bf16.msra.mxu0 %v287_v4 }
  0xde   :  { %3897 = vmatprep.subr.bf16.mxu0 %v4688_v0 }
  0xe1   :  { %3898 = vmatpush3.bf16.msra.mxu0 %v286_v6 }
  0xe2   :  { %3903 = vmatprep.subr.mxu0 %v4688_v0 }
  0xe4   :  { %3900 = vmatmul.mubr.msk.bf16.vlgmr.msra.gmra.mxu0 %vm295_vm1, %v285_v9 }
  0xe5   :  { %3905 = vmatprep.mubr.msk.f32.mxu0 %vm4689_vm0, %v4688_v0 }
 0x1a4   :  { %v333_v11 = vpop.f32.mrf.mxu0 }
 0x1a5   :  { %v4930_v12 = vadd.f32 %v3706_v10, %v333_v11 }
 0x1a6   :  { %v3901_v13 = vpop.f32.mrf.mxu0 }
 0x1a7   :  { %432 = vrot.lane.b32.xlu1 %v4930_v12, %s4690_s27  ;;  %342 = vrot.lane.b32.xlu0 %v4930_v12, %s4691_s16 }
 0x1a8   :  { %v336_v14 = vpop.f32.mrf.mxu0 }
 0x1a9   :  { %v4936_v15 = vadd.f32 %v3706_v10, %v336_v14 }
 0x1aa   :  { %v3902_v16 = vpop.f32.mrf.mxu0 }
 0x1ab   :  { %510 = vrot.lane.b32.xlu1 %v4930_v12, %s4692_s28 }
 0x1af   :  { %508 = vrot.lane.b32.xlu1 %v4930_v12, %s4693_s30 }
 0x1b3   :  { %677 = vrot.lane.b32.xlu1 %v4930_v12, %s4694_s4 }
 0x1b7   :  { %675 = vrot.lane.b32.xlu1 %v4930_v12, %s4695_s9 }
 0x219   :  { %v433_v17 = vpop.permute.xlu1 %432  ;;  %v343_v18 = vpop.permute.xlu0 %342 }
 0x21a   :  { %3904 = vmatpush3.xpose.msk.msra.mxu0 %vm344_vm2, %v343_v18  ;;  %3909 = vmatpush3.msra.mxu1 %v433_v17 }
 0x21b   :  { %3913 = vmatprep.subr.mxu1 %v4688_v0  ;;  %3918 = vmatprep.subr.mxu0 %v4688_v0 }
 0x21d   :  { %3906 = vmatmul.mubr.msk.f32.vlgmr.msra.gmra.mxu0 %vm344_vm2, %v4930_v12  ;;  %v511_v30 = vpop.permute.xlu1 %510 }
 0x21e   :  { %3920 = vmatprep.mubr.msk.f32.mxu0 %vm4689_vm0, %v4688_v0 }
 0x221   :  { %v509_v31 = vpop.permute.xlu1 %508 }
 0x225   :  { %v678_v32 = vpop.permute.xlu1 %677 }
 0x229   :  { %v676_v33 = vpop.permute.xlu1 %675 }
 0x2dd   :  { %v415_v19 = vpop.f32.mrf.mxu0 }
 0x2de   :  { %v419_v21 = vmul.f32 0.35355338, %v415_v19 }
 0x2df   :  { %v3907_v22 = vpop.f32.mrf.mxu0 }
 0x2e0   :  { %v420_v23 = vadd.f32 %v419_v21, %v4953_v20 }
 0x2e2   :  { %v421_v24 = vsel %vm344_vm2, %v420_v23, -inf }
 0x2e3   :  { %422 = vmax.xlane.f32.xlu0 %v421_v24 }
 0x2f9   :  { %844 = vrot.lane.b32.xlu0 %v4930_v12, %s4696_s13 }
 0x2fd   :  { %1361 = vrot.lane.b32.xlu0 %v4936_v15, %s4695_s9 }
 0x301   :  { %1528 = vrot.lane.b32.xlu0 %v4936_v15, %s4697_s5 }
 0x36c   :  { %v423_v25 = vpop.xlane.xlu0 %422 }
 0x36d   :  { %v424_v26 = vsub.f32 %v420_v23, %v423_v25 }
 0x36f   :  { %v425_v27 = vmul.f32 1.442695, %v424_v26 }
 0x370   :  { %v845_v40 = vpop.permute.xlu0 %844 }
 0x371   :  { %4212 = vpow2.f32 %v425_v27 }
 0x374   :  { %v1362_v43 = vpop.permute.xlu0 %1361 }
 0x378   :  { %v1529_v45 = vpop.permute.xlu0 %1528 }
 0x37e   :  { %v4213_v28 = vpop.eup %4212 }
 0x37f   :  { %v427_v29 = vsel %vm344_vm2, %v4213_v28, 0.0 }
 0x380   :  { %428 = vadd.xlane.f32.xlu1 %v427_v29 }
 0x391   :  { %842 = vrot.lane.b32.xlu1 %v4930_v12, %s4697_s5 }
 0x395   :  { %1029 = vrot.lane.b32.xlu1 %v4936_v15, %s4691_s16 }
 0x399   :  { %1196 = vrot.lane.b32.xlu1 %v4936_v15, %s4692_s28 }
 0x39d   :  { %1194 = vrot.lane.b32.xlu1 %v4936_v15, %s4693_s30 }
 0x3a1   :  { %1363 = vrot.lane.b32.xlu1 %v4936_v15, %s4694_s4 }
 0x3a5   :  { %1530 = vrot.lane.b32.xlu1 %v4936_v15, %s4696_s13 }
 0x409   :  { %v429_v34 = vpop.xlane.xlu1 %428 }
 0x40a   :  { %4214 = vrcp.f32 %v429_v34 }
 0x40d   :  { %v843_v35 = vpop.permute.xlu1 %842 }
 0x411   :  { %v1030_v38 = vpop.permute.xlu1 %1029 }
 0x415   :  { %v1197_v39 = vpop.permute.xlu1 %1196 }
 0x417   :  { %v4215_v36 = vpop.eup %4214 }
 0x418   :  { %v431_v37 = vmul.f32 %v4215_v36, %v4213_v28 }
 0x419   :  { %v1195_v41 = vpop.permute.xlu1 %1194 }
 0x41a   :  { %3911 = vmatmul.mubr.msk.f32.vlgmr.msra.gmra.mxu1 %vm344_vm2, %v431_v37 }
 0x41b   :  { %3914 = vmatpush3.xpose.msk.msra.mxu1 %vm344_vm2, %v511_v30  ;;  %3915 = vmatprep.mubr.msk.f32.mxu1 %vm4689_vm0, %v4688_v0 }
 0x41c   :  { %3923 = vmatprep.subr.mxu1 %v4688_v0 }
 0x41d   :  { %v1364_v42 = vpop.permute.xlu1 %1363 }
 0x41e   :  { %3916 = vmatmul.mubr.msk.f32.vlgmr.msra.gmra.mxu1 %vm344_vm2, %v509_v31 }
 0x41f   :  { %3924 = vmatpush3.xpose.msk.msra.mxu1 %vm344_vm2, %v678_v32  ;;  %3925 = vmatprep.mubr.msk.f32.mxu1 %vm4689_vm0, %v4688_v0 }
 0x420   :  { %3933 = vmatprep.subr.mxu1 %v4688_v0 }
 0x421   :  { %v1531_v44 = vpop.permute.xlu1 %1530 }
 0x422   :  { %3926 = vmatmul.mubr.msk.f32.vlgmr.msra.gmra.mxu1 %vm344_vm2, %v676_v33 }
 0x423   :  { %3934 = vmatpush3.xpose.msk.msra.mxu1 %vm344_vm2, %v845_v40  ;;  %3935 = vmatprep.mubr.msk.f32.mxu1 %vm4689_vm0, %v4688_v0 }
 0x424   :  { %3943 = vmatprep.subr.mxu1 %v4688_v0 }
 0x426   :  { %3936 = vmatmul.mubr.msk.f32.vlgmr.msra.gmra.mxu1 %vm344_vm2, %v843_v35 }
 0x427   :  { %3944 = vmatpush3.xpose.msk.msra.mxu1 %vm344_vm2, %v1030_v38  ;;  %3945 = vmatprep.mubr.msk.f32.mxu1 %vm4689_vm0, %v4688_v0 }
 0x428   :  { %3953 = vmatprep.subr.mxu1 %v4688_v0 }
 0x42a   :  { %3946 = vmatmul.mubr.msk.f32.vlgmr.msra.gmra.mxu1 %vm344_vm2, %v4936_v15 }
 0x42b   :  { %3954 = vmatpush3.xpose.msk.msra.mxu1 %vm344_vm2, %v1197_v39  ;;  %3955 = vmatprep.mubr.msk.f32.mxu1 %vm4689_vm0, %v4688_v0 }
 0x42c   :  { %3963 = vmatprep.subr.mxu1 %v4688_v0 }
 0x42e   :  { %3956 = vmatmul.mubr.msk.f32.vlgmr.msra.gmra.mxu1 %vm344_vm2, %v1195_v41 }
 0x42f   :  { %3964 = vmatpush3.xpose.msk.msra.mxu1 %vm344_vm2, %v1364_v42  ;;  %3965 = vmatprep.mubr.msk.f32.mxu1 %vm4689_vm0, %v4688_v0 }
 0x430   :  { %3973 = vmatprep.subr.mxu1 %v4688_v0 }
 0x432   :  { %3966 = vmatmul.mubr.msk.f32.vlgmr.msra.gmra.mxu1 %vm344_vm2, %v1362_v43 }
 0x433   :  { %3974 = vmatpush3.xpose.msk.msra.mxu1 %vm344_vm2, %v1531_v44  ;;  %3975 = vmatprep.mubr.msk.f32.mxu1 %vm4689_vm0, %v4688_v0 }
 0x434   :  { %3983 = vmatprep.subr.bf16.mxu1 %v4688_v0 }
 0x436   :  { %3976 = vmatmul.mubr.msk.f32.vlgmr.msra.gmra.mxu1 %vm344_vm2, %v1529_v45 }
 0x437   :  { %3987 = vmatprep.mubr.msk.bf16.mxu1 %vm4689_vm0, %v4688_v0 }
 0x4da   :  { %v5015_v46 = vpop.f32.mrf.mxu1 }
 0x4dc   :  { %v3912_v47 = vpop.f32.mrf.mxu1 }
 0x4de   :  { %v582_v48 = vpop.f32.mrf.mxu1 }
 0x4df   :  { %v586_v49 = vmul.f32 0.35355338, %v582_v48 }
 0x4e0   :  { %v3917_v50 = vpop.f32.mrf.mxu1 }
 0x4e1   :  { %v587_v51 = vadd.f32 %v586_v49, %v4953_v20 }
 0x4e2   :  { %v749_v52 = vpop.f32.mrf.mxu1 }
 0x4e3   :  { %v753_v53 = vmul.f32 0.35355338, %v749_v52  ;;  %v588_v54 = vsel %vm344_vm2, %v587_v51, -inf }
 0x4e4   :  { %589 = vmax.xlane.f32.xlu1 %v588_v54  ;;  %v3927_v55 = vpop.f32.mrf.mxu1 }
 0x4e5   :  { %v754_v56 = vadd.f32 %v753_v53, %v4953_v20 }
 0x4e6   :  { %v916_v57 = vpop.f32.mrf.mxu1 }
 0x4e7   :  { %v920_v58 = vmul.f32 0.35355338, %v916_v57  ;;  %v755_v59 = vsel %vm344_vm2, %v754_v56, -inf }
 0x4e8   :  { %756 = vmax.xlane.f32.xlu0 %v755_v59  ;;  %v3937_v60 = vpop.f32.mrf.mxu1 }
 0x4e9   :  { %v921_v61 = vadd.f32 %v920_v58, %v4953_v20 }
 0x4ea   :  { %v1101_v62 = vpop.f32.mrf.mxu1 }
 0x4eb   :  { %v1105_v1 = vmul.f32 0.35355338, %v1101_v62  ;;  %v922_v2 = vsel %vm344_vm2, %v921_v61, -inf }
 0x4ec   :  { %923 = vmax.xlane.f32.xlu0 %v922_v2  ;;  %v3947_v3 = vpop.f32.mrf.mxu1 }
 0x4ed   :  { %v1106_v4 = vadd.f32 %v1105_v1, %v1027_v63 }
 0x4ee   :  { %v1268_v5 = vpop.f32.mrf.mxu1 }
 0x4ef   :  { %v1272_v6 = vmul.f32 0.35355338, %v1268_v5  ;;  %v1107_v9 = vsel %vm344_vm2, %v1106_v4, -inf }
 0x4f0   :  { %1108 = vmax.xlane.f32.xlu1 %v1107_v9  ;;  %v3957_v10 = vpop.f32.mrf.mxu1 }
 0x4f1   :  { %v1273_v11 = vadd.f32 %v1272_v6, %v1027_v63 }
 0x4f2   :  { %v1435_v13 = vpop.f32.mrf.mxu1 }
 0x4f3   :  { %v1439_v14 = vmul.f32 0.35355338, %v1435_v13  ;;  %v1274_v16 = vsel %vm344_vm2, %v1273_v11, -inf }
 0x4f4   :  { %1275 = vmax.xlane.f32.xlu0 %v1274_v16  ;;  %v3967_v17 = vpop.f32.mrf.mxu1 }
 0x4f5   :  { %v1440_v18 = vadd.f32 %v1439_v14, %v1027_v63 }
 0x4f6   :  { %v1602_v19 = vpop.f32.mrf.mxu1 }
 0x4f7   :  { %v1606_v20 = vmul.f32 0.35355338, %v1602_v19  ;;  %v1441_v21 = vsel %vm344_vm2, %v1440_v18, -inf }
 0x4f8   :  { %1442 = vmax.xlane.f32.xlu1 %v1441_v21  ;;  %v3977_v22 = vpop.f32.mrf.mxu1 }
 0x4f9   :  { %v1607_v23 = vadd.f32 %v1606_v20, %v1027_v63 }
 0x4fb   :  { %v1608_v24 = vsel %vm344_vm2, %v1607_v23, -inf }
 0x4fc   :  { %1609 = vmax.xlane.f32.xlu0 %v1608_v24 }
 0x509   :  { %766 = vrot.lane.b32.xlu1 %v4930_v12, %s4698_s6 }
 0x50d   :  { %933 = vrot.lane.b32.xlu1 %v4930_v12, %s4699_s12 }
 0x512   :  { %599 = vrot.lane.b32.xlu0 %v4930_v12, %s4700_s15 }
 0x56d   :  { %v590_v25 = vpop.xlane.xlu1 %589 }
 0x56e   :  { %v591_v26 = vsub.f32 %v587_v51, %v590_v25 }
 0x570   :  { %v592_v27 = vmul.f32 1.442695, %v591_v26 }
 0x571   :  { %v757_v28 = vpop.xlane.xlu0 %756 }
 0x572   :  { %4216 = vpow2.f32 %v592_v27  ;;  %v758_v29 = vsub.f32 %v754_v56, %v757_v28 }
 0x574   :  { %v759_v30 = vmul.f32 1.442695, %v758_v29 }
 0x575   :  { %v924_v31 = vpop.xlane.xlu0 %923 }
 0x576   :  { %4218 = vpow2.f32 %v759_v30  ;;  %v925_v38 = vsub.f32 %v921_v61, %v924_v31 }
 0x578   :  { %v926_v41 = vmul.f32 1.442695, %v925_v38  ;;  %v1710_v38 = vld [vmem:[%s5515_s17] sm:$0xff] }
 0x579   :  { %v1109_v39 = vpop.xlane.xlu1 %1108 }
 0x57a   :  { %v1110_v40 = vsub.f32 %v1106_v4, %v1109_v39  ;;  %4220 = vpow2.f32 %v926_v41  ;;  %v1711_v39 = vld [vmem:[%s5515_s17 + $0x8] sm:$0xff] }
 0x57c   :  { %v1111_v44 = vmul.f32 1.442695, %v1110_v40  ;;  %v1715_v40 = vpack.c.bf16 %v1711_v39, %v1710_v38 }
 0x57d   :  { %v1276_v34 = vpop.xlane.xlu0 %1275 }
 0x57e   :  { %v1277_v42 = vsub.f32 %v1273_v11, %v1276_v34  ;;  %4222 = vpow2.f32 %v1111_v44  ;;  %v1712_v34 = vld [vmem:[%s5515_s17 + $0x10] sm:$0xff] }
 0x57f   :  { %v4217_v32 = vpop.eup %4216 }
 0x580   :  { %v594_v33 = vsel %vm344_vm2, %v4217_v32, 0.0  ;;  %v1278_v47 = vmul.f32 1.442695, %v1277_v42 }
 0x581   :  { %595 = vadd.xlane.f32.xlu1 %v594_v33  ;;  %v1443_v43 = vpop.xlane.xlu1 %1442 }
 0x582   :  { %v1444_v45 = vsub.f32 %v1440_v18, %v1443_v43  ;;  %4224 = vpow2.f32 %v1278_v47 }
 0x583   :  { %v4219_v35 = vpop.eup %4218 }
 0x584   :  { %v761_v36 = vsel %vm344_vm2, %v4219_v35, 0.0  ;;  %v1445_v49 = vmul.f32 1.442695, %v1444_v45 }
 0x585   :  { %762 = vadd.xlane.f32.xlu0 %v761_v36  ;;  %v1610_v37 = vpop.xlane.xlu0 %1609  ;;  %v767_v61 = vpop.permute.xlu1 %766 }
 0x586   :  { %v1611_v48 = vsub.f32 %v1607_v23, %v1610_v37  ;;  %4226 = vpow2.f32 %v1445_v49 }
 0x587   :  { %v4221_v51 = vpop.eup %4220 }
 0x588   :  { %v1612_v50 = vmul.f32 1.442695, %v1611_v48  ;;  %v928_v53 = vsel %vm344_vm2, %v4221_v51, 0.0 }
 0x589   :  { %v600_v12 = vpop.permute.xlu0 %599  ;;  %v934_v62 = vpop.permute.xlu1 %933 }
 0x58a   :  { %3919 = vmatpush3.msra.mxu0 %v600_v12  ;;  %4228 = vpow2.f32 %v1612_v50 }
 0x58b   :  { %3928 = vmatprep.subr.mxu0 %v4688_v0  ;;  %v4223_v52 = vpop.eup %4222 }
 0x58c   :  { %v1113_v56 = vsel %vm344_vm2, %v4223_v52, 0.0 }
 0x58f   :  { %v4225_v54 = vpop.eup %4224 }
 0x590   :  { %v1280_v57 = vsel %vm344_vm2, %v4225_v54, 0.0 }
 0x592   :  { %1285 = vrot.lane.b32.xlu1 %v4936_v15, %s4700_s15 }
 0x593   :  { %v4227_v55 = vpop.eup %4226 }
 0x594   :  { %v1447_v59 = vsel %vm344_vm2, %v4227_v55, 0.0 }
 0x597   :  { %v5041_v58 = vpop.eup %4228 }
 0x598   :  { %v1614_v60 = vsel %vm344_vm2, %v5041_v58, 0.0 }
 0x59b   :  { %1118 = vrot.lane.b32.xlu0 %v4936_v15, %s4690_s27 }
 0x5b6   :  { %929 = vadd.xlane.f32.xlu1 %v928_v53 }
 0x5ba   :  { %1114 = vadd.xlane.f32.xlu0 %v1113_v56  ;;  %1281 = vadd.xlane.f32.xlu1 %v1280_v57 }
 0x5be   :  { %1448 = vadd.xlane.f32.xlu0 %v1447_v59  ;;  %1615 = vadd.xlane.f32.xlu1 %v1614_v60 }
 0x5cf   :  { %1619 = vrot.lane.b32.xlu1 %v4936_v15, %s4699_s12  ;;  %s5516_s12 = sld [smem:[#allocation50_spill]] }
 0x5d4   :  { %1452 = vrot.lane.b32.xlu0 %v4936_v15, %s4698_s6 }
 0x5d5   :  { %v1815_v38 = vld [vmem:[%s5516_s12] sm:$0xff]  ;;  %v1816_v39 = vld [vmem:[%s5516_s12 + $0x8] sm:$0xff] }
 0x60a   :  { %v596_v63 = vpop.xlane.xlu1 %595 }
 0x60b   :  { %4230 = vrcp.f32 %v596_v63 }
 0x60e   :  { %v763_v1 = vpop.xlane.xlu0 %762  ;;  %v1286_v15 = vpop.permute.xlu1 %1285 }
 0x60f   :  { %4232 = vrcp.f32 %v763_v1 }
 0x612   :  { %v1119_v6 = vpop.permute.xlu0 %1118 }
 0x618   :  { %v4231_v2 = vpop.eup %4230 }
 0x619   :  { %v598_v3 = vmul.f32 %v4231_v2, %v4217_v32 }
 0x61b   :  { %3921 = vmatmul.mubr.msk.f32.vlgmr.msra.gmra.mxu0 %vm344_vm2, %v598_v3 }
 0x61c   :  { %v4233_v4 = vpop.eup %4232  ;;  %3929 = vmatpush3.msra.mxu0 %v767_v61  ;;  %3930 = vmatprep.mubr.msk.f32.mxu0 %vm4689_vm0, %v4688_v0 }
 0x61d   :  { %3938 = vmatprep.subr.mxu0 %v4688_v0  ;;  %v765_v5 = vmul.f32 %v4233_v4, %v4219_v35  ;;  %v1713_v35 = vld [vmem:[%s5515_s17 + $0x18] sm:$0xff]  ;;  %v3732_v4 = vld [vmem:[#allocation11] ss:$0 sm:$0xff] }
 0x61e   :  { %v1716_v36 = vpack.c.bf16 %v1713_v35, %v1712_v34  ;;  %v1875_v34 = vld [vmem:[#allocation5 + $0x10] sm:$0xf] }
 0x61f   :  { %3931 = vmatmul.mubr.msk.f32.vlgmr.msra.gmra.mxu0 %vm344_vm2, %v765_v5  ;;  %v1881_v35 = vpack.c.bf16 %v1875_v34, %v1875_v34 }
 0x620   :  { %3939 = vmatpush3.msra.mxu0 %v934_v62  ;;  %3940 = vmatprep.mubr.msk.f32.mxu0 %vm4689_vm0, %v4688_v0 }
 0x621   :  { %3948 = vmatprep.subr.mxu0 %v4688_v0  ;;  %3984 = vmatpush3.bf16.msra.mxu1 %v1716_v36  ;;  %v1817_v36 = vld [vmem:[%s5516_s12 + $0x10] sm:$0xff] }
 0x622   :  { %3985 = vmatprep.subr.bf16.mxu1 %v4688_v0 }
 0x625   :  { %3986 = vmatpush3.bf16.msra.mxu1 %v1715_v40  ;;  %v1820_v40 = vpack.c.bf16 %v1816_v39, %v1815_v38 }
 0x63f   :  { %v930_v9 = vpop.xlane.xlu1 %929 }
 0x640   :  { %4234 = vrcp.f32 %v930_v9 }
 0x643   :  { %v1115_v10 = vpop.xlane.xlu0 %1114  ;;  %v1282_v11 = vpop.xlane.xlu1 %1281 }
 0x644   :  { %4236 = vrcp.f32 %v1115_v10 }
 0x645   :  { %4238 = vrcp.f32 %v1282_v11 }
 0x647   :  { %v1449_v13 = vpop.xlane.xlu0 %1448  ;;  %v1616_v14 = vpop.xlane.xlu1 %1615 }
 0x648   :  { %4240 = vrcp.f32 %v1449_v13 }
 0x649   :  { %4242 = vrcp.f32 %v1616_v14 }
 0x64b   :  { %v1453_v23 = vpop.permute.xlu0 %1452  ;;  %v1620_v26 = vpop.permute.xlu1 %1619 }
 0x64d   :  { %v4235_v16 = vpop.eup %4234 }
 0x64e   :  { %v932_v17 = vmul.f32 %v4235_v16, %v4221_v51 }
 0x650   :  { %3941 = vmatmul.mubr.msk.f32.vlgmr.msra.gmra.mxu0 %vm344_vm2, %v932_v17 }
 0x651   :  { %3949 = vmatpush3.msra.mxu0 %v1119_v6  ;;  %3950 = vmatprep.mubr.msk.f32.mxu0 %vm4689_vm0, %v4688_v0  ;;  %v4237_v18 = vpop.eup %4236 }
 0x652   :  { %3958 = vmatprep.subr.mxu0 %v4688_v0  ;;  %v1117_v19 = vmul.f32 %v4237_v18, %v4223_v52  ;;  %v4239_v20 = vpop.eup %4238 }
 0x653   :  { %v1284_v21 = vmul.f32 %v4239_v20, %v4225_v54 }
 0x654   :  { %3951 = vmatmul.mubr.msk.f32.vlgmr.msra.gmra.mxu0 %vm344_vm2, %v1117_v19 }
 0x655   :  { %3959 = vmatpush3.msra.mxu0 %v1286_v15  ;;  %3960 = vmatprep.mubr.msk.f32.mxu0 %vm4689_vm0, %v4688_v0  ;;  %v4241_v22 = vpop.eup %4240 }
 0x656   :  { %3968 = vmatprep.subr.mxu0 %v4688_v0  ;;  %v1451_v24 = vmul.f32 %v4241_v22, %v4227_v55  ;;  %v4243_v25 = vpop.eup %4242 }
 0x657   :  { %v1618_v27 = vmul.f32 %v4243_v25, %v5041_v58 }
 0x658   :  { %3961 = vmatmul.mubr.msk.f32.vlgmr.msra.gmra.mxu0 %vm344_vm2, %v1284_v21 }
 0x659   :  { %3969 = vmatpush3.msra.mxu0 %v1453_v23  ;;  %3970 = vmatprep.mubr.msk.f32.mxu0 %vm4689_vm0, %v4688_v0 }
 0x65a   :  { %3978 = vmatprep.subr.mxu0 %v4688_v0 }
 0x65c   :  { %3971 = vmatmul.mubr.msk.f32.vlgmr.msra.gmra.mxu0 %vm344_vm2, %v1451_v24 }
 0x65d   :  { %3979 = vmatpush3.msra.mxu0 %v1620_v26  ;;  %3980 = vmatprep.mubr.msk.f32.mxu0 %vm4689_vm0, %v4688_v0  ;;  %v1878_v26 = vld [vmem:[#allocation14 + $0x10] sm:$0xff] }
 0x65e   :  { %3991 = vmatprep.subr.bf16.mxu0 %v4688_v0 }
 0x660   :  { %3981 = vmatmul.mubr.msk.f32.vlgmr.msra.gmra.mxu0 %vm344_vm2, %v1618_v27  ;;  %v1879_v27 = vld [vmem:[#allocation14 + $0x18] sm:$0xff] }
 0x661   :  { %3995 = vmatprep.mubr.msk.bf16.mxu0 %vm4689_vm0, %v4688_v0 }
 0x6db   :  { %v671_v28 = vpop.f32.mrf.mxu0 }
 0x6dd   :  { %v3922_v29 = vpop.f32.mrf.mxu0 }
 0x6de   :  { %v1877_v29 = vld [vmem:[#allocation14 + $0x8] sm:$0xff] }
 0x6df   :  { %v838_v30 = vpop.f32.mrf.mxu0 }
 0x6e1   :  { %v3932_v31 = vpop.f32.mrf.mxu0 }
 0x6e2   :  { %v1873_v31 = vld [vmem:[#allocation5] sm:$0xff] }
 0x710   :  { %v1005_v32 = vpop.f32.mrf.mxu0 }
 0x712   :  { %v3942_v33 = vpop.f32.mrf.mxu0 }
 0x714   :  { %v1190_v37 = vpop.f32.mrf.mxu0 }
 0x716   :  { %v3952_v12 = vpop.f32.mrf.mxu0 }
 0x718   :  { %v1357_v41 = vpop.f32.mrf.mxu0 }
 0x719   :  { %v4182_v42 = vpack.i.bf16 %v1357_v41, %v671_v28  ;;  %v1876_v28 = vld [vmem:[#allocation14] sm:$0xff] }
 0x71a   :  { %v3962_v43 = vpop.f32.mrf.mxu0 }
 0x71b   :  { %4183 = vrot.lane.b32.xlu0 %v4182_v42, %s4673_s26 }
 0x71c   :  { %v1524_v44 = vpop.f32.mrf.mxu0 }
 0x71d   :  { %v4187_v45 = vpack.i.bf16 %v1524_v44, %v838_v30  ;;  %v1882_v30 = vpack.c.bf16 %v1877_v29, %v1876_v28 }
 0x71e   :  { %v3972_v47 = vpop.f32.mrf.mxu0 }
 0x71f   :  { %4188 = vrot.lane.b32.xlu1 %v4187_v45, %s4701_s11 }
 0x720   :  { %v1691_v48 = vpop.f32.mrf.mxu0 }
 0x721   :  { %v4192_v49 = vpack.i.bf16 %v1691_v48, %v1005_v32  ;;  %v1874_v32 = vld [vmem:[#allocation5 + $0x8] sm:$0xff] }
 0x722   :  { %v3982_v50 = vpop.f32.mrf.mxu0  ;;  %v1880_v33 = vpack.c.bf16 %v1874_v32, %v1873_v31 }
 0x723   :  { %4193 = vrot.lane.b32.xlu0 %v4192_v49, %s4702_s8  ;;  %v3734_v50 = vld [vmem:[#allocation20] ss:$0 sm:$0xff] }
 0x78d   :  { %v4184_v51 = vpop.permute.xlu0 %4183 }
 0x78e   :  { %v4186_v53 = vunpack.i.h.bf16 %v4184_v51  ;;  %v4185_v54 = vunpack.i.l.bf16 %v4184_v51 }
 0x790   :  { %v1707_v58 = vsel %vm344_vm2, %v1190_v37, %v4186_v53  ;;  %v1021_v59 = vsel %vm344_vm2, %v5015_v46, %v4185_v54  ;;  %v1818_v37 = vld [vmem:[%s5516_s12 + $0x18] sm:$0xff]  ;;  %v3735_v54 = vld [vmem:[#allocation22] ss:$0 sm:$0xff] }
 0x791   :  { %v4189_v52 = vpop.permute.xlu1 %4188  ;;  %v1821_v12 = vpack.c.bf16 %v1818_v37, %v1817_v36 }
 0x792   :  { %v4191_v55 = vunpack.i.h.bf16 %v4189_v52  ;;  %v4190_v56 = vunpack.i.l.bf16 %v4189_v52 }
 0x793   :  { %3992 = vmatpush3.bf16.msra.mxu0 %v1821_v12 }
 0x794   :  { %v1708_v62 = vsel %vm1022_vm3, %v1707_v58, %v4191_v55  ;;  %v1023_v63 = vsel %vm1022_vm3, %v1021_v59, %v4190_v56  ;;  %3993 = vmatprep.subr.bf16.mxu0 %v4688_v0 }
 0x795   :  { %v4194_v57 = vpop.permute.xlu0 %4193 }
 0x796   :  { %v4196_v60 = vunpack.i.h.bf16 %v4194_v57  ;;  %v4195_v61 = vunpack.i.l.bf16 %v4194_v57 }
 0x797   :  { %3994 = vmatpush3.bf16.msra.mxu0 %v1820_v40 }
 0x798   :  { %v1709_v1 = vsel %vm1024_vm4, %v1708_v62, %v4196_v60  ;;  %v1025_v2 = vsel %vm1024_vm4, %v1023_v63, %v4195_v61  ;;  %4007 = vmatprep.subr.mxu0 %v4688_v0  ;;  %v3738_v60 = vld [vmem:[#allocation16] ss:$0 sm:$0xff] }
 0x799   :  { %v1714_v3 = vpack.c.bf16 %v1709_v1, %v1025_v2 }
 0x79b   :  { %3988 = vmatmul.mubr.msk.bf16.vlgmr.msra.gmra.mxu1 %vm295_vm1, %v1714_v3 }
 0x79c   :  { %4003 = vmatprep.mubr.msk.bf16.mxu1 %vm295_vm1, %v1880_v33 }
 0x85b   :  { %v1761_v5 = vpop.f32.mrf.mxu1 }
 0x85c   :  { %v1762_v15 = vadd.f32 %v3732_v4, %v1761_v5 }
 0x85d   :  { %v3989_v6 = vpop.f32.mrf.mxu1 }
 0x85e   :  { %v1768_v9 = vadd.f32 %v1762_v15, %v4919_v7  ;;  %v3736_v15 = vld [vmem:[#allocation13] ss:$0 sm:$0xff] }
 0x85f   :  { %v1764_v46 = vpop.f32.mrf.mxu1 }
 0x860   :  { %v1765_v10 = vadd.f32 %v3732_v4, %v1764_v46  ;;  %v1772_v11 = vsel %vm295_vm1, %v1768_v9, 0.0 }
 0x861   :  { %1773 = vadd.xlane.f32.xlu1 %v1772_v11  ;;  %v3990_v13 = vpop.f32.mrf.mxu1 }
 0x862   :  { %v1769_v14 = vadd.f32 %v1765_v10, %v4921_v8  ;;  %v1883_v8 = vpack.c.bf16 %v1879_v27, %v1878_v26 }
 0x864   :  { %v1775_v16 = vsel %vm295_vm1, %v1769_v14, 0.0  ;;  %3999 = vmatprep.subr.bf16.mxu1 %v1883_v8 }
 0x865   :  { %1776 = vadd.xlane.f32.xlu0 %v1775_v16  ;;  %4000 = vmatpush3.bf16.msra.mxu1 %v1883_v8 }
 0x866   :  { %4001 = vmatprep.subr.bf16.mxu1 %v1882_v30 }
 0x869   :  { %4002 = vmatpush3.bf16.msra.mxu1 %v1882_v30 }
 0x86a   :  { %4021 = vmatprep.subr.mxu1 %v4688_v0 }
 0x86c   :  { %4004 = vmatmul.mubr.msk.bf16.vlgmr.msra.gmra.mxu1 %vm295_vm1, %v1881_v35 }
 0x86d   :  { %4025 = vmatprep.mubr.msk.f32.mxu1 %vm4689_vm0, %v4688_v0 }
 0x8ea   :  { %v1774_v17 = vpop.xlane.xlu1 %1773 }
 0x8eb   :  { %v1779_v18 = vmul.f32 0.03125, %v1774_v17 }
 0x8ed   :  { %v1781_v19 = vsub.f32 %v1768_v9, %v1779_v18 }
 0x8ee   :  { %v1777_v20 = vpop.xlane.xlu0 %1776 }
 0x8ef   :  { %v1780_v21 = vmul.f32 0.03125, %v1777_v20  ;;  %v1783_v22 = vmul.f32 %v1781_v19, %v1781_v19  ;;  %v5182_v20 = vld [vmem:[#allocation8] sm:$0xff] }
 0x8f1   :  { %v1782_v23 = vsub.f32 %v1769_v14, %v1780_v21  ;;  %v1785_v7 = vsel %vm295_vm1, %v1783_v22, 0.0 }
 0x8f2   :  { %1786 = vadd.xlane.f32.xlu0 %v1785_v7 }
 0x8f3   :  { %v1784_v24 = vmul.f32 %v1782_v23, %v1782_v23 }
 0x8f5   :  { %v1788_v25 = vsel %vm295_vm1, %v1784_v24, 0.0 }
 0x8f6   :  { %1789 = vadd.xlane.f32.xlu1 %v1788_v25 }
 0x92c   :  { %v4005_v59 = vpop.f32.mrf.mxu1 }
 0x92d   :  { %v5136_v61 = vadd.f32 %v4005_v59, %v3738_v60 }
 0x92e   :  { %v1931_v62 = vpop.f32.mrf.mxu1 }
 0x92f   :  { %v5138_v63 = vadd.f32 %v3738_v60, %v1931_v62 }
 0x930   :  { %v4006_v1 = vpop.f32.mrf.mxu1 }
 0x931   :  { %2122 = vrot.lane.b32.xlu1 %v5138_v63, %s4693_s30 }
 0x932   :  { %v1934_v2 = vpop.f32.mrf.mxu1 }
 0x933   :  { %v5142_v3 = vadd.f32 %v3738_v60, %v1934_v2 }
 0x935   :  { %2124 = vrot.lane.b32.xlu0 %v5142_v3, %s4693_s30 }
 0x939   :  { %2300 = vrot.lane.b32.xlu0 %v5142_v3, %s4695_s9 }
 0x97b   :  { %v1787_v41 = vpop.xlane.xlu0 %1786 }
 0x97c   :  { %v1791_v42 = vmul.f32 0.03125, %v1787_v41 }
 0x97e   :  { %v1793_v43 = vadd.f32 1e-05, %v1791_v42 }
 0x97f   :  { %v1790_v44 = vpop.xlane.xlu1 %1789 }
 0x980   :  { %4244 = vrsqrt.f32 %v1793_v43  ;;  %v1792_v45 = vmul.f32 0.03125, %v1790_v44 }
 0x982   :  { %v1794_v47 = vadd.f32 1e-05, %v1792_v45 }
 0x984   :  { %4246 = vrsqrt.f32 %v1794_v47 }
 0x98d   :  { %v4245_v48 = vpop.eup %4244 }
 0x98e   :  { %v1797_v49 = vmul.f32 %v4245_v48, %v1781_v19 }
 0x990   :  { %v1805_v53 = vmul.f32 %v3734_v50, %v1797_v49 }
 0x991   :  { %v4247_v51 = vpop.eup %4246 }
 0x992   :  { %v1798_v52 = vmul.f32 %v4247_v51, %v1782_v23  ;;  %v5127_v56 = vadd.f32 %v3735_v54, %v1805_v53 }
 0x994   :  { %v1806_v55 = vmul.f32 %v3734_v50, %v1798_v52 }
 0x996   :  { %v5129_v57 = vadd.f32 %v3735_v54, %v1806_v55 }
 0x998   :  { %v1819_v58 = vpack.c.bf16 %v5129_v57, %v5127_v56 }
 0x99a   :  { %3996 = vmatmul.mubr.msk.bf16.vlgmr.msra.gmra.mxu0 %vm295_vm1, %v1819_v58 }
 0x99b   :  { %4011 = vmatprep.mubr.msk.f32.mxu0 %vm4689_vm0, %v4688_v0  ;;  %4008 = vmatpush3.xpose.msk.msra.mxu0 %vm344_vm2, %v5142_v3 }
 0x99c   :  { %4009 = vmatprep.subr.mxu0 %v4688_v0 }
 0x99f   :  { %4010 = vmatpush3.xpose.msk.msra.mxu0 %vm344_vm2, %v5138_v63 }
 0x9a0   :  { %4014 = vmatprep.subr.mxu0 %v4688_v0 }
 0x9a3   :  { %v2123_v5 = vpop.permute.xlu1 %2122 }
 0x9a7   :  { %v2125_v4 = vpop.permute.xlu0 %2124 }
 0x9a8   :  { %4022 = vmatpush3.xpose.msk.msra.mxu1 %vm344_vm2, %v2125_v4 }
 0x9a9   :  { %4023 = vmatprep.subr.mxu1 %v4688_v0 }
 0x9ab   :  { %v2301_v16 = vpop.permute.xlu0 %2300 }
 0x9ac   :  { %4024 = vmatpush3.xpose.msk.msra.mxu1 %vm344_vm2, %v2123_v5 }
 0x9ad   :  { %4035 = vmatprep.subr.mxu1 %v4688_v0 }
 0xa5a   :  { %v1866_v6 = vpop.f32.mrf.mxu0 }
 0xa5b   :  { %v5158_v9 = vadd.f32 %v3736_v15, %v1866_v6 }
 0xa5c   :  { %v3997_v46 = vpop.f32.mrf.mxu0 }
 0xa5d   :  { %2296 = vrot.lane.b32.xlu0 %v5158_v9, %s4695_s9  ;;  %2120 = vrot.lane.b32.xlu1 %v5158_v9, %s4693_s30 }
 0xa5e   :  { %4012 = vmatmul.mubr.msk.f32.vlgmr.msra.gmra.mxu0 %vm344_vm2, %v5158_v9  ;;  %v1869_v10 = vpop.f32.mrf.mxu0 }
 0xa5f   :  { %v5166_v11 = vadd.f32 %v3736_v15, %v1869_v10  ;;  %4018 = vmatprep.mubr.msk.f32.mxu0 %vm4689_vm0, %v4688_v0 }
 0xa60   :  { %v3998_v13 = vpop.f32.mrf.mxu0 }
 0xa61   :  { %2298 = vrot.lane.b32.xlu1 %v5138_v63, %s4695_s9 }
 0xacf   :  { %v2121_v14 = vpop.permute.xlu1 %2120  ;;  %v2297_v18 = vpop.permute.xlu0 %2296 }
 0xad0   :  { %4026 = vmatmul.mubr.msk.f32.vlgmr.msra.gmra.mxu1 %vm344_vm2, %v2121_v14 }
 0xad1   :  { %4036 = vmatpush3.xpose.msk.msra.mxu1 %vm344_vm2, %v2301_v16  ;;  %4039 = vmatprep.mubr.msk.f32.mxu1 %vm4689_vm0, %v4688_v0 }
 0xad2   :  { %4037 = vmatprep.subr.mxu1 %v4688_v0 }
 0xad3   :  { %v2299_v17 = vpop.permute.xlu1 %2298 }
 0xad5   :  { %4038 = vmatpush3.xpose.msk.msra.mxu1 %vm344_vm2, %v2299_v17 }
 0xad6   :  { %4056 = vmatprep.subr.mxu1 %v4688_v0 }
 0xad8   :  { %4040 = vmatmul.mubr.msk.f32.vlgmr.msra.gmra.mxu1 %vm344_vm2, %v2297_v18 }
 0xad9   :  { %4060 = vmatprep.mubr.msk.f32.mxu1 %vm4689_vm0, %v4688_v0 }
 0xb1e   :  { %v2021_v19 = vpop.f32.mrf.mxu0 }
 0xb1f   :  { %v2025_v21 = vmul.f32 0.35355338, %v2021_v19 }
 0xb20   :  { %v4013_v22 = vpop.f32.mrf.mxu0 }
 0xb21   :  { %v2026_v23 = vadd.f32 %v2025_v21, %v5182_v20 }
 0xb23   :  { %v2028_v7 = vsel %vm2027_vm5, %v2026_v23, -inf }
 0xb24   :  { %2029 = vmax.xlane.f32.xlu1 %v2028_v7 }
 0xb35   :  { %2039 = vrot.lane.b32.xlu1 %v5138_v63, %s4691_s16 }
 0xb39   :  { %2217 = vrot.lane.b32.xlu1 %v5142_v3, %s4692_s28 }
 0xb3d   :  { %2393 = vrot.lane.b32.xlu1 %v5142_v3, %s4694_s4 }
 0xb90   :  { %v2198_v24 = vpop.f32.mrf.mxu1 }
 0xb91   :  { %v2202_v25 = vmul.f32 0.35355338, %v2198_v24 }
 0xb92   :  { %v4027_v26 = vpop.f32.mrf.mxu1 }
 0xb93   :  { %v2203_v27 = vadd.f32 %v2202_v25, %v5182_v20 }
 0xb95   :  { %v2204_v8 = vsel %vm2027_vm5, %v2203_v27, -inf }
 0xb96   :  { %2205 = vmax.xlane.f32.xlu0 %v2204_v8 }
 0xb98   :  { %v2374_v28 = vpop.f32.mrf.mxu1 }
 0xb99   :  { %v2378_v29 = vmul.f32 0.35355338, %v2374_v28 }
 0xb9a   :  { %v4041_v30 = vpop.f32.mrf.mxu1 }
 0xb9b   :  { %v2379_v31 = vadd.f32 %v2378_v29, %v5182_v20  ;;  %v2669_v29 = vrot.slane %v5142_v3, 2 }
 0xb9d   :  { %v2380_v32 = vsel %vm2027_vm5, %v2379_v31, -inf }
 0xb9e   :  { %2381 = vmax.xlane.f32.xlu0 %v2380_v32 }
 0xbad   :  { %v2030_v33 = vpop.xlane.xlu1 %2029 }
 0xbae   :  { %v2031_v34 = vsub.f32 %v2026_v23, %v2030_v33 }
 0xbb0   :  { %v2032_v35 = vmul.f32 1.442695, %v2031_v34 }
 0xbb1   :  { %v2040_v44 = vpop.permute.xlu1 %2039 }
 0xbb2   :  { %4248 = vpow2.f32 %v2032_v35 }
 0xbb4   :  { %2041 = vrot.lane.b32.xlu0 %v5142_v3, %s4691_s16 }
 0xbb5   :  { %v2218_v50 = vpop.permute.xlu1 %2217 }
 0xbb8   :  { %2215 = vrot.lane.b32.xlu0 %v5138_v63, %s4692_s28 }
 0xbb9   :  { %v2394_v51 = vpop.permute.xlu1 %2393 }
 0xbbf   :  { %v4249_v36 = vpop.eup %4248 }
 0xbc0   :  { %v2034_v37 = vsel %vm2027_vm5, %v4249_v36, 0.0 }
 0xbc1   :  { %2035 = vadd.xlane.f32.xlu1 %v2034_v37  ;;  %v5277_v37 = vld [vmem:[#allocation8 + $0x8] sm:$0xff] }
 0xbd2   :  { %2476 = vrot.lane.b32.xlu1 %v5142_v3, %s4697_s5 }
 0xc1f   :  { %v2206_v12 = vpop.xlane.xlu0 %2205 }
 0xc20   :  { %v2207_v38 = vsub.f32 %v2203_v27, %v2206_v12 }
 0xc22   :  { %v2208_v39 = vmul.f32 1.442695, %v2207_v38 }
 0xc24   :  { %4250 = vpow2.f32 %v2208_v39 }
 0xc27   :  { %v2382_v40 = vpop.xlane.xlu0 %2381 }
 0xc28   :  { %v2383_v41 = vsub.f32 %v2379_v31, %v2382_v40 }
 0xc2a   :  { %v2384_v42 = vmul.f32 1.442695, %v2383_v41 }
 0xc2b   :  { %v2042_v43 = vpop.permute.xlu0 %2041 }
 0xc2c   :  { %4252 = vpow2.f32 %v2384_v42  ;;  %4015 = vmatpush3.msk.msra.mxu0 %vm2047_vm6, %v2042_v43 }
 0xc2d   :  { %4016 = vmatprep.subr.mxu0 %v4688_v0 }
 0xc2e   :  { %4017 = vmatpush3.msra.mxu0 %v2040_v44 }
 0xc2f   :  { %4028 = vmatprep.subr.mxu0 %v4688_v0  ;;  %v2216_v55 = vpop.permute.xlu0 %2215 }
 0xc31   :  { %v4251_v45 = vpop.eup %4250 }
 0xc32   :  { %v2210_v47 = vsel %vm2027_vm5, %v4251_v45, 0.0 }
 0xc33   :  { %2211 = vadd.xlane.f32.xlu0 %v2210_v47 }
 0xc39   :  { %v4253_v48 = vpop.eup %4252 }
 0xc3a   :  { %v2386_v49 = vsel %vm2027_vm5, %v4253_v48, 0.0 }
 0xc3b   :  { %2387 = vadd.xlane.f32.xlu1 %v2386_v49 }
 0xc49   :  { %2391 = vrot.lane.b32.xlu0 %v5138_v63, %s4694_s4 }
 0xc4a   :  { %v2036_v52 = vpop.xlane.xlu1 %2035 }
 0xc4b   :  { %4254 = vrcp.f32 %v2036_v52 }
 0xc4c   :  { %2472 = vrot.lane.b32.xlu1 %v5158_v9, %s4697_s5 }
 0xc4d   :  { %2474 = vrot.lane.b32.xlu0 %v5138_v63, %s4697_s5 }
 0xc4e   :  { %v2477_v59 = vpop.permute.xlu1 %2476 }
 0xc58   :  { %v4255_v53 = vpop.eup %4254 }
 0xc59   :  { %v2038_v54 = vmul.f32 %v4255_v53, %v4249_v36 }
 0xc5b   :  { %4019 = vmatmul.mubr.msk.f32.vlgmr.msra.gmra.mxu0 %vm2027_vm5, %v2038_v54 }
 0xc5c   :  { %4029 = vmatpush3.msk.msra.mxu0 %vm2047_vm6, %v2218_v50  ;;  %4032 = vmatprep.mubr.msk.f32.mxu0 %vm4689_vm0, %v4688_v0 }
 0xc5d   :  { %4030 = vmatprep.subr.mxu0 %v4688_v0 }
 0xc5e   :  { %4031 = vmatpush3.msra.mxu0 %v2216_v55 }
 0xc5f   :  { %4042 = vmatprep.subr.mxu0 %v4688_v0 }
 0xcbc   :  { %v2212_v58 = vpop.xlane.xlu0 %2211 }
 0xcbd   :  { %4256 = vrcp.f32 %v2212_v58 }
 0xcc0   :  { %v2392_v2 = vpop.permute.xlu0 %2391 }
 0xcc4   :  { %v2388_v60 = vpop.xlane.xlu1 %2387  ;;  %v2475_v9 = vpop.permute.xlu0 %2474 }
 0xcc5   :  { %4258 = vrcp.f32 %v2388_v60 }
 0xcc8   :  { %v2473_v46 = vpop.permute.xlu1 %2472 }
 0xcca   :  { %v4257_v62 = vpop.eup %4256 }
 0xccb   :  { %v2214_v1 = vmul.f32 %v4257_v62, %v4251_v45 }
 0xccd   :  { %4033 = vmatmul.mubr.msk.f32.vlgmr.msra.gmra.mxu0 %vm2027_vm5, %v2214_v1  ;;  %v2295_v15 = vadd.f32 %v2214_v1, %v2038_v54 }
 0xcce   :  { %4043 = vmatpush3.msk.msra.mxu0 %vm2047_vm6, %v2394_v51  ;;  %4046 = vmatprep.mubr.msk.f32.mxu0 %vm4689_vm0, %v4688_v0 }
 0xccf   :  { %4044 = vmatprep.subr.mxu0 %v4688_v0 }
 0xcd0   :  { %4045 = vmatpush3.msra.mxu0 %v2392_v2 }
 0xcd1   :  { %4049 = vmatprep.subr.mxu0 %v4688_v0 }
 0xcd2   :  { %v4259_v4 = vpop.eup %4258 }
 0xcd3   :  { %v2390_v5 = vmul.f32 %v4259_v4, %v4253_v48 }
 0xcd5   :  { %4047 = vmatmul.mubr.msk.f32.vlgmr.msra.gmra.mxu0 %vm2027_vm5, %v2390_v5  ;;  %v2471_v6 = vadd.f32 %v2390_v5, %v2295_v15 }
 0xcd6   :  { %4050 = vmatpush3.xpose.msk.msra.mxu0 %vm344_vm2, %v2477_v59  ;;  %4053 = vmatprep.mubr.msk.f32.mxu0 %vm4689_vm0, %v4688_v0 }
 0xcd7   :  { %4051 = vmatprep.subr.mxu0 %v4688_v0 }
 0xcda   :  { %4052 = vmatpush3.xpose.msk.msra.mxu0 %vm344_vm2, %v2475_v9 }
 0xcdb   :  { %4070 = vmatprep.subr.mxu0 %v4688_v0 }
 0xcdd   :  { %4054 = vmatmul.mubr.msk.f32.vlgmr.msra.gmra.mxu0 %vm344_vm2, %v2473_v46 }
 0xcde   :  { %4074 = vmatprep.mubr.msk.f32.mxu0 %vm4689_vm0, %v4688_v0 }
 0xd1b   :  { %v5236_v10 = vpop.f32.mrf.mxu0 }
 0xd1d   :  { %v4020_v13 = vpop.f32.mrf.mxu0 }
 0xd8d   :  { %v5238_v14 = vpop.f32.mrf.mxu0 }
 0xd8f   :  { %v4034_v16 = vpop.f32.mrf.mxu0 }
 0xd95   :  { %v5240_v17 = vpop.f32.mrf.mxu0 }
 0xd97   :  { %v4048_v18 = vpop.f32.mrf.mxu0 }
 0xd9d   :  { %v2550_v19 = vpop.f32.mrf.mxu0 }
 0xd9e   :  { %v2554_v21 = vmul.f32 0.35355338, %v2550_v19 }
 0xd9f   :  { %v4055_v22 = vpop.f32.mrf.mxu0 }
 0xda0   :  { %v2555_v23 = vadd.f32 %v2554_v21, %v5182_v20  ;;  %v5250_v20 = vrot.slane %v5136_v61, 2 }
 0xda2   :  { %v2556_v7 = vsel %vm2027_vm5, %v2555_v23, -inf  ;;  %v5256_v30 = vsel %vm2668_vm7, %v2669_v29, %v5250_v20 }
 0xda3   :  { %2557 = vmax.xlane.f32.xlu0 %v2556_v7 }
 0xdb9   :  { %2569 = vrot.lane.b32.xlu0 %v5142_v3, %s4696_s13 }
 0xe2c   :  { %v2558_v24 = vpop.xlane.xlu0 %2557 }
 0xe2d   :  { %v2559_v25 = vsub.f32 %v2555_v23, %v2558_v24 }
 0xe2f   :  { %v2560_v26 = vmul.f32 1.442695, %v2559_v25 }
 0xe30   :  { %v2570_v27 = vpop.permute.xlu0 %2569 }
 0xe31   :  { %4260 = vpow2.f32 %v2560_v26  ;;  %4057 = vmatpush3.msk.msra.mxu1 %vm2047_vm6, %v2570_v27 }
 0xe32   :  { %4058 = vmatprep.subr.mxu1 %v4688_v0 }
 0xe3e   :  { %v4261_v8 = vpop.eup %4260 }
 0xe3f   :  { %v2562_v28 = vsel %vm2027_vm5, %v4261_v8, 0.0 }
 0xe40   :  { %2563 = vadd.xlane.f32.xlu1 %v2562_v28 }
 0xe51   :  { %2567 = vrot.lane.b32.xlu1 %v5138_v63, %s4696_s13 }
 0xe55   :  { %2762 = vrot.lane.b32.xlu1 %v5256_v30, %s4691_s16 }
 0xec9   :  { %v2564_v31 = vpop.xlane.xlu1 %2563 }
 0xeca   :  { %4262 = vrcp.f32 %v2564_v31 }
 0xecd   :  { %v2568_v32 = vpop.permute.xlu1 %2567 }
 0xece   :  { %4059 = vmatpush3.msra.mxu1 %v2568_v32 }
 0xecf   :  { %4063 = vmatprep.subr.mxu1 %v4688_v0 }
 0xed1   :  { %v2763_v45 = vpop.permute.xlu1 %2762 }
 0xed7   :  { %v4263_v61 = vpop.eup %4262 }
 0xed8   :  { %v2566_v33 = vmul.f32 %v4263_v61, %v4261_v8 }
 0xeda   :  { %4061 = vmatmul.mubr.msk.f32.vlgmr.msra.gmra.mxu1 %vm2027_vm5, %v2566_v33  ;;  %v2647_v3 = vadd.f32 %v2566_v33, %v2471_v6 }
 0xedb   :  { %4064 = vmatpush3.xpose.msk.msra.mxu1 %vm344_vm2, %v5250_v20  ;;  %4067 = vmatprep.mubr.msk.f32.mxu1 %vm4689_vm0, %v4688_v0 }
 0xedc   :  { %4065 = vmatprep.subr.mxu1 %v4688_v0  ;;  %v2663_v63 = vmul.f32 0.25, %v2647_v3 }
 0xede   :  { %2664 = vst.msk [vmem:[#allocation29] sm:$0xff] %vm2027_vm5, %v2663_v63 }
 0xedf   :  { %4066 = vmatpush3.xpose.msk.msra.mxu1 %vm344_vm2, %v5256_v30 }
 0xee0   :  { %4084 = vmatprep.subr.mxu1 %v4688_v0 }
 0xee2   :  { %4068 = vmatmul.mubr.msk.f32.vlgmr.msra.gmra.mxu1 %vm344_vm2, %v5166_v11 }
 0xee3   :  { %4088 = vmatprep.mubr.msk.f32.mxu1 %vm4689_vm0, %v4688_v0 }
 0xf9a   :  { %v5275_v34 = vpop.f32.mrf.mxu1 }
 0xf9c   :  { %v4062_v35 = vpop.f32.mrf.mxu1 }
 0xfa2   :  { %v2745_v36 = vpop.f32.mrf.mxu1 }
 0xfa3   :  { %v2749_v12 = vmul.f32 0.35355338, %v2745_v36 }
 0xfa4   :  { %v4069_v38 = vpop.f32.mrf.mxu1 }
 0xfa5   :  { %v2750_v39 = vadd.f32 %v2749_v12, %v5277_v37 }
 0xfa7   :  { %v2751_v40 = vsel %vm2027_vm5, %v2750_v39, -inf }
 0xfa8   :  { %2752 = vmax.xlane.f32.xlu0 %v2751_v40 }
 0xfbe   :  { %2764 = vrot.lane.b32.xlu0 %v5250_v20, %s4691_s16 }
 0xfc2   :  { %2846 = vrot.lane.b32.xlu0 %v5250_v20, %s4693_s30 }
 0xfc6   :  { %2842 = vrot.lane.b32.xlu0 %v5166_v11, %s4693_s30 }
0x1031   :  { %v2753_v41 = vpop.xlane.xlu0 %2752 }
0x1032   :  { %v2754_v42 = vsub.f32 %v2750_v39, %v2753_v41 }
0x1034   :  { %v2755_v43 = vmul.f32 1.442695, %v2754_v42 }
0x1035   :  { %v2765_v44 = vpop.permute.xlu0 %2764 }
0x1036   :  { %4264 = vpow2.f32 %v2755_v43  ;;  %4071 = vmatpush3.msk.msra.mxu0 %vm2047_vm6, %v2765_v44 }
0x1037   :  { %4072 = vmatprep.subr.mxu0 %v4688_v0 }
0x1038   :  { %4073 = vmatpush3.msra.mxu0 %v2763_v45 }
0x1039   :  { %4077 = vmatprep.subr.mxu0 %v4688_v0  ;;  %v2847_v52 = vpop.permute.xlu0 %2846 }
0x103d   :  { %v2843_v54 = vpop.permute.xlu0 %2842 }
0x1043   :  { %v4265_v47 = vpop.eup %4264 }
0x1044   :  { %v2757_v48 = vsel %vm2027_vm5, %v4265_v47, 0.0 }
0x1045   :  { %2758 = vadd.xlane.f32.xlu1 %v2757_v48 }
0x1056   :  { %2844 = vrot.lane.b32.xlu1 %v5256_v30, %s4693_s30 }
0x10ce   :  { %v2759_v49 = vpop.xlane.xlu1 %2758 }
0x10cf   :  { %4266 = vrcp.f32 %v2759_v49 }
0x10d2   :  { %v2845_v53 = vpop.permute.xlu1 %2844 }
0x10dc   :  { %v4267_v50 = vpop.eup %4266 }
0x10dd   :  { %v5293_v51 = vmul.f32 %v4267_v50, %v4265_v47 }
0x10df   :  { %4075 = vmatmul.mubr.msk.f32.vlgmr.msra.gmra.mxu0 %vm2027_vm5, %v5293_v51 }
0x10e0   :  { %4078 = vmatpush3.xpose.msk.msra.mxu0 %vm344_vm2, %v2847_v52  ;;  %4081 = vmatprep.mubr.msk.f32.mxu0 %vm4689_vm0, %v4688_v0 }
0x10e1   :  { %4079 = vmatprep.subr.mxu0 %v4688_v0 }
0x10e4   :  { %4080 = vmatpush3.xpose.msk.msra.mxu0 %vm344_vm2, %v2845_v53 }
0x10e5   :  { %4098 = vmatprep.subr.mxu0 %v4688_v0 }
0x10e7   :  { %4082 = vmatmul.mubr.msk.f32.vlgmr.msra.gmra.mxu0 %vm344_vm2, %v2843_v54 }
0x10e8   :  { %4102 = vmatprep.mubr.msk.f32.mxu0 %vm4689_vm0, %v4688_v0 }
0x119f   :  { %v5306_v55 = vpop.f32.mrf.mxu0 }
0x11a1   :  { %v4076_v58 = vpop.f32.mrf.mxu0 }
0x11a7   :  { %v2920_v59 = vpop.f32.mrf.mxu0 }
0x11a8   :  { %v2924_v60 = vmul.f32 0.35355338, %v2920_v59 }
0x11a9   :  { %v4083_v62 = vpop.f32.mrf.mxu0 }
0x11aa   :  { %v2925_v1 = vadd.f32 %v2924_v60, %v5277_v37 }
0x11ac   :  { %v2926_v2 = vsel %vm2027_vm5, %v2925_v1, -inf }
0x11ad   :  { %2927 = vmax.xlane.f32.xlu1 %v2926_v2  ;;  %v3391_v2 = vld [vmem:[#allocation17 + $0x18] sm:$0xff] }
0x11be   :  { %2937 = vrot.lane.b32.xlu1 %v5256_v30, %s4692_s28 }
0x11c2   :  { %3022 = vrot.lane.b32.xlu1 %v5250_v20, %s4695_s9 }
0x11c6   :  { %3018 = vrot.lane.b32.xlu1 %v5166_v11, %s4695_s9 }
0x11ca   :  { %3113 = vrot.lane.b32.xlu1 %v5256_v30, %s4694_s4 }
0x1236   :  { %v2928_v4 = vpop.xlane.xlu1 %2927 }
0x1237   :  { %v2929_v5 = vsub.f32 %v2925_v1, %v2928_v4  ;;  %v3390_v1 = vld [vmem:[#allocation17 + $0x10] sm:$0xff] }
0x1238   :  { %v3394_v4 = vpack.c.bf16 %v3391_v2, %v3390_v1  ;;  %v3783_v1 = vld [vmem:[#allocation23] ss:$0 sm:$0xff] }
0x1239   :  { %v2930_v15 = vmul.f32 1.442695, %v2929_v5  ;;  %v3388_v5 = vld [vmem:[#allocation17] sm:$0xff] }
0x123a   :  { %v2938_v16 = vpop.permute.xlu1 %2937 }
0x123b   :  { %4268 = vpow2.f32 %v2930_v15  ;;  %v3389_v15 = vld [vmem:[#allocation17 + $0x8] sm:$0xff] }
0x123e   :  { %v3023_v21 = vpop.permute.xlu1 %3022 }
0x1242   :  { %v3019_v23 = vpop.permute.xlu1 %3018 }
0x1246   :  { %v3114_v33 = vpop.permute.xlu1 %3113 }
0x1248   :  { %v4269_v6 = vpop.eup %4268 }
0x1249   :  { %v2932_v9 = vsel %vm2027_vm5, %v4269_v6, 0.0 }
0x124a   :  { %2933 = vadd.xlane.f32.xlu0 %v2932_v9 }
0x1260   :  { %2939 = vrot.lane.b32.xlu0 %v5250_v20, %s4692_s28 }
0x1264   :  { %3020 = vrot.lane.b32.xlu0 %v5256_v30, %s4695_s9 }
0x12d3   :  { %v2934_v46 = vpop.xlane.xlu0 %2933 }
0x12d4   :  { %4270 = vrcp.f32 %v2934_v46 }
0x12d7   :  { %v2940_v13 = vpop.permute.xlu0 %2939 }
0x12d8   :  { %4085 = vmatpush3.msk.msra.mxu1 %vm2047_vm6, %v2940_v13 }
0x12d9   :  { %4086 = vmatprep.subr.mxu1 %v4688_v0 }
0x12da   :  { %4087 = vmatpush3.msra.mxu1 %v2938_v16 }
0x12db   :  { %4091 = vmatprep.subr.mxu1 %v4688_v0  ;;  %v3021_v22 = vpop.permute.xlu0 %3020 }
0x12e1   :  { %v4271_v18 = vpop.eup %4270 }
0x12e2   :  { %v2936_v19 = vmul.f32 %v4271_v18, %v4269_v6  ;;  %v3393_v6 = vpack.c.bf16 %v3389_v15, %v3388_v5  ;;  %v3784_v15 = vld [vmem:[#allocation25] ss:$0 sm:$0xff] }
0x12e4   :  { %4089 = vmatmul.mubr.msk.f32.vlgmr.msra.gmra.mxu1 %vm2027_vm5, %v2936_v19  ;;  %v3017_v12 = vadd.f32 %v2936_v19, %v5293_v51 }
0x12e5   :  { %4092 = vmatpush3.xpose.msk.msra.mxu1 %vm344_vm2, %v3023_v21  ;;  %4095 = vmatprep.mubr.msk.f32.mxu1 %vm4689_vm0, %v4688_v0 }
0x12e6   :  { %4093 = vmatprep.subr.mxu1 %v4688_v0 }
0x12e9   :  { %4094 = vmatpush3.xpose.msk.msra.mxu1 %vm344_vm2, %v3021_v22 }
0x12ea   :  { %4112 = vmatprep.subr.mxu1 %v4688_v0 }
0x12ec   :  { %4096 = vmatmul.mubr.msk.f32.vlgmr.msra.gmra.mxu1 %vm344_vm2, %v3019_v23 }
0x12ed   :  { %4116 = vmatprep.mubr.msk.f32.mxu1 %vm4689_vm0, %v4688_v0 }
0x13a4   :  { %v3013_v7 = vpop.f32.mrf.mxu1 }
0x13a5   :  { %v4197_v50 = vpack.i.bf16 %v3013_v7, %v5238_v14 }
0x13a6   :  { %v4090_v24 = vpop.f32.mrf.mxu1 }
0x13ac   :  { %v3096_v25 = vpop.f32.mrf.mxu1 }
0x13ad   :  { %v3100_v26 = vmul.f32 0.35355338, %v3096_v25 }
0x13ae   :  { %v4097_v27 = vpop.f32.mrf.mxu1 }
0x13af   :  { %v3101_v8 = vadd.f32 %v3100_v26, %v5277_v37 }
0x13b1   :  { %v3102_v28 = vsel %vm2027_vm5, %v3101_v8, -inf }
0x13b2   :  { %3103 = vmax.xlane.f32.xlu0 %v3102_v28 }
0x13c8   :  { %3115 = vrot.lane.b32.xlu0 %v5250_v20, %s4694_s4 }
0x13cc   :  { %3198 = vrot.lane.b32.xlu0 %v5250_v20, %s4697_s5 }
0x13d0   :  { %3194 = vrot.lane.b32.xlu0 %v5166_v11, %s4697_s5 }
0x143b   :  { %v3104_v29 = vpop.xlane.xlu0 %3103 }
0x143c   :  { %v3105_v31 = vsub.f32 %v3101_v8, %v3104_v29 }
0x143e   :  { %v3106_v32 = vmul.f32 1.442695, %v3105_v31 }
0x143f   :  { %v3116_v61 = vpop.permute.xlu0 %3115 }
0x1440   :  { %4272 = vpow2.f32 %v3106_v32  ;;  %4099 = vmatpush3.msk.msra.mxu0 %vm2047_vm6, %v3116_v61 }
0x1441   :  { %4100 = vmatprep.subr.mxu0 %v4688_v0 }
0x1442   :  { %4101 = vmatpush3.msra.mxu0 %v3114_v33 }
0x1443   :  { %4105 = vmatprep.subr.mxu0 %v4688_v0  ;;  %v3199_v38 = vpop.permute.xlu0 %3198 }
0x1447   :  { %v3195_v41 = vpop.permute.xlu0 %3194 }
0x144d   :  { %v4273_v3 = vpop.eup %4272 }
0x144e   :  { %v3108_v63 = vsel %vm2027_vm5, %v4273_v3, 0.0 }
0x144f   :  { %3109 = vadd.xlane.f32.xlu1 %v3108_v63 }
0x1460   :  { %3196 = vrot.lane.b32.xlu1 %v5256_v30, %s4697_s5 }
0x14d8   :  { %v3110_v11 = vpop.xlane.xlu1 %3109 }
0x14d9   :  { %4274 = vrcp.f32 %v3110_v11 }
0x14dc   :  { %v3197_v40 = vpop.permute.xlu1 %3196 }
0x14e6   :  { %v4275_v35 = vpop.eup %4274 }
0x14e7   :  { %v3112_v36 = vmul.f32 %v4275_v35, %v4273_v3 }
0x14e9   :  { %4103 = vmatmul.mubr.msk.f32.vlgmr.msra.gmra.mxu0 %vm2027_vm5, %v3112_v36  ;;  %v3193_v39 = vadd.f32 %v3112_v36, %v3017_v12 }
0x14ea   :  { %4106 = vmatpush3.xpose.msk.msra.mxu0 %vm344_vm2, %v3199_v38  ;;  %4109 = vmatprep.mubr.msk.f32.mxu0 %vm4689_vm0, %v4688_v0 }
0x14eb   :  { %4107 = vmatprep.subr.mxu0 %v4688_v0 }
0x14ee   :  { %4108 = vmatpush3.xpose.msk.msra.mxu0 %vm344_vm2, %v3197_v40 }
0x14ef   :  { %4127 = vmatprep.subr.bf16.mxu0 %v4688_v0 }
0x14f1   :  { %4110 = vmatmul.mubr.msk.f32.vlgmr.msra.gmra.mxu0 %vm344_vm2, %v3195_v41 }
0x14f2   :  { %4131 = vmatprep.mubr.msk.bf16.mxu0 %vm4689_vm0, %v4688_v0 }
0x15a9   :  { %v3189_v42 = vpop.f32.mrf.mxu0 }
0x15ab   :  { %v4104_v43 = vpop.f32.mrf.mxu0 }
0x15b1   :  { %v3272_v44 = vpop.f32.mrf.mxu0 }
0x15b2   :  { %v3276_v45 = vmul.f32 0.35355338, %v3272_v44 }
0x15b3   :  { %v4111_v47 = vpop.f32.mrf.mxu0 }
0x15b4   :  { %v3277_v48 = vadd.f32 %v3276_v45, %v5277_v37  ;;  %v4202_v37 = vpack.i.bf16 %v3189_v42, %v5240_v17 }
0x15b6   :  { %v3278_v49 = vsel %vm2027_vm5, %v3277_v48, -inf }
0x15b7   :  { %3279 = vmax.xlane.f32.xlu1 %v3278_v49 }
0x15c8   :  { %3289 = vrot.lane.b32.xlu1 %v5256_v30, %s4696_s13 }
0x15cc   :  { %4198 = vrot.lane.b32.xlu1 %v4197_v50, %s4673_s26  ;;  %v3492_v50 = vld [vmem:[%s5488_s20] sm:$0xff] }
0x1640   :  { %v3280_v51 = vpop.xlane.xlu1 %3279 }
0x1641   :  { %v3281_v52 = vsub.f32 %v3277_v48, %v3280_v51  ;;  %v3495_v48 = vld [vmem:[%s5488_s20 + $0x18] sm:$0xff]  ;;  %v3493_v51 = vld [vmem:[%s5488_s20 + $0x8] sm:$0xff] }
0x1643   :  { %v3282_v53 = vmul.f32 1.442695, %v3281_v52  ;;  %v3497_v52 = vpack.c.bf16 %v3493_v51, %v3492_v50 }
0x1644   :  { %v3290_v59 = vpop.permute.xlu1 %3289 }
0x1645   :  { %4276 = vpow2.f32 %v3282_v53  ;;  %v3558_v53 = vld [vmem:[%s5490_s22 + $0x30] sm:$0xff] }
0x1648   :  { %v4199_v16 = vpop.permute.xlu1 %4198 }
0x1649   :  { %v4201_v19 = vunpack.i.h.bf16 %v4199_v16  ;;  %v4200_v21 = vunpack.i.l.bf16 %v4199_v16  ;;  %v3556_v16 = vld [vmem:[%s5490_s22 + $0x20] sm:$0xff] }
0x164b   :  { %v3382_v24 = vsel %vm344_vm2, %v5306_v55, %v4201_v19  ;;  %v2660_v25 = vsel %vm344_vm2, %v5236_v10, %v4200_v21  ;;  %v3781_v55 = vld [vmem:[#allocation19] ss:$0 sm:$0xff] }
0x164c   :  { %v3554_v21 = vld [vmem:[%s5490_s22 + $0x10] sm:$0xff] }
0x1652   :  { %v4277_v54 = vpop.eup %4276 }
0x1653   :  { %v3284_v58 = vsel %vm2027_vm5, %v4277_v54, 0.0 }
0x1654   :  { %3285 = vadd.xlane.f32.xlu0 %v3284_v58 }
0x166a   :  { %3291 = vrot.lane.b32.xlu0 %v5250_v20, %s4696_s13 }
0x166e   :  { %4203 = vrot.lane.b32.xlu0 %v4202_v37, %s4701_s11 }
0x16dd   :  { %v3286_v30 = vpop.xlane.xlu0 %3285 }
0x16de   :  { %4278 = vrcp.f32 %v3286_v30 }
0x16e1   :  { %v3292_v14 = vpop.permute.xlu0 %3291 }
0x16e2   :  { %4113 = vmatpush3.msk.msra.mxu1 %vm2047_vm6, %v3292_v14 }
0x16e3   :  { %4114 = vmatprep.subr.mxu1 %v4688_v0 }
0x16e4   :  { %4115 = vmatpush3.msra.mxu1 %v3290_v59 }
0x16e5   :  { %4119 = vmatprep.subr.bf16.mxu1 %v4688_v0  ;;  %v4204_v18 = vpop.permute.xlu0 %4203 }
0x16e6   :  { %v4206_v22 = vunpack.i.h.bf16 %v4204_v18  ;;  %v4205_v23 = vunpack.i.l.bf16 %v4204_v18  ;;  %v3557_v18 = vld [vmem:[%s5490_s22 + $0x28] sm:$0xff] }
0x16e7   :  { %v3563_v19 = vpack.c.bf16 %v3557_v18, %v3556_v16 }
0x16e8   :  { %v3383_v8 = vsel %vm1022_vm3, %v3382_v24, %v4206_v22  ;;  %v3555_v22 = vld [vmem:[%s5490_s22 + $0x18] sm:$0xff]  ;;  %v3553_v24 = vld [vmem:[%s5490_s22 + $0x8] sm:$0xff] }
0x16eb   :  { %v4279_v60 = vpop.eup %4278 }
0x16ec   :  { %v3288_v62 = vmul.f32 %v4279_v60, %v4277_v54  ;;  %v3559_v54 = vld [vmem:[%s5490_s22 + $0x38] sm:$0xff] }
0x16ed   :  { %v3564_v58 = vpack.c.bf16 %v3559_v54, %v3558_v53 }
0x16ee   :  { %4117 = vmatmul.mubr.msk.f32.vlgmr.msra.gmra.mxu1 %vm2027_vm5, %v3288_v62  ;;  %v3369_v20 = vadd.f32 %v3288_v62, %v3193_v39 }
0x16ef   :  { %4123 = vmatprep.mubr.msk.bf16.mxu1 %vm4689_vm0, %v4688_v0  ;;  %4120 = vmatpush3.bf16.msra.mxu1 %v3394_v4 }
0x16f0   :  { %v3385_v17 = vmul.f32 0.25, %v3369_v20  ;;  %4121 = vmatprep.subr.bf16.mxu1 %v4688_v0 }
0x16f2   :  { %3387 = vst.msk [vmem:[#allocation29 + $0x8] sm:$0xff] %vm2027_vm5, %v3385_v17 }
0x16f3   :  { %4122 = vmatpush3.bf16.msra.mxu1 %v3393_v6 }
0x16f4   :  { %4135 = vmatprep.subr.bf16.mxu1 %v4688_v0 }
0x17ae   :  { %v3365_v9 = vpop.f32.mrf.mxu1 }
0x17af   :  { %v4207_v46 = vpack.i.bf16 %v3365_v9, %v5275_v34  ;;  %v2661_v34 = vsel %vm1022_vm3, %v2660_v25, %v4205_v23  ;;  %v3562_v23 = vpack.c.bf16 %v3555_v22, %v3554_v21 }
0x17b0   :  { %v4118_v13 = vpop.f32.mrf.mxu1 }
0x17b1   :  { %4208 = vrot.lane.b32.xlu1 %v4207_v46, %s4702_s8 }
0x1823   :  { %v4209_v7 = vpop.permute.xlu1 %4208 }
0x1824   :  { %v4211_v26 = vunpack.i.h.bf16 %v4209_v7  ;;  %v4210_v27 = vunpack.i.l.bf16 %v4209_v7  ;;  %v3552_v7 = vld [vmem:[%s5490_s22] sm:$0xff] }
0x1825   :  { %v3561_v25 = vpack.c.bf16 %v3553_v24, %v3552_v7 }
0x1826   :  { %v2662_v28 = vsel %vm1024_vm4, %v2661_v34, %v4210_v27  ;;  %v3384_v29 = vsel %vm1024_vm4, %v3383_v8, %v4211_v26  ;;  %v3785_v26 = vld [vmem:[%s5489_s21] ss:$0 sm:$0xff]  ;;  %s4703_s21 = smov [#allocation29]  }
0x1827   :  { %v3392_v31 = vpack.c.bf16 %v3384_v29, %v2662_v28  ;;  %s3682_s22 = sshll.u32 %s4703_s21, 4  ;;  %s3683_s22 = int_to_ptr.vmem [resolvable:$true] %s3682_s22 }
0x1828   :  { %p4613_p11 = scmp.lt.s32.totalorder %s3683_s22, %s3683_s22 }
0x1829   :  { %4124 = vmatmul.mubr.msk.bf16.vlgmr.msra.gmra.mxu1 %vm295_vm1, %v3392_v31 }
0x182a   :  { %4143 = vmatprep.mubr.msk.bf16.mxu1 %vm4689_vm0, %v4688_v0  ;;  %4136 = vmatpush3.bf16.msra.mxu1 %v3564_v58 }
0x182b   :  { %4137 = vmatprep.subr.bf16.mxu1 %v4688_v0 }
0x182e   :  { %4138 = vmatpush3.bf16.msra.mxu1 %v3563_v19 }
0x182f   :  { %4139 = vmatprep.subr.bf16.mxu1 %v4688_v0 }
0x1832   :  { %4140 = vmatpush3.bf16.msra.mxu1 %v3562_v23 }
0x1833   :  { %4141 = vmatprep.subr.bf16.mxu1 %v4688_v0 }
0x1836   :  { %4142 = vmatpush3.bf16.msra.mxu1 %v3561_v25 }
0x18e9   :  { %v3439_v32 = vpop.f32.mrf.mxu1 }
0x18ea   :  { %v3440_v61 = vadd.f32 %v3781_v55, %v3439_v32 }
0x18eb   :  { %v4125_v10 = vpop.f32.mrf.mxu1 }
0x18ec   :  { %v3446_v33 = vadd.f32 %v3440_v61, %v5127_v56  ;;  %v3787_v61 = vld [vmem:[%s5491_s23] ss:$0 sm:$0xff]  ;;  %s4608_s23 = scalar_lea.vmem %s3683_s22, 256 }
0x18ed   :  { %v3442_v3 = vpop.f32.mrf.mxu1  ;;  %p4609_p10 = scmp.ne.s32.totalorder %s3683_s22, %s4608_s23  ;;  %p4614_p12 = scmp.lt.s32.totalorder %s4608_s23, %s4608_s23 }
0x18ee   :  { %v3443_v63 = vadd.f32 %v3781_v55, %v3442_v3  ;;  %v3450_v11 = vsel %vm295_vm1, %v3446_v33, 0.0 }
0x18ef   :  { %3451 = vadd.xlane.f32.xlu0 %v3450_v11  ;;  %v4126_v35 = vpop.f32.mrf.mxu1  ;;  %p4615_p13 = por %p4614_p12, %p4613_p11 }
0x18f0   :  { %v3447_v36 = vadd.f32 %v3443_v63, %v5129_v57  ;;  %v3494_v57 = vld [vmem:[%s5488_s20 + $0x10] sm:$0xff] }
0x18f1   :  { %v3498_v49 = vpack.c.bf16 %v3495_v48, %v3494_v57  ;;  %p4616_p0 = pnand %p4615_p13, %p4609_p10 }
0x18f2   :  { %v3453_v12 = vsel %vm295_vm1, %v3447_v36, 0.0 }
0x18f3   :  { %3454 = vadd.xlane.f32.xlu1 %v3453_v12  ;;  %4128 = vmatpush3.bf16.msra.mxu0 %v3498_v49 }
0x18f4   :  { %4129 = vmatprep.subr.bf16.mxu0 %v4688_v0 }
0x18f7   :  { %4130 = vmatpush3.bf16.msra.mxu0 %v3497_v52 }
0x1978   :  { %v3452_v38 = vpop.xlane.xlu0 %3451 }
0x1979   :  { %v3456_v39 = vmul.f32 0.03125, %v3452_v38 }
0x197b   :  { %v3458_v40 = vsub.f32 %v3446_v33, %v3456_v39 }
0x197c   :  { %v3455_v41 = vpop.xlane.xlu1 %3454 }
0x197d   :  { %v3457_v42 = vmul.f32 0.03125, %v3455_v41  ;;  %v3460_v43 = vmul.f32 %v3458_v40, %v3458_v40 }
0x197f   :  { %v3459_v44 = vsub.f32 %v3447_v36, %v3457_v42  ;;  %v3462_v56 = vsel %vm295_vm1, %v3460_v43, 0.0 }
0x1980   :  { %3463 = vadd.xlane.f32.xlu0 %v3462_v56 }
0x1981   :  { %v3461_v45 = vmul.f32 %v3459_v44, %v3459_v44 }
0x1983   :  { %v3465_v47 = vsel %vm295_vm1, %v3461_v45, 0.0 }
0x1984   :  { %3466 = vadd.xlane.f32.xlu0 %v3465_v47 }
0x1a09   :  { %v3464_v37 = vpop.xlane.xlu0 %3463 }
0x1a0a   :  { %v3468_v30 = vmul.f32 0.03125, %v3464_v37 }
0x1a0c   :  { %v3470_v14 = vadd.f32 1e-05, %v3468_v30 }
0x1a0d   :  { %v3467_v59 = vpop.xlane.xlu0 %3466 }
0x1a0e   :  { %4280 = vrsqrt.f32 %v3470_v14  ;;  %v3469_v60 = vmul.f32 0.03125, %v3467_v59 }
0x1a10   :  { %v3471_v62 = vadd.f32 1e-05, %v3469_v60 }
0x1a12   :  { %4282 = vrsqrt.f32 %v3471_v62 }
0x1a1b   :  { %v4281_v20 = vpop.eup %4280 }
0x1a1c   :  { %v3474_v17 = vmul.f32 %v4281_v20, %v3458_v40 }
0x1a1e   :  { %v3482_v5 = vmul.f32 %v3783_v1, %v3474_v17 }
0x1a1f   :  { %v4283_v2 = vpop.eup %4282 }
0x1a20   :  { %v3475_v4 = vmul.f32 %v4283_v2, %v3459_v44  ;;  %v3490_v9 = vadd.f32 %v3784_v15, %v3482_v5 }
0x1a22   :  { %v3483_v6 = vmul.f32 %v3783_v1, %v3475_v4 }
0x1a24   :  { %v3491_v46 = vadd.f32 %v3784_v15, %v3483_v6 }
0x1a26   :  { %v3496_v13 = vpack.c.bf16 %v3491_v46, %v3490_v9 }
0x1a28   :  { %4132 = vmatmul.mubr.msk.bf16.vlgmr.msra.gmra.mxu0 %vm295_vm1, %v3496_v13 }
0x1ae8   :  { %v3543_v27 = vpop.f32.mrf.mxu0 }
0x1ae9   :  { %v3544_v8 = vadd.f32 %v3785_v26, %v3543_v27 }
0x1aea   :  { %v4133_v34 = vpop.f32.mrf.mxu0 }
0x1aeb   :  { %v3550_v31 = vmax.f32 %v3544_v8, 0.0 }
0x1aec   :  { %v3546_v28 = vpop.f32.mrf.mxu0 }
0x1aed   :  { %v3547_v29 = vadd.f32 %v3785_v26, %v3546_v28 }
0x1aee   :  { %v4134_v0 = vpop.f32.mrf.mxu0 }
0x1aef   :  { %v3551_v55 = vmax.f32 %v3547_v29, 0.0 }
0x1af1   :  { %v3560_v32 = vpack.c.bf16 %v3551_v55, %v3550_v31 }
0x1af3   :  { %4144 = vmatmul.mubr.msk.bf16.vlgmr.msra.gmra.mxu1 %vm3572_vm8, %v3560_v32 }
0x1bb3   :  { %v3610_v10 = vpop.f32.mrf.mxu1 }
0x1bb4   :  { %v3611_v33 = vadd.f32 %v3787_v61, %v3610_v10 }
0x1bb5   :  { %v4145_v3 = vpop.f32.mrf.mxu1 }
0x1bb6   :  { %v3617_v63 = vadd.f32 %v3611_v33, %v3490_v9 }
0x1bb7   :  { %v3613_v11 = vpop.f32.mrf.mxu1 }
0x1bb8   :  { %v3614_v35 = vadd.f32 %v3787_v61, %v3613_v11  ;;  %v3621_v36 = vsel %vm295_vm1, %v3617_v63, 0.0 }
0x1bb9   :  { %3622 = vadd.xlane.f32.xlu1 %v3621_v36  ;;  %v4146_v12 = vpop.f32.mrf.mxu1 }
0x1bba   :  { %v3618_v38 = vadd.f32 %v3614_v35, %v3491_v46 }
0x1bbc   :  { %v3624_v39 = vsel %vm295_vm1, %v3618_v38, 0.0 }
0x1bbd   :  { %3625 = vadd.xlane.f32.xlu0 %v3624_v39 }
0x1c42   :  { %v3623_v40 = vpop.xlane.xlu1 %3622 }
0x1c43   :  { %v3627_v41 = vmul.f32 0.03125, %v3623_v40 }
0x1c45   :  { %v3629_v42 = vsub.f32 %v3617_v63, %v3627_v41 }
0x1c46   :  { %v3626_v43 = vpop.xlane.xlu0 %3625 }
0x1c47   :  { %v3628_v44 = vmul.f32 0.03125, %v3626_v43  ;;  %v3631_v56 = vmul.f32 %v3629_v42, %v3629_v42 }
0x1c49   :  { %v3630_v45 = vsub.f32 %v3618_v38, %v3628_v44  ;;  %v3633_v47 = vsel %vm295_vm1, %v3631_v56, 0.0 }
0x1c4a   :  { %3634 = vadd.xlane.f32.xlu1 %v3633_v47 }
0x1c4b   :  { %v3632_v57 = vmul.f32 %v3630_v45, %v3630_v45 }
0x1c4d   :  { %v3636_v48 = vsel %vm295_vm1, %v3632_v57, 0.0 }
0x1c4e   :  { %3637 = vadd.xlane.f32.xlu0 %v3636_v48 }
0x1c4f   :  { %4619 = shalt.err (!%p4616_p0)
}
0x1c50   :  { %3688 = dma.vmem_to_hbm [thread:$0]  %s3683_s22, 256, %s5493_s25, [#allocation30], %s4672_s3, %s4672_s3, %s4673_s26   ;;  %v3789_v37 = vld [vmem:[#allocation26] ss:$0 sm:$0xff] }
0x1c51   :  { %v3790_v14 = vld [vmem:[%s5487_s19] ss:$0 sm:$0xff]  ;;  %s4704_s25 = smov [#allocation28]  }
0x1c52   :  { %s3670_s10 = sshll.u32 %s4704_s25, 4  ;;  %s3671_s10 = int_to_ptr.vmem [resolvable:$true] %s3670_s10 }
0x1c53   :  { %s4628_s7 = scalar_lea.vmem %s3671_s10, 256  ;;  %p4633_p2 = scmp.lt.s32.totalorder %s3671_s10, %s3671_s10 }
0x1c54   :  { %p4629_p1 = scmp.ne.s32.totalorder %s3671_s10, %s4628_s7  ;;  %p4634_p3 = scmp.lt.s32.totalorder %s4628_s7, %s4628_s7 }
0x1c56   :  { %p4635_p4 = por %p4634_p3, %p4633_p2 }
0x1c58   :  { %p4636_p5 = pnand %p4635_p4, %p4629_p1 }
0x1cd3   :  { %v3635_v49 = vpop.xlane.xlu1 %3634 }
0x1cd4   :  { %v3639_v50 = vmul.f32 0.03125, %v3635_v49 }
0x1cd6   :  { %v3641_v51 = vadd.f32 1e-05, %v3639_v50 }
0x1cd7   :  { %v3638_v52 = vpop.xlane.xlu0 %3637 }
0x1cd8   :  { %4284 = vrsqrt.f32 %v3641_v51  ;;  %v3640_v53 = vmul.f32 0.03125, %v3638_v52 }
0x1cda   :  { %v3642_v54 = vadd.f32 1e-05, %v3640_v53 }
0x1cdc   :  { %4286 = vrsqrt.f32 %v3642_v54 }
0x1ce5   :  { %v4285_v58 = vpop.eup %4284 }
0x1ce6   :  { %v3645_v30 = vmul.f32 %v4285_v58, %v3629_v42 }
0x1ce8   :  { %v3653_v59 = vmul.f32 %v3789_v37, %v3645_v30 }
0x1ce9   :  { %v4287_v60 = vpop.eup %4286 }
0x1cea   :  { %v3646_v62 = vmul.f32 %v4287_v60, %v3630_v45  ;;  %v3661_v20 = vadd.f32 %v3790_v14, %v3653_v59 }
0x1cec   :  { %v3654_v17 = vmul.f32 %v3789_v37, %v3646_v62  ;;  %3663 = vst.msk [vmem:[#allocation28] sm:$0xff] %vm295_vm1, %v3661_v20 }
0x1cee   :  { %v3662_v1 = vadd.f32 %v3790_v14, %v3654_v17 }
0x1cf0   :  { %3664 = vst.msk [vmem:[#allocation28 + $0x8] sm:$0xff] %vm295_vm1, %v3662_v1 }
0x1cf1   :  { %4639 = shalt.err (!%p4636_p5)
}
0x1cf2   :  { %3676 = dma.vmem_to_hbm [thread:$0]  %s3671_s10, 256, %s5492_s24, [#allocation4], %s4672_s3, %s4672_s3, %s4673_s26  }
0x1cf3   :  { %4666 = dma.done.wait [#allocation4], 256  }
0x1cf4   :  { %4667 = vsyncadd [#allocation4], 4294967040 }
0x1cf5   :  { %4668 = dma.done.wait [#allocation30], 256  }
0x1cf6   :  { %4669 = vsyncadd [#allocation30], 4294967040 }
0x1cf7   :  { %3695 = vsyncpa [#allocation3], 1 }
0x1cf8   :  { %3696 = vsyncpa [#allocation6], 1 }
0x1cf9   :  { %3697 = vsyncpa [#allocation9], 1 }
0x1cfa   :  { %3698 = vsyncpa [#allocation12], 1 }
0x1cfb   :  { %3699 = vsyncpa [#allocation15], 1 }
0x1cfc   :  { %3700 = vsyncpa [#allocation18], 1 }
0x1cfd   :  { %3701 = vsyncpa [#allocation21], 1 }
0x1cfe   :  { %3702 = vsyncpa [#allocation24], 1 }
0x1cff   :  { %3703 = vsyncpa [#allocation27], 1 }
0x1d00   :  { %3704 = vsyncpa [#allocation4], 1 }
0x1d01   :  { %3705 = vsyncpa [#allocation30], 1 }

</bundles_post_ra>
